<compile_context>
chip_gen: v7x
topology: tpu7x:2x2x1
jax: 0.10.0
libtpu: 0.0.40
codegen_flags: <defaults>
</compile_context>

<pallas_src>
import functools

import jax
import jax.numpy as jnp
from jax.experimental import pallas as pl
from jax.experimental.pallas import tpu as pltpu


def _round_up(x, m):
    return (x + m - 1) // m * m


# ---------------------------------------------------------------------------
# Batched conv GEMM:  out[n, :, s_tile] += W(Cout, TK) @ P[n, TK, s_tile]
# bf16 operands, f32 accumulation directly into the resident output block.
# ---------------------------------------------------------------------------
def _conv_gemm_kernel(w_ref, p_ref, o_ref):
    @pl.when(pl.program_id(2) == 0)
    def _init():
        o_ref[...] = jnp.zeros_like(o_ref)

    o_ref[0] += jnp.dot(w_ref[...], p_ref[0],
                        preferred_element_type=jnp.float32)


def conv_gemm(w_mat, patches):
    """w_mat: (Cout, K); patches: (N, K, S) -> (N, Cout, S) float32."""
    Cout, K = w_mat.shape
    N, K2, S = patches.shape
    assert K == K2
    # K tiling: a single full-K block when small (no padding), otherwise pad to
    # a multiple of 512 and reduce over a K grid axis (bounded VMEM, pipelined).
    if K <= 1024:
        tk, Kp = K, K
    else:
        tk = 512
        Kp = _round_up(K, tk)
    # S tiling: lane axis.  Multiples of 128 when possible (lane-dense stores,
    # >=2 parallel blocks for megacore); otherwise the full extent.
    ts = 128 if (S % 128 == 0 and S > 128) else S

    w_p = w_mat if Kp == K else jnp.pad(w_mat, ((0, 0), (0, Kp - K)))
    p_p = patches if Kp == K else jnp.pad(patches, ((0, 0), (0, Kp - K), (0, 0)))
    w_p = w_p.astype(jnp.bfloat16)
    p_p = p_p.astype(jnp.bfloat16)

    return pl.pallas_call(
        _conv_gemm_kernel,
        out_shape=jax.ShapeDtypeStruct((N, Cout, S), jnp.float32),
        grid=(N, S // ts, Kp // tk),
        in_specs=[pl.BlockSpec((Cout, tk), lambda n, s, k: (0, k)),
                  pl.BlockSpec((1, tk, ts), lambda n, s, k: (n, k, s))],
        out_specs=pl.BlockSpec((1, Cout, ts), lambda n, s, k: (n, 0, s)),
        compiler_params=pltpu.CompilerParams(
            dimension_semantics=("parallel", "parallel", "arbitrary")),
    )(w_p, p_p)


# ---------------------------------------------------------------------------
# GroupNorm (optionally fused ReLU): one (sample, group) block per grid step.
# ---------------------------------------------------------------------------
def _group_norm_kernel(x_ref, g_ref, b_ref, o_ref, *, eps, relu):
    cg, s = x_ref.shape[2], x_ref.shape[3]
    x = x_ref[...].reshape(cg, s)
    g = g_ref[...].reshape(cg, 1)
    b = b_ref[...].reshape(cg, 1)
    mean = jnp.mean(x, keepdims=True)
    var = jnp.mean(jnp.square(x - mean), keepdims=True)
    y = (x - mean) * jax.lax.rsqrt(var + eps)
    y = y * g + b                          # per-channel affine, lane-broadcast
    if relu:
        y = jnp.maximum(y, 0.0)
    o_ref[...] = y.reshape(x_ref.shape)


def group_norm(x, gamma, beta, *, num_groups=2, eps=1e-5, relu=False):
    """x: (N, C, D, H, W) f32 -> same shape.  Per-(sample, group) statistics."""
    N, C, D, H, W = x.shape
    G = num_groups
    Cg = C // G
    S = D * H * W
    xr = x.reshape(N, G, Cg, S)
    g = gamma.reshape(G, Cg, 1).astype(jnp.float32)
    b = beta.reshape(G, Cg, 1).astype(jnp.float32)
    # TODO(synk): for very large spatial sizes a 2-pass tiled reduction would be
    # needed so a single (Cg, S) block need not fit VMEM; fine at these shapes.
    out = pl.pallas_call(
        functools.partial(_group_norm_kernel, eps=eps, relu=relu),
        out_shape=jax.ShapeDtypeStruct((N, G, Cg, S), jnp.float32),
        grid=(N, G),
        in_specs=[pl.BlockSpec((1, 1, Cg, S), lambda n, gg: (n, gg, 0, 0)),
                  pl.BlockSpec((1, Cg, 1), lambda n, gg: (gg, 0, 0)),
                  pl.BlockSpec((1, Cg, 1), lambda n, gg: (gg, 0, 0))],
        out_specs=pl.BlockSpec((1, 1, Cg, S), lambda n, gg: (n, gg, 0, 0)),
        compiler_params=pltpu.CompilerParams(
            dimension_semantics=("parallel", "parallel")),
    )(xr, g, b)
    return out.reshape(N, C, D, H, W)


# ---------------------------------------------------------------------------
# BatchNorm (training-mode batch stats) fused with residual add + ReLU.
# Pass 1: tiled per-channel sum / sum-of-squares.  Pass 2: fused epilogue.
# ---------------------------------------------------------------------------
def _bn_stats_kernel(x_ref, sum_ref, sq_ref):
    @pl.when(jnp.logical_and(pl.program_id(0) == 0, pl.program_id(1) == 0))
    def _init():
        sum_ref[...] = jnp.zeros_like(sum_ref)
        sq_ref[...] = jnp.zeros_like(sq_ref)

    c, ts = x_ref.shape[1], x_ref.shape[2]
    x = x_ref[...].reshape(c, ts)
    sum_ref[...] += jnp.sum(x, axis=-1, keepdims=True)
    sq_ref[...] += jnp.sum(x * x, axis=-1, keepdims=True)


def _bn_apply_kernel(x_ref, r_ref, scale_ref, shift_ref, o_ref):
    o_ref[...] = jnp.maximum(
        x_ref[...] * scale_ref[...] + shift_ref[...] + r_ref[...], 0.0)


def batch_norm_add_relu(x, res, gamma, beta, *, eps=1e-5):
    """relu(BatchNorm3d(x) + res) with batch statistics (fresh PyTorch module).
    TODO(synk): running_mean/running_var tracking (training side effect) is not
    modeled."""
    N, C, D, H, W = x.shape
    S = D * H * W
    ts = 128 if (S % 128 == 0 and S > 128) else S
    xr = x.reshape(N, C, S)
    rr = res.reshape(N, C, S)

    sums, sqs = pl.pallas_call(
        _bn_stats_kernel,
        out_shape=(jax.ShapeDtypeStruct((C, 1), jnp.float32),
                   jax.ShapeDtypeStruct((C, 1), jnp.float32)),
        grid=(N, S // ts),
        in_specs=[pl.BlockSpec((1, C, ts), lambda n, s: (n, 0, s))],
        out_specs=(pl.BlockSpec((C, 1), lambda n, s: (0, 0)),
                   pl.BlockSpec((C, 1), lambda n, s: (0, 0))),
        compiler_params=pltpu.CompilerParams(
            dimension_semantics=("arbitrary", "arbitrary")),
    )(xr)

    cnt = float(N * S)
    mean = sums / cnt
    var = sqs / cnt - mean * mean            # biased variance (training norm)
    scale = gamma.reshape(C, 1).astype(jnp.float32) * jax.lax.rsqrt(var + eps)
    shift = beta.reshape(C, 1).astype(jnp.float32) - mean * scale

    out = pl.pallas_call(
        _bn_apply_kernel,
        out_shape=jax.ShapeDtypeStruct((N, C, S), jnp.float32),
        grid=(N, S // ts),
        in_specs=[pl.BlockSpec((1, C, ts), lambda n, s: (n, 0, s)),
                  pl.BlockSpec((1, C, ts), lambda n, s: (n, 0, s)),
                  pl.BlockSpec((C, 1), lambda n, s: (0, 0)),
                  pl.BlockSpec((C, 1), lambda n, s: (0, 0))],
        out_specs=pl.BlockSpec((1, C, ts), lambda n, s: (n, 0, s)),
        compiler_params=pltpu.CompilerParams(
            dimension_semantics=("parallel", "parallel")),
    )(xr, rr, scale, shift)
    return out.reshape(N, C, D, H, W)


# ---------------------------------------------------------------------------
# Convolutions (im2col glue in bf16, GEMM in Pallas)
# ---------------------------------------------------------------------------
def conv3d(x, w, stride, pad):
    """x: (N, Cin, D, H, W);  w: (Cout, Cin, kD, kH, kW);  no bias."""
    N, Cin, D, H, W = x.shape
    Cout, Cin2, kD, kH, kW = w.shape
    assert Cin == Cin2
    Do = (D + 2 * pad - kD) // stride + 1
    Ho = (H + 2 * pad - kH) // stride + 1
    Wo = (W + 2 * pad - kW) // stride + 1
    xb = x.astype(jnp.bfloat16)
    if kD == kH == kW == 1 and stride == 1 and pad == 0:
        patches = xb.reshape(N, Cin, D * H * W)
        w_mat = w.reshape(Cout, Cin)
    else:
        xp = jnp.pad(xb, ((0, 0), (0, 0), (pad, pad), (pad, pad), (pad, pad)))
        taps = []
        for kd in range(kD):
            for kh in range(kH):
                for kw in range(kW):
                    taps.append(
                        xp[:, :,
                           kd:kd + stride * (Do - 1) + 1:stride,
                           kh:kh + stride * (Ho - 1) + 1:stride,
                           kw:kw + stride * (Wo - 1) + 1:stride]
                        .reshape(N, Cin, Do * Ho * Wo))
        patches = jnp.concatenate(taps, axis=1)          # (N, k^3*Cin, S) bf16
        w_mat = w.transpose(0, 2, 3, 4, 1).reshape(Cout, kD * kH * kW * Cin)
    out = conv_gemm(w_mat, patches)
    return out.reshape(N, Cout, Do, Ho, Wo)


def conv_transpose3d_s2(x, w):
    """ConvTranspose3d(kernel=3, stride=2, padding=1, output_padding=1, bias=False)
    via the sub-pixel (parity) decomposition (no zero-stuffed GEMM work).
    x: (N, Cin, D, H, W);  w: (Cin, Cout, 3, 3, 3) -> (N, Cout, 2D, 2H, 2W)."""
    N, Cin, D, H, W = x.shape
    Cin2, Cout = w.shape[:2]
    assert Cin == Cin2
    xb = x.astype(jnp.bfloat16)
    xp = jnp.pad(xb, ((0, 0), (0, 0), (0, 1), (0, 1), (0, 1)))
    # out[2q + r] = x[q]*w[...,1]                      (r == 0)
    #             = x[q]*w[...,2] + x[q+1]*w[...,0]    (r == 1)
    taps = {0: ((1, 0),), 1: ((2, 0), (0, 1))}
    parts = []
    for rd in (0, 1):
        for rh in (0, 1):
            for rw in (0, 1):
                p_list, w_list = [], []
                for kd, od in taps[rd]:
                    for kh, oh in taps[rh]:
                        for kw, ow in taps[rw]:
                            p_list.append(
                                xp[:, :, od:od + D, oh:oh + H, ow:ow + W]
                                .reshape(N, Cin, D * H * W))
                            w_list.append(w[:, :, kd, kh, kw].T)  # (Cout, Cin)
                patches = jnp.concatenate(p_list, axis=1)
                w_mat = jnp.concatenate(w_list, axis=1)
                parts.append(conv_gemm(w_mat, patches).reshape(N, Cout, D, H, W))
    out = jnp.stack(parts, axis=0).reshape(2, 2, 2, N, Cout, D, H, W)
    out = out.transpose(3, 4, 5, 0, 6, 1, 7, 2)   # (N, Cout, D, 2, H, 2, W, 2)
    return out.reshape(N, Cout, 2 * D, 2 * H, 2 * W)


# ---------------------------------------------------------------------------
# hourglass module
# ---------------------------------------------------------------------------
def init_hourglass_params(key, c):
    keys = jax.random.split(key, 16)

    def conv_w(k, cout, cin, ks):
        fan = cin * ks ** 3
        return jax.random.normal(k, (cout, cin, ks, ks, ks),
                                 jnp.float32) * (2.0 / fan) ** 0.5

    def tconv_w(k, cin, cout, ks):
        fan = cin * ks ** 3
        return jax.random.normal(k, (cin, cout, ks, ks, ks),
                                 jnp.float32) * (2.0 / fan) ** 0.5

    def affine(k, ch):
        k1, k2 = jax.random.split(k)
        return (1.0 + 0.1 * jax.random.normal(k1, (ch,), jnp.float32),
                0.1 * jax.random.normal(k2, (ch,), jnp.float32))

    p = {}
    p['w1'] = conv_w(keys[0], 2 * c, c, 3);       p['g1'], p['b1'] = affine(keys[1], 2 * c)
    p['w2'] = conv_w(keys[2], 2 * c, 2 * c, 3);   p['g2'], p['b2'] = affine(keys[3], 2 * c)
    p['w3'] = conv_w(keys[4], 4 * c, 2 * c, 3);   p['g3'], p['b3'] = affine(keys[5], 4 * c)
    p['w4'] = conv_w(keys[6], 4 * c, 4 * c, 3);   p['g4'], p['b4'] = affine(keys[7], 4 * c)
    p['w5'] = tconv_w(keys[8], 4 * c, 2 * c, 3);  p['g5'], p['b5'] = affine(keys[9], 2 * c)
    p['w6'] = tconv_w(keys[10], 2 * c, c, 3);     p['g6'], p['b6'] = affine(keys[11], c)
    p['wr1'] = conv_w(keys[12], c, c, 1);         p['gr1'], p['br1'] = affine(keys[13], c)
    p['wr2'] = conv_w(keys[14], 2 * c, 2 * c, 1); p['gr2'], p['br2'] = affine(keys[15], 2 * c)
    return p


def hourglass_forward(x, p):
    c1 = group_norm(conv3d(x, p['w1'], 2, 1), p['g1'], p['b1'], relu=True)
    c2 = group_norm(conv3d(c1, p['w2'], 1, 1), p['g2'], p['b2'], relu=True)
    c3 = group_norm(conv3d(c2, p['w3'], 2, 1), p['g3'], p['b3'], relu=True)
    c4 = group_norm(conv3d(c3, p['w4'], 1, 1), p['g4'], p['b4'], relu=True)

    r2 = group_norm(conv3d(c2, p['wr2'], 1, 0), p['gr2'], p['br2'])
    t5 = conv_transpose3d_s2(c4, p['w5'])
    c5 = batch_norm_add_relu(t5, r2, p['g5'], p['b5'])   # BN + add + ReLU fused

    r1 = group_norm(conv3d(x, p['wr1'], 1, 0), p['gr1'], p['br1'])
    t6 = conv_transpose3d_s2(c5, p['w6'])
    c6 = batch_norm_add_relu(t6, r1, p['g6'], p['b6'])
    return c6


if __name__ == "__main__":
    key = jax.random.PRNGKey(0)
    kx, kp = jax.random.split(key)
    C = 4
    # N=2, C=4, D=H=W=8 (spatial divisible by 4 for the two stride-2 stages)
    x = jax.random.normal(kx, (2, C, 8, 8, 8), jnp.float32)
    params = init_hourglass_params(kp, C)

    out = jax.jit(hourglass_forward)(x, params)
    out = jax.block_until_ready(out)
    assert out.shape == x.shape and out.dtype == jnp.float32
    print("KERNEL_OK")
</pallas_src>

<mosaic_0001>
module attributes {stable_mosaic.version = 11 : i64} {
  func.func @_conv_gemm_kernel(%arg0: i32, %arg1: i32, %arg2: i32, %arg3: memref<4x4xbf16, #tpu.memory_space<vmem>>, %arg4: memref<1x4x128xbf16, #tpu.memory_space<vmem>>, %arg5: memref<1x4x128xf32, #tpu.memory_space<vmem>>) attributes {dimension_semantics = [#tpu.dimension_semantics<parallel>, #tpu.dimension_semantics<parallel>, #tpu.dimension_semantics<arbitrary>], iteration_bounds = array<i64: 2, 4, 1>, scalar_prefetch = 0 : i64, scratch_operands = 0 : i64, tpu.core_type = #tpu.core_type<tc>, window_params = [{transform_indices = @transform_0, window_bounds = array<i64: 4, 4>}, {transform_indices = @transform_1, window_bounds = array<i64: 1, 4, 128>}, {transform_indices = @transform_2, window_bounds = array<i64: 1, 4, 128>}]} {
    %c0_i32 = arith.constant 0 : i32
    %0 = arith.cmpi eq, %arg2, %c0_i32 : i32
    %1 = arith.extui %0 : i1 to i32
    %c0_i32_0 = arith.constant 0 : i32
    %2 = arith.cmpi ne, %1, %c0_i32_0 : i32
    scf.if %2 {
      %cst_11 = arith.constant 0.000000e+00 : f32
      %13 = vector.broadcast %cst_11 : f32 to vector<1x4x128xf32>
      %c0_12 = arith.constant 0 : index
      %c0_13 = arith.constant 0 : index
      %c0_14 = arith.constant 0 : index
      %14 = vector.load %arg5[%c0_12, %c0_13, %c0_14] : memref<1x4x128xf32, #tpu.memory_space<vmem>>, vector<1x4x128xf32>
      tpu.vector_store %arg5[%c0_12, %c0_13, %c0_14], %13 {strides = array<i32>} : memref<1x4x128xf32, #tpu.memory_space<vmem>>, vector<1x4x128xf32>,
    } else {
    }
    %c0 = arith.constant 0 : index
    %c0_1 = arith.constant 0 : index
    %c0_2 = arith.constant 0 : index
    %3 = vector.load %arg5[%c0, %c0_1, %c0_2] : memref<1x4x128xf32, #tpu.memory_space<vmem>>, vector<1x4x128xf32>
    %4 = vector.shape_cast %3 : vector<1x4x128xf32> to vector<4x128xf32>
    %c0_3 = arith.constant 0 : index
    %c0_4 = arith.constant 0 : index
    %5 = vector.load %arg3[%c0_3, %c0_4] : memref<4x4xbf16, #tpu.memory_space<vmem>>, vector<4x4xbf16>
    %c0_5 = arith.constant 0 : index
    %c0_6 = arith.constant 0 : index
    %c0_7 = arith.constant 0 : index
    %6 = vector.load %arg4[%c0_5, %c0_6, %c0_7] : memref<1x4x128xbf16, #tpu.memory_space<vmem>>, vector<1x4x128xbf16>
    %7 = vector.shape_cast %6 : vector<1x4x128xbf16> to vector<4x128xbf16>
    %cst = arith.constant dense<0.000000e+00> : vector<4x128xf32>
    %8 = tpu.matmul %5, %7, %cst {dimension_numbers = #tpu.dot_dimension_numbers<[1], [0], [0], [1], [0, 0, 1, 1], [], []>} : vector<4x4xbf16>, vector<4x128xbf16>, vector<4x128xf32> -> vector<4x128xf32>
    %9 = arith.addf %4, %8 : vector<4x128xf32>
    %c0_8 = arith.constant 0 : index
    %c0_9 = arith.constant 0 : index
    %c0_10 = arith.constant 0 : index
    %10 = vector.load %arg5[%c0_8, %c0_9, %c0_10] : memref<1x4x128xf32, #tpu.memory_space<vmem>>, vector<1x4x128xf32>
    %11 = vector.shape_cast %10 : vector<1x4x128xf32> to vector<4x128xf32>
    %12 = vector.shape_cast %9 : vector<4x128xf32> to vector<1x4x128xf32>
    tpu.vector_store %arg5[%c0_8, %c0_9, %c0_10], %12 {strides = array<i32>} : memref<1x4x128xf32, #tpu.memory_space<vmem>>, vector<1x4x128xf32>,
    return
  }
  func.func @transform_0(%arg0: i32, %arg1: i32, %arg2: i32) -> (i32, i32) {
    %c0_i32 = arith.constant 0 : i32
    %c0_i32_0 = arith.constant 0 : i32
    return %c0_i32, %arg2 : i32, i32
  }
  func.func @transform_1(%arg0: i32, %arg1: i32, %arg2: i32) -> (i32, i32, i32) {
    %c0_i32 = arith.constant 0 : i32
    return %arg0, %arg2, %arg1 : i32, i32, i32
  }
  func.func @transform_2(%arg0: i32, %arg1: i32, %arg2: i32) -> (i32, i32, i32) {
    %c0_i32 = arith.constant 0 : i32
    %c0_i32_0 = arith.constant 0 : i32
    return %arg0, %c0_i32, %arg1 : i32, i32, i32
  }
}

module attributes {stable_mosaic.version = 11 : i64} {
  func.func @_group_norm_kernel(%arg0: i32, %arg1: i32, %arg2: memref<1x1x2x512xf32, #tpu.memory_space<vmem>>, %arg3: memref<1x2x1xf32, #tpu.memory_space<vmem>>, %arg4: memref<1x2x1xf32, #tpu.memory_space<vmem>>, %arg5: memref<1x1x2x512xf32, #tpu.memory_space<vmem>>) attributes {dimension_semantics = [#tpu.dimension_semantics<parallel>, #tpu.dimension_semantics<parallel>], iteration_bounds = array<i64: 2, 2>, scalar_prefetch = 0 : i64, scratch_operands = 0 : i64, tpu.core_type = #tpu.core_type<tc>, window_params = [{transform_indices = @transform_0, window_bounds = array<i64: 1, 1, 2, 512>}, {transform_indices = @transform_1, window_bounds = array<i64: 1, 2, 1>}, {transform_indices = @transform_2, window_bounds = array<i64: 1, 2, 1>}, {transform_indices = @transform_3, window_bounds = array<i64: 1, 1, 2, 512>}]} {
    %c0 = arith.constant 0 : index
    %c0_0 = arith.constant 0 : index
    %c0_1 = arith.constant 0 : index
    %c0_2 = arith.constant 0 : index
    %0 = vector.load %arg2[%c0, %c0_0, %c0_1, %c0_2] : memref<1x1x2x512xf32, #tpu.memory_space<vmem>>, vector<1x1x2x512xf32>
    %1 = vector.shape_cast %0 : vector<1x1x2x512xf32> to vector<2x512xf32>
    %c0_3 = arith.constant 0 : index
    %c0_4 = arith.constant 0 : index
    %c0_5 = arith.constant 0 : index
    %2 = vector.load %arg3[%c0_3, %c0_4, %c0_5] : memref<1x2x1xf32, #tpu.memory_space<vmem>>, vector<1x2x1xf32>
    %3 = vector.shape_cast %2 : vector<1x2x1xf32> to vector<2x1xf32>
    %c0_6 = arith.constant 0 : index
    %c0_7 = arith.constant 0 : index
    %c0_8 = arith.constant 0 : index
    %4 = vector.load %arg4[%c0_6, %c0_7, %c0_8] : memref<1x2x1xf32, #tpu.memory_space<vmem>>, vector<1x2x1xf32>
    %5 = vector.shape_cast %4 : vector<1x2x1xf32> to vector<2x1xf32>
    %6 = vector.shape_cast %1 : vector<2x512xf32> to vector<1x2x512xf32>
    %cst = arith.constant dense<0.000000e+00> : vector<1xf32>
    %7 = vector.multi_reduction <add>, %6, %cst [1, 2] : vector<1x2x512xf32> to vector<1xf32>
    %8 = vector.shape_cast %7 : vector<1xf32> to vector<1x1x1xf32>
    %9 = vector.extract %8[0, 0, 0] : f32 from vector<1x1x1xf32>
    %10 = vector.broadcast %9 : f32 to vector<1x1xf32>
    %cst_9 = arith.constant 1.024000e+03 : f32
    %11 = vector.broadcast %cst_9 : f32 to vector<1x1xf32>
    %12 = arith.divf %10, %11 : vector<1x1xf32>
    %13 = vector.broadcast %12 : vector<1x1xf32> to vector<2x512xf32>
    %14 = arith.subf %1, %13 : vector<2x512xf32>
    %15 = arith.mulf %14, %14 : vector<2x512xf32>
    %16 = vector.shape_cast %15 : vector<2x512xf32> to vector<1x2x512xf32>
    %cst_10 = arith.constant dense<0.000000e+00> : vector<1xf32>
    %17 = vector.multi_reduction <add>, %16, %cst_10 [1, 2] : vector<1x2x512xf32> to vector<1xf32>
    %18 = vector.shape_cast %17 : vector<1xf32> to vector<1x1x1xf32>
    %19 = vector.extract %18[0, 0, 0] : f32 from vector<1x1x1xf32>
    %20 = vector.broadcast %19 : f32 to vector<1x1xf32>
    %cst_11 = arith.constant 1.024000e+03 : f32
    %21 = vector.broadcast %cst_11 : f32 to vector<1x1xf32>
    %22 = arith.divf %20, %21 : vector<1x1xf32>
    %23 = vector.broadcast %12 : vector<1x1xf32> to vector<2x512xf32>
    %24 = arith.subf %1, %23 : vector<2x512xf32>
    %cst_12 = arith.constant 9.99999974E-6 : f32
    %25 = vector.broadcast %cst_12 : f32 to vector<1x1xf32>
    %26 = arith.addf %22, %25 : vector<1x1xf32>
    %27 = math.rsqrt %26 : vector<1x1xf32>
    %28 = vector.broadcast %27 : vector<1x1xf32> to vector<2x512xf32>
    %29 = arith.mulf %24, %28 : vector<2x512xf32>
    %30 = vector.broadcast %3 : vector<2x1xf32> to vector<2x512xf32>
    %31 = arith.mulf %29, %30 : vector<2x512xf32>
    %32 = vector.broadcast %5 : vector<2x1xf32> to vector<2x512xf32>
    %33 = arith.addf %31, %32 : vector<2x512xf32>
    %34 = vector.shape_cast %33 : vector<2x512xf32> to vector<1x1x2x512xf32>
    %c0_13 = arith.constant 0 : index
    %c0_14 = arith.constant 0 : index
    %c0_15 = arith.constant 0 : index
    %c0_16 = arith.constant 0 : index
    %35 = vector.load %arg5[%c0_13, %c0_14, %c0_15, %c0_16] : memref<1x1x2x512xf32, #tpu.memory_space<vmem>>, vector<1x1x2x512xf32>
    tpu.vector_store %arg5[%c0_13, %c0_14, %c0_15, %c0_16], %34 {strides = array<i32>} : memref<1x1x2x512xf32, #tpu.memory_space<vmem>>, vector<1x1x2x512xf32>,
    return
  }
  func.func @transform_0(%arg0: i32, %arg1: i32) -> (i32, i32, i32, i32) {
    %c0_i32 = arith.constant 0 : i32
    %c0_i32_0 = arith.constant 0 : i32
    %c0_i32_1 = arith.constant 0 : i32
    return %arg0, %arg1, %c0_i32, %c0_i32_0 : i32, i32, i32, i32
  }
  func.func @transform_1(%arg0: i32, %arg1: i32) -> (i32, i32, i32) {
    %c0_i32 = arith.constant 0 : i32
    %c0_i32_0 = arith.constant 0 : i32
    %c0_i32_1 = arith.constant 0 : i32
    return %arg1, %c0_i32, %c0_i32_0 : i32, i32, i32
  }
  func.func @transform_2(%arg0: i32, %arg1: i32) -> (i32, i32, i32) {
    %c0_i32 = arith.constant 0 : i32
    %c0_i32_0 = arith.constant 0 : i32
    %c0_i32_1 = arith.constant 0 : i32
    return %arg1, %c0_i32, %c0_i32_0 : i32, i32, i32
  }
  func.func @transform_3(%arg0: i32, %arg1: i32) -> (i32, i32, i32, i32) {
    %c0_i32 = arith.constant 0 : i32
    %c0_i32_0 = arith.constant 0 : i32
    %c0_i32_1 = arith.constant 0 : i32
    return %arg0, %arg1, %c0_i32, %c0_i32_0 : i32, i32, i32, i32
  }
}

module attributes {stable_mosaic.version = 11 : i64} {
  func.func @_conv_gemm_kernel(%arg0: i32, %arg1: i32, %arg2: i32, %arg3: memref<8x108xbf16, #tpu.memory_space<vmem>>, %arg4: memref<1x108x64xbf16, #tpu.memory_space<vmem>>, %arg5: memref<1x8x64xf32, #tpu.memory_space<vmem>>) attributes {dimension_semantics = [#tpu.dimension_semantics<parallel>, #tpu.dimension_semantics<parallel>, #tpu.dimension_semantics<arbitrary>], iteration_bounds = array<i64: 2, 1, 1>, scalar_prefetch = 0 : i64, scratch_operands = 0 : i64, tpu.core_type = #tpu.core_type<tc>, window_params = [{transform_indices = @transform_0, window_bounds = array<i64: 8, 108>}, {transform_indices = @transform_1, window_bounds = array<i64: 1, 108, 64>}, {transform_indices = @transform_2, window_bounds = array<i64: 1, 8, 64>}]} {
    %c0_i32 = arith.constant 0 : i32
    %0 = arith.cmpi eq, %arg2, %c0_i32 : i32
    %1 = arith.extui %0 : i1 to i32
    %c0_i32_0 = arith.constant 0 : i32
    %2 = arith.cmpi ne, %1, %c0_i32_0 : i32
    scf.if %2 {
      %cst_11 = arith.constant 0.000000e+00 : f32
      %13 = vector.broadcast %cst_11 : f32 to vector<1x8x64xf32>
      %c0_12 = arith.constant 0 : index
      %c0_13 = arith.constant 0 : index
      %c0_14 = arith.constant 0 : index
      %14 = vector.load %arg5[%c0_12, %c0_13, %c0_14] : memref<1x8x64xf32, #tpu.memory_space<vmem>>, vector<1x8x64xf32>
      tpu.vector_store %arg5[%c0_12, %c0_13, %c0_14], %13 {strides = array<i32>} : memref<1x8x64xf32, #tpu.memory_space<vmem>>, vector<1x8x64xf32>,
    } else {
    }
    %c0 = arith.constant 0 : index
    %c0_1 = arith.constant 0 : index
    %c0_2 = arith.constant 0 : index
    %3 = vector.load %arg5[%c0, %c0_1, %c0_2] : memref<1x8x64xf32, #tpu.memory_space<vmem>>, vector<1x8x64xf32>
    %4 = vector.shape_cast %3 : vector<1x8x64xf32> to vector<8x64xf32>
    %c0_3 = arith.constant 0 : index
    %c0_4 = arith.constant 0 : index
    %5 = vector.load %arg3[%c0_3, %c0_4] : memref<8x108xbf16, #tpu.memory_space<vmem>>, vector<8x108xbf16>
    %c0_5 = arith.constant 0 : index
    %c0_6 = arith.constant 0 : index
    %c0_7 = arith.constant 0 : index
    %6 = vector.load %arg4[%c0_5, %c0_6, %c0_7] : memref<1x108x64xbf16, #tpu.memory_space<vmem>>, vector<1x108x64xbf16>
    %7 = vector.shape_cast %6 : vector<1x108x64xbf16> to vector<108x64xbf16>
    %cst = arith.constant dense<0.000000e+00> : vector<8x64xf32>
    %8 = tpu.matmul %5, %7, %cst {dimension_numbers = #tpu.dot_dimension_numbers<[1], [0], [0], [1], [0, 0, 1, 1], [], []>} : vector<8x108xbf16>, vector<108x64xbf16>, vector<8x64xf32> -> vector<8x64xf32>
    %9 = arith.addf %4, %8 : vector<8x64xf32>
    %c0_8 = arith.constant 0 : index
    %c0_9 = arith.constant 0 : index
    %c0_10 = arith.constant 0 : index
    %10 = vector.load %arg5[%c0_8, %c0_9, %c0_10] : memref<1x8x64xf32, #tpu.memory_space<vmem>>, vector<1x8x64xf32>
    %11 = vector.shape_cast %10 : vector<1x8x64xf32> to vector<8x64xf32>
    %12 = vector.shape_cast %9 : vector<8x64xf32> to vector<1x8x64xf32>
    tpu.vector_store %arg5[%c0_8, %c0_9, %c0_10], %12 {strides = array<i32>} : memref<1x8x64xf32, #tpu.memory_space<vmem>>, vector<1x8x64xf32>,
    return
  }
  func.func @transform_0(%arg0: i32, %arg1: i32, %arg2: i32) -> (i32, i32) {
    %c0_i32 = arith.constant 0 : i32
    %c0_i32_0 = arith.constant 0 : i32
    return %c0_i32, %arg2 : i32, i32
  }
  func.func @transform_1(%arg0: i32, %arg1: i32, %arg2: i32) -> (i32, i32, i32) {
    %c0_i32 = arith.constant 0 : i32
    return %arg0, %arg2, %arg1 : i32, i32, i32
  }
  func.func @transform_2(%arg0: i32, %arg1: i32, %arg2: i32) -> (i32, i32, i32) {
    %c0_i32 = arith.constant 0 : i32
    %c0_i32_0 = arith.constant 0 : i32
    return %arg0, %c0_i32, %arg1 : i32, i32, i32
  }
}

module attributes {stable_mosaic.version = 11 : i64} {
  func.func @_group_norm_kernel(%arg0: i32, %arg1: i32, %arg2: memref<1x1x4x64xf32, #tpu.memory_space<vmem>>, %arg3: memref<1x4x1xf32, #tpu.memory_space<vmem>>, %arg4: memref<1x4x1xf32, #tpu.memory_space<vmem>>, %arg5: memref<1x1x4x64xf32, #tpu.memory_space<vmem>>) attributes {dimension_semantics = [#tpu.dimension_semantics<parallel>, #tpu.dimension_semantics<parallel>], iteration_bounds = array<i64: 2, 2>, scalar_prefetch = 0 : i64, scratch_operands = 0 : i64, tpu.core_type = #tpu.core_type<tc>, window_params = [{transform_indices = @transform_0, window_bounds = array<i64: 1, 1, 4, 64>}, {transform_indices = @transform_1, window_bounds = array<i64: 1, 4, 1>}, {transform_indices = @transform_2, window_bounds = array<i64: 1, 4, 1>}, {transform_indices = @transform_3, window_bounds = array<i64: 1, 1, 4, 64>}]} {
    %c0 = arith.constant 0 : index
    %c0_0 = arith.constant 0 : index
    %c0_1 = arith.constant 0 : index
    %c0_2 = arith.constant 0 : index
    %0 = vector.load %arg2[%c0, %c0_0, %c0_1, %c0_2] : memref<1x1x4x64xf32, #tpu.memory_space<vmem>>, vector<1x1x4x64xf32>
    %1 = vector.shape_cast %0 : vector<1x1x4x64xf32> to vector<4x64xf32>
    %c0_3 = arith.constant 0 : index
    %c0_4 = arith.constant 0 : index
    %c0_5 = arith.constant 0 : index
    %2 = vector.load %arg3[%c0_3, %c0_4, %c0_5] : memref<1x4x1xf32, #tpu.memory_space<vmem>>, vector<1x4x1xf32>
    %3 = vector.shape_cast %2 : vector<1x4x1xf32> to vector<4x1xf32>
    %c0_6 = arith.constant 0 : index
    %c0_7 = arith.constant 0 : index
    %c0_8 = arith.constant 0 : index
    %4 = vector.load %arg4[%c0_6, %c0_7, %c0_8] : memref<1x4x1xf32, #tpu.memory_space<vmem>>, vector<1x4x1xf32>
    %5 = vector.shape_cast %4 : vector<1x4x1xf32> to vector<4x1xf32>
    %6 = vector.shape_cast %1 : vector<4x64xf32> to vector<1x4x64xf32>
    %cst = arith.constant dense<0.000000e+00> : vector<1xf32>
    %7 = vector.multi_reduction <add>, %6, %cst [1, 2] : vector<1x4x64xf32> to vector<1xf32>
    %8 = vector.shape_cast %7 : vector<1xf32> to vector<1x1x1xf32>
    %9 = vector.extract %8[0, 0, 0] : f32 from vector<1x1x1xf32>
    %10 = vector.broadcast %9 : f32 to vector<1x1xf32>
    %cst_9 = arith.constant 2.560000e+02 : f32
    %11 = vector.broadcast %cst_9 : f32 to vector<1x1xf32>
    %12 = arith.divf %10, %11 : vector<1x1xf32>
    %13 = vector.broadcast %12 : vector<1x1xf32> to vector<4x64xf32>
    %14 = arith.subf %1, %13 : vector<4x64xf32>
    %15 = arith.mulf %14, %14 : vector<4x64xf32>
    %16 = vector.shape_cast %15 : vector<4x64xf32> to vector<1x4x64xf32>
    %cst_10 = arith.constant dense<0.000000e+00> : vector<1xf32>
    %17 = vector.multi_reduction <add>, %16, %cst_10 [1, 2] : vector<1x4x64xf32> to vector<1xf32>
    %18 = vector.shape_cast %17 : vector<1xf32> to vector<1x1x1xf32>
    %19 = vector.extract %18[0, 0, 0] : f32 from vector<1x1x1xf32>
    %20 = vector.broadcast %19 : f32 to vector<1x1xf32>
    %cst_11 = arith.constant 2.560000e+02 : f32
    %21 = vector.broadcast %cst_11 : f32 to vector<1x1xf32>
    %22 = arith.divf %20, %21 : vector<1x1xf32>
    %23 = vector.broadcast %12 : vector<1x1xf32> to vector<4x64xf32>
    %24 = arith.subf %1, %23 : vector<4x64xf32>
    %cst_12 = arith.constant 9.99999974E-6 : f32
    %25 = vector.broadcast %cst_12 : f32 to vector<1x1xf32>
    %26 = arith.addf %22, %25 : vector<1x1xf32>
    %27 = math.rsqrt %26 : vector<1x1xf32>
    %28 = vector.broadcast %27 : vector<1x1xf32> to vector<4x64xf32>
    %29 = arith.mulf %24, %28 : vector<4x64xf32>
    %30 = vector.broadcast %3 : vector<4x1xf32> to vector<4x64xf32>
    %31 = arith.mulf %29, %30 : vector<4x64xf32>
    %32 = vector.broadcast %5 : vector<4x1xf32> to vector<4x64xf32>
    %33 = arith.addf %31, %32 : vector<4x64xf32>
    %cst_13 = arith.constant 0.000000e+00 : f32
    %34 = vector.broadcast %cst_13 : f32 to vector<4x64xf32>
    %35 = arith.maximumf %33, %34 : vector<4x64xf32>
    %36 = vector.shape_cast %35 : vector<4x64xf32> to vector<1x1x4x64xf32>
    %c0_14 = arith.constant 0 : index
    %c0_15 = arith.constant 0 : index
    %c0_16 = arith.constant 0 : index
    %c0_17 = arith.constant 0 : index
    %37 = vector.load %arg5[%c0_14, %c0_15, %c0_16, %c0_17] : memref<1x1x4x64xf32, #tpu.memory_space<vmem>>, vector<1x1x4x64xf32>
    tpu.vector_store %arg5[%c0_14, %c0_15, %c0_16, %c0_17], %36 {strides = array<i32>} : memref<1x1x4x64xf32, #tpu.memory_space<vmem>>, vector<1x1x4x64xf32>,
    return
  }
  func.func @transform_0(%arg0: i32, %arg1: i32) -> (i32, i32, i32, i32) {
    %c0_i32 = arith.constant 0 : i32
    %c0_i32_0 = arith.constant 0 : i32
    %c0_i32_1 = arith.constant 0 : i32
    return %arg0, %arg1, %c0_i32, %c0_i32_0 : i32, i32, i32, i32
  }
  func.func @transform_1(%arg0: i32, %arg1: i32) -> (i32, i32, i32) {
    %c0_i32 = arith.constant 0 : i32
    %c0_i32_0 = arith.constant 0 : i32
    %c0_i32_1 = arith.constant 0 : i32
    return %arg1, %c0_i32, %c0_i32_0 : i32, i32, i32
  }
  func.func @transform_2(%arg0: i32, %arg1: i32) -> (i32, i32, i32) {
    %c0_i32 = arith.constant 0 : i32
    %c0_i32_0 = arith.constant 0 : i32
    %c0_i32_1 = arith.constant 0 : i32
    return %arg1, %c0_i32, %c0_i32_0 : i32, i32, i32
  }
  func.func @transform_3(%arg0: i32, %arg1: i32) -> (i32, i32, i32, i32) {
    %c0_i32 = arith.constant 0 : i32
    %c0_i32_0 = arith.constant 0 : i32
    %c0_i32_1 = arith.constant 0 : i32
    return %arg0, %arg1, %c0_i32, %c0_i32_0 : i32, i32, i32, i32
  }
}

module attributes {stable_mosaic.version = 11 : i64} {
  func.func @_conv_gemm_kernel(%arg0: i32, %arg1: i32, %arg2: i32, %arg3: memref<8x216xbf16, #tpu.memory_space<vmem>>, %arg4: memref<1x216x64xbf16, #tpu.memory_space<vmem>>, %arg5: memref<1x8x64xf32, #tpu.memory_space<vmem>>) attributes {dimension_semantics = [#tpu.dimension_semantics<parallel>, #tpu.dimension_semantics<parallel>, #tpu.dimension_semantics<arbitrary>], iteration_bounds = array<i64: 2, 1, 1>, scalar_prefetch = 0 : i64, scratch_operands = 0 : i64, tpu.core_type = #tpu.core_type<tc>, window_params = [{transform_indices = @transform_0, window_bounds = array<i64: 8, 216>}, {transform_indices = @transform_1, window_bounds = array<i64: 1, 216, 64>}, {transform_indices = @transform_2, window_bounds = array<i64: 1, 8, 64>}]} {
    %c0_i32 = arith.constant 0 : i32
    %0 = arith.cmpi eq, %arg2, %c0_i32 : i32
    %1 = arith.extui %0 : i1 to i32
    %c0_i32_0 = arith.constant 0 : i32
    %2 = arith.cmpi ne, %1, %c0_i32_0 : i32
    scf.if %2 {
      %cst_11 = arith.constant 0.000000e+00 : f32
      %13 = vector.broadcast %cst_11 : f32 to vector<1x8x64xf32>
      %c0_12 = arith.constant 0 : index
      %c0_13 = arith.constant 0 : index
      %c0_14 = arith.constant 0 : index
      %14 = vector.load %arg5[%c0_12, %c0_13, %c0_14] : memref<1x8x64xf32, #tpu.memory_space<vmem>>, vector<1x8x64xf32>
      tpu.vector_store %arg5[%c0_12, %c0_13, %c0_14], %13 {strides = array<i32>} : memref<1x8x64xf32, #tpu.memory_space<vmem>>, vector<1x8x64xf32>,
    } else {
    }
    %c0 = arith.constant 0 : index
    %c0_1 = arith.constant 0 : index
    %c0_2 = arith.constant 0 : index
    %3 = vector.load %arg5[%c0, %c0_1, %c0_2] : memref<1x8x64xf32, #tpu.memory_space<vmem>>, vector<1x8x64xf32>
    %4 = vector.shape_cast %3 : vector<1x8x64xf32> to vector<8x64xf32>
    %c0_3 = arith.constant 0 : index
    %c0_4 = arith.constant 0 : index
    %5 = vector.load %arg3[%c0_3, %c0_4] : memref<8x216xbf16, #tpu.memory_space<vmem>>, vector<8x216xbf16>
    %c0_5 = arith.constant 0 : index
    %c0_6 = arith.constant 0 : index
    %c0_7 = arith.constant 0 : index
    %6 = vector.load %arg4[%c0_5, %c0_6, %c0_7] : memref<1x216x64xbf16, #tpu.memory_space<vmem>>, vector<1x216x64xbf16>
    %7 = vector.shape_cast %6 : vector<1x216x64xbf16> to vector<216x64xbf16>
    %cst = arith.constant dense<0.000000e+00> : vector<8x64xf32>
    %8 = tpu.matmul %5, %7, %cst {dimension_numbers = #tpu.dot_dimension_numbers<[1], [0], [0], [1], [0, 0, 1, 1], [], []>} : vector<8x216xbf16>, vector<216x64xbf16>, vector<8x64xf32> -> vector<8x64xf32>
    %9 = arith.addf %4, %8 : vector<8x64xf32>
    %c0_8 = arith.constant 0 : index
    %c0_9 = arith.constant 0 : index
    %c0_10 = arith.constant 0 : index
    %10 = vector.load %arg5[%c0_8, %c0_9, %c0_10] : memref<1x8x64xf32, #tpu.memory_space<vmem>>, vector<1x8x64xf32>
    %11 = vector.shape_cast %10 : vector<1x8x64xf32> to vector<8x64xf32>
    %12 = vector.shape_cast %9 : vector<8x64xf32> to vector<1x8x64xf32>
    tpu.vector_store %arg5[%c0_8, %c0_9, %c0_10], %12 {strides = array<i32>} : memref<1x8x64xf32, #tpu.memory_space<vmem>>, vector<1x8x64xf32>,
    return
  }
  func.func @transform_0(%arg0: i32, %arg1: i32, %arg2: i32) -> (i32, i32) {
    %c0_i32 = arith.constant 0 : i32
    %c0_i32_0 = arith.constant 0 : i32
    return %c0_i32, %arg2 : i32, i32
  }
  func.func @transform_1(%arg0: i32, %arg1: i32, %arg2: i32) -> (i32, i32, i32) {
    %c0_i32 = arith.constant 0 : i32
    return %arg0, %arg2, %arg1 : i32, i32, i32
  }
  func.func @transform_2(%arg0: i32, %arg1: i32, %arg2: i32) -> (i32, i32, i32) {
    %c0_i32 = arith.constant 0 : i32
    %c0_i32_0 = arith.constant 0 : i32
    return %arg0, %c0_i32, %arg1 : i32, i32, i32
  }
}

module attributes {stable_mosaic.version = 11 : i64} {
  func.func @_conv_gemm_kernel(%arg0: i32, %arg1: i32, %arg2: i32, %arg3: memref<8x8xbf16, #tpu.memory_space<vmem>>, %arg4: memref<1x8x64xbf16, #tpu.memory_space<vmem>>, %arg5: memref<1x8x64xf32, #tpu.memory_space<vmem>>) attributes {dimension_semantics = [#tpu.dimension_semantics<parallel>, #tpu.dimension_semantics<parallel>, #tpu.dimension_semantics<arbitrary>], iteration_bounds = array<i64: 2, 1, 1>, scalar_prefetch = 0 : i64, scratch_operands = 0 : i64, tpu.core_type = #tpu.core_type<tc>, window_params = [{transform_indices = @transform_0, window_bounds = array<i64: 8, 8>}, {transform_indices = @transform_1, window_bounds = array<i64: 1, 8, 64>}, {transform_indices = @transform_2, window_bounds = array<i64: 1, 8, 64>}]} {
    %c0_i32 = arith.constant 0 : i32
    %0 = arith.cmpi eq, %arg2, %c0_i32 : i32
    %1 = arith.extui %0 : i1 to i32
    %c0_i32_0 = arith.constant 0 : i32
    %2 = arith.cmpi ne, %1, %c0_i32_0 : i32
    scf.if %2 {
      %cst_11 = arith.constant 0.000000e+00 : f32
      %13 = vector.broadcast %cst_11 : f32 to vector<1x8x64xf32>
      %c0_12 = arith.constant 0 : index
      %c0_13 = arith.constant 0 : index
      %c0_14 = arith.constant 0 : index
      %14 = vector.load %arg5[%c0_12, %c0_13, %c0_14] : memref<1x8x64xf32, #tpu.memory_space<vmem>>, vector<1x8x64xf32>
      tpu.vector_store %arg5[%c0_12, %c0_13, %c0_14], %13 {strides = array<i32>} : memref<1x8x64xf32, #tpu.memory_space<vmem>>, vector<1x8x64xf32>,
    } else {
    }
    %c0 = arith.constant 0 : index
    %c0_1 = arith.constant 0 : index
    %c0_2 = arith.constant 0 : index
    %3 = vector.load %arg5[%c0, %c0_1, %c0_2] : memref<1x8x64xf32, #tpu.memory_space<vmem>>, vector<1x8x64xf32>
    %4 = vector.shape_cast %3 : vector<1x8x64xf32> to vector<8x64xf32>
    %c0_3 = arith.constant 0 : index
    %c0_4 = arith.constant 0 : index
    %5 = vector.load %arg3[%c0_3, %c0_4] : memref<8x8xbf16, #tpu.memory_space<vmem>>, vector<8x8xbf16>
    %c0_5 = arith.constant 0 : index
    %c0_6 = arith.constant 0 : index
    %c0_7 = arith.constant 0 : index
    %6 = vector.load %arg4[%c0_5, %c0_6, %c0_7] : memref<1x8x64xbf16, #tpu.memory_space<vmem>>, vector<1x8x64xbf16>
    %7 = vector.shape_cast %6 : vector<1x8x64xbf16> to vector<8x64xbf16>
    %cst = arith.constant dense<0.000000e+00> : vector<8x64xf32>
    %8 = tpu.matmul %5, %7, %cst {dimension_numbers = #tpu.dot_dimension_numbers<[1], [0], [0], [1], [0, 0, 1, 1], [], []>} : vector<8x8xbf16>, vector<8x64xbf16>, vector<8x64xf32> -> vector<8x64xf32>
    %9 = arith.addf %4, %8 : vector<8x64xf32>
    %c0_8 = arith.constant 0 : index
    %c0_9 = arith.constant 0 : index
    %c0_10 = arith.constant 0 : index
    %10 = vector.load %arg5[%c0_8, %c0_9, %c0_10] : memref<1x8x64xf32, #tpu.memory_space<vmem>>, vector<1x8x64xf32>
    %11 = vector.shape_cast %10 : vector<1x8x64xf32> to vector<8x64xf32>
    %12 = vector.shape_cast %9 : vector<8x64xf32> to vector<1x8x64xf32>
    tpu.vector_store %arg5[%c0_8, %c0_9, %c0_10], %12 {strides = array<i32>} : memref<1x8x64xf32, #tpu.memory_space<vmem>>, vector<1x8x64xf32>,
    return
  }
  func.func @transform_0(%arg0: i32, %arg1: i32, %arg2: i32) -> (i32, i32) {
    %c0_i32 = arith.constant 0 : i32
    %c0_i32_0 = arith.constant 0 : i32
    return %c0_i32, %arg2 : i32, i32
  }
  func.func @transform_1(%arg0: i32, %arg1: i32, %arg2: i32) -> (i32, i32, i32) {
    %c0_i32 = arith.constant 0 : i32
    return %arg0, %arg2, %arg1 : i32, i32, i32
  }
  func.func @transform_2(%arg0: i32, %arg1: i32, %arg2: i32) -> (i32, i32, i32) {
    %c0_i32 = arith.constant 0 : i32
    %c0_i32_0 = arith.constant 0 : i32
    return %arg0, %c0_i32, %arg1 : i32, i32, i32
  }
}

module attributes {stable_mosaic.version = 11 : i64} {
  func.func @_group_norm_kernel(%arg0: i32, %arg1: i32, %arg2: memref<1x1x4x64xf32, #tpu.memory_space<vmem>>, %arg3: memref<1x4x1xf32, #tpu.memory_space<vmem>>, %arg4: memref<1x4x1xf32, #tpu.memory_space<vmem>>, %arg5: memref<1x1x4x64xf32, #tpu.memory_space<vmem>>) attributes {dimension_semantics = [#tpu.dimension_semantics<parallel>, #tpu.dimension_semantics<parallel>], iteration_bounds = array<i64: 2, 2>, scalar_prefetch = 0 : i64, scratch_operands = 0 : i64, tpu.core_type = #tpu.core_type<tc>, window_params = [{transform_indices = @transform_0, window_bounds = array<i64: 1, 1, 4, 64>}, {transform_indices = @transform_1, window_bounds = array<i64: 1, 4, 1>}, {transform_indices = @transform_2, window_bounds = array<i64: 1, 4, 1>}, {transform_indices = @transform_3, window_bounds = array<i64: 1, 1, 4, 64>}]} {
    %c0 = arith.constant 0 : index
    %c0_0 = arith.constant 0 : index
    %c0_1 = arith.constant 0 : index
    %c0_2 = arith.constant 0 : index
    %0 = vector.load %arg2[%c0, %c0_0, %c0_1, %c0_2] : memref<1x1x4x64xf32, #tpu.memory_space<vmem>>, vector<1x1x4x64xf32>
    %1 = vector.shape_cast %0 : vector<1x1x4x64xf32> to vector<4x64xf32>
    %c0_3 = arith.constant 0 : index
    %c0_4 = arith.constant 0 : index
    %c0_5 = arith.constant 0 : index
    %2 = vector.load %arg3[%c0_3, %c0_4, %c0_5] : memref<1x4x1xf32, #tpu.memory_space<vmem>>, vector<1x4x1xf32>
    %3 = vector.shape_cast %2 : vector<1x4x1xf32> to vector<4x1xf32>
    %c0_6 = arith.constant 0 : index
    %c0_7 = arith.constant 0 : index
    %c0_8 = arith.constant 0 : index
    %4 = vector.load %arg4[%c0_6, %c0_7, %c0_8] : memref<1x4x1xf32, #tpu.memory_space<vmem>>, vector<1x4x1xf32>
    %5 = vector.shape_cast %4 : vector<1x4x1xf32> to vector<4x1xf32>
    %6 = vector.shape_cast %1 : vector<4x64xf32> to vector<1x4x64xf32>
    %cst = arith.constant dense<0.000000e+00> : vector<1xf32>
    %7 = vector.multi_reduction <add>, %6, %cst [1, 2] : vector<1x4x64xf32> to vector<1xf32>
    %8 = vector.shape_cast %7 : vector<1xf32> to vector<1x1x1xf32>
    %9 = vector.extract %8[0, 0, 0] : f32 from vector<1x1x1xf32>
    %10 = vector.broadcast %9 : f32 to vector<1x1xf32>
    %cst_9 = arith.constant 2.560000e+02 : f32
    %11 = vector.broadcast %cst_9 : f32 to vector<1x1xf32>
    %12 = arith.divf %10, %11 : vector<1x1xf32>
    %13 = vector.broadcast %12 : vector<1x1xf32> to vector<4x64xf32>
    %14 = arith.subf %1, %13 : vector<4x64xf32>
    %15 = arith.mulf %14, %14 : vector<4x64xf32>
    %16 = vector.shape_cast %15 : vector<4x64xf32> to vector<1x4x64xf32>
    %cst_10 = arith.constant dense<0.000000e+00> : vector<1xf32>
    %17 = vector.multi_reduction <add>, %16, %cst_10 [1, 2] : vector<1x4x64xf32> to vector<1xf32>
    %18 = vector.shape_cast %17 : vector<1xf32> to vector<1x1x1xf32>
    %19 = vector.extract %18[0, 0, 0] : f32 from vector<1x1x1xf32>
    %20 = vector.broadcast %19 : f32 to vector<1x1xf32>
    %cst_11 = arith.constant 2.560000e+02 : f32
    %21 = vector.broadcast %cst_11 : f32 to vector<1x1xf32>
    %22 = arith.divf %20, %21 : vector<1x1xf32>
    %23 = vector.broadcast %12 : vector<1x1xf32> to vector<4x64xf32>
    %24 = arith.subf %1, %23 : vector<4x64xf32>
    %cst_12 = arith.constant 9.99999974E-6 : f32
    %25 = vector.broadcast %cst_12 : f32 to vector<1x1xf32>
    %26 = arith.addf %22, %25 : vector<1x1xf32>
    %27 = math.rsqrt %26 : vector<1x1xf32>
    %28 = vector.broadcast %27 : vector<1x1xf32> to vector<4x64xf32>
    %29 = arith.mulf %24, %28 : vector<4x64xf32>
    %30 = vector.broadcast %3 : vector<4x1xf32> to vector<4x64xf32>
    %31 = arith.mulf %29, %30 : vector<4x64xf32>
    %32 = vector.broadcast %5 : vector<4x1xf32> to vector<4x64xf32>
    %33 = arith.addf %31, %32 : vector<4x64xf32>
    %34 = vector.shape_cast %33 : vector<4x64xf32> to vector<1x1x4x64xf32>
    %c0_13 = arith.constant 0 : index
    %c0_14 = arith.constant 0 : index
    %c0_15 = arith.constant 0 : index
    %c0_16 = arith.constant 0 : index
    %35 = vector.load %arg5[%c0_13, %c0_14, %c0_15, %c0_16] : memref<1x1x4x64xf32, #tpu.memory_space<vmem>>, vector<1x1x4x64xf32>
    tpu.vector_store %arg5[%c0_13, %c0_14, %c0_15, %c0_16], %34 {strides = array<i32>} : memref<1x1x4x64xf32, #tpu.memory_space<vmem>>, vector<1x1x4x64xf32>,
    return
  }
  func.func @transform_0(%arg0: i32, %arg1: i32) -> (i32, i32, i32, i32) {
    %c0_i32 = arith.constant 0 : i32
    %c0_i32_0 = arith.constant 0 : i32
    %c0_i32_1 = arith.constant 0 : i32
    return %arg0, %arg1, %c0_i32, %c0_i32_0 : i32, i32, i32, i32
  }
  func.func @transform_1(%arg0: i32, %arg1: i32) -> (i32, i32, i32) {
    %c0_i32 = arith.constant 0 : i32
    %c0_i32_0 = arith.constant 0 : i32
    %c0_i32_1 = arith.constant 0 : i32
    return %arg1, %c0_i32, %c0_i32_0 : i32, i32, i32
  }
  func.func @transform_2(%arg0: i32, %arg1: i32) -> (i32, i32, i32) {
    %c0_i32 = arith.constant 0 : i32
    %c0_i32_0 = arith.constant 0 : i32
    %c0_i32_1 = arith.constant 0 : i32
    return %arg1, %c0_i32, %c0_i32_0 : i32, i32, i32
  }
  func.func @transform_3(%arg0: i32, %arg1: i32) -> (i32, i32, i32, i32) {
    %c0_i32 = arith.constant 0 : i32
    %c0_i32_0 = arith.constant 0 : i32
    %c0_i32_1 = arith.constant 0 : i32
    return %arg0, %arg1, %c0_i32, %c0_i32_0 : i32, i32, i32, i32
  }
}

module attributes {stable_mosaic.version = 11 : i64} {
  func.func @_group_norm_kernel(%arg0: i32, %arg1: i32, %arg2: memref<1x1x8x8xf32, #tpu.memory_space<vmem>>, %arg3: memref<1x8x1xf32, #tpu.memory_space<vmem>>, %arg4: memref<1x8x1xf32, #tpu.memory_space<vmem>>, %arg5: memref<1x1x8x8xf32, #tpu.memory_space<vmem>>) attributes {dimension_semantics = [#tpu.dimension_semantics<parallel>, #tpu.dimension_semantics<parallel>], iteration_bounds = array<i64: 2, 2>, scalar_prefetch = 0 : i64, scratch_operands = 0 : i64, tpu.core_type = #tpu.core_type<tc>, window_params = [{transform_indices = @transform_0, window_bounds = array<i64: 1, 1, 8, 8>}, {transform_indices = @transform_1, window_bounds = array<i64: 1, 8, 1>}, {transform_indices = @transform_2, window_bounds = array<i64: 1, 8, 1>}, {transform_indices = @transform_3, window_bounds = array<i64: 1, 1, 8, 8>}]} {
    %c0 = arith.constant 0 : index
    %c0_0 = arith.constant 0 : index
    %c0_1 = arith.constant 0 : index
    %c0_2 = arith.constant 0 : index
    %0 = vector.load %arg2[%c0, %c0_0, %c0_1, %c0_2] : memref<1x1x8x8xf32, #tpu.memory_space<vmem>>, vector<1x1x8x8xf32>
    %1 = vector.shape_cast %0 : vector<1x1x8x8xf32> to vector<8x8xf32>
    %c0_3 = arith.constant 0 : index
    %c0_4 = arith.constant 0 : index
    %c0_5 = arith.constant 0 : index
    %2 = vector.load %arg3[%c0_3, %c0_4, %c0_5] : memref<1x8x1xf32, #tpu.memory_space<vmem>>, vector<1x8x1xf32>
    %3 = vector.shape_cast %2 : vector<1x8x1xf32> to vector<8x1xf32>
    %c0_6 = arith.constant 0 : index
    %c0_7 = arith.constant 0 : index
    %c0_8 = arith.constant 0 : index
    %4 = vector.load %arg4[%c0_6, %c0_7, %c0_8] : memref<1x8x1xf32, #tpu.memory_space<vmem>>, vector<1x8x1xf32>
    %5 = vector.shape_cast %4 : vector<1x8x1xf32> to vector<8x1xf32>
    %6 = vector.shape_cast %1 : vector<8x8xf32> to vector<1x8x8xf32>
    %cst = arith.constant dense<0.000000e+00> : vector<1xf32>
    %7 = vector.multi_reduction <add>, %6, %cst [1, 2] : vector<1x8x8xf32> to vector<1xf32>
    %8 = vector.shape_cast %7 : vector<1xf32> to vector<1x1x1xf32>
    %9 = vector.extract %8[0, 0, 0] : f32 from vector<1x1x1xf32>
    %10 = vector.broadcast %9 : f32 to vector<1x1xf32>
    %cst_9 = arith.constant 6.400000e+01 : f32
    %11 = vector.broadcast %cst_9 : f32 to vector<1x1xf32>
    %12 = arith.divf %10, %11 : vector<1x1xf32>
    %13 = vector.broadcast %12 : vector<1x1xf32> to vector<8x8xf32>
    %14 = arith.subf %1, %13 : vector<8x8xf32>
    %15 = arith.mulf %14, %14 : vector<8x8xf32>
    %16 = vector.shape_cast %15 : vector<8x8xf32> to vector<1x8x8xf32>
    %cst_10 = arith.constant dense<0.000000e+00> : vector<1xf32>
    %17 = vector.multi_reduction <add>, %16, %cst_10 [1, 2] : vector<1x8x8xf32> to vector<1xf32>
    %18 = vector.shape_cast %17 : vector<1xf32> to vector<1x1x1xf32>
    %19 = vector.extract %18[0, 0, 0] : f32 from vector<1x1x1xf32>
    %20 = vector.broadcast %19 : f32 to vector<1x1xf32>
    %cst_11 = arith.constant 6.400000e+01 : f32
    %21 = vector.broadcast %cst_11 : f32 to vector<1x1xf32>
    %22 = arith.divf %20, %21 : vector<1x1xf32>
    %23 = vector.broadcast %12 : vector<1x1xf32> to vector<8x8xf32>
    %24 = arith.subf %1, %23 : vector<8x8xf32>
    %cst_12 = arith.constant 9.99999974E-6 : f32
    %25 = vector.broadcast %cst_12 : f32 to vector<1x1xf32>
    %26 = arith.addf %22, %25 : vector<1x1xf32>
    %27 = math.rsqrt %26 : vector<1x1xf32>
    %28 = vector.broadcast %27 : vector<1x1xf32> to vector<8x8xf32>
    %29 = arith.mulf %24, %28 : vector<8x8xf32>
    %30 = vector.broadcast %3 : vector<8x1xf32> to vector<8x8xf32>
    %31 = arith.mulf %29, %30 : vector<8x8xf32>
    %32 = vector.broadcast %5 : vector<8x1xf32> to vector<8x8xf32>
    %33 = arith.addf %31, %32 : vector<8x8xf32>
    %cst_13 = arith.constant 0.000000e+00 : f32
    %34 = vector.broadcast %cst_13 : f32 to vector<8x8xf32>
    %35 = arith.maximumf %33, %34 : vector<8x8xf32>
    %36 = vector.shape_cast %35 : vector<8x8xf32> to vector<1x1x8x8xf32>
    %c0_14 = arith.constant 0 : index
    %c0_15 = arith.constant 0 : index
    %c0_16 = arith.constant 0 : index
    %c0_17 = arith.constant 0 : index
    %37 = vector.load %arg5[%c0_14, %c0_15, %c0_16, %c0_17] : memref<1x1x8x8xf32, #tpu.memory_space<vmem>>, vector<1x1x8x8xf32>
    tpu.vector_store %arg5[%c0_14, %c0_15, %c0_16, %c0_17], %36 {strides = array<i32>} : memref<1x1x8x8xf32, #tpu.memory_space<vmem>>, vector<1x1x8x8xf32>,
    return
  }
  func.func @transform_0(%arg0: i32, %arg1: i32) -> (i32, i32, i32, i32) {
    %c0_i32 = arith.constant 0 : i32
    %c0_i32_0 = arith.constant 0 : i32
    %c0_i32_1 = arith.constant 0 : i32
    return %arg0, %arg1, %c0_i32, %c0_i32_0 : i32, i32, i32, i32
  }
  func.func @transform_1(%arg0: i32, %arg1: i32) -> (i32, i32, i32) {
    %c0_i32 = arith.constant 0 : i32
    %c0_i32_0 = arith.constant 0 : i32
    %c0_i32_1 = arith.constant 0 : i32
    return %arg1, %c0_i32, %c0_i32_0 : i32, i32, i32
  }
  func.func @transform_2(%arg0: i32, %arg1: i32) -> (i32, i32, i32) {
    %c0_i32 = arith.constant 0 : i32
    %c0_i32_0 = arith.constant 0 : i32
    %c0_i32_1 = arith.constant 0 : i32
    return %arg1, %c0_i32, %c0_i32_0 : i32, i32, i32
  }
  func.func @transform_3(%arg0: i32, %arg1: i32) -> (i32, i32, i32, i32) {
    %c0_i32 = arith.constant 0 : i32
    %c0_i32_0 = arith.constant 0 : i32
    %c0_i32_1 = arith.constant 0 : i32
    return %arg0, %arg1, %c0_i32, %c0_i32_0 : i32, i32, i32, i32
  }
}

module attributes {stable_mosaic.version = 11 : i64} {
  func.func @_conv_gemm_kernel(%arg0: i32, %arg1: i32, %arg2: i32, %arg3: memref<16x216xbf16, #tpu.memory_space<vmem>>, %arg4: memref<1x216x8xbf16, #tpu.memory_space<vmem>>, %arg5: memref<1x16x8xf32, #tpu.memory_space<vmem>>) attributes {dimension_semantics = [#tpu.dimension_semantics<parallel>, #tpu.dimension_semantics<parallel>, #tpu.dimension_semantics<arbitrary>], iteration_bounds = array<i64: 2, 1, 1>, scalar_prefetch = 0 : i64, scratch_operands = 0 : i64, tpu.core_type = #tpu.core_type<tc>, window_params = [{transform_indices = @transform_0, window_bounds = array<i64: 16, 216>}, {transform_indices = @transform_1, window_bounds = array<i64: 1, 216, 8>}, {transform_indices = @transform_2, window_bounds = array<i64: 1, 16, 8>}]} {
    %c0_i32 = arith.constant 0 : i32
    %0 = arith.cmpi eq, %arg2, %c0_i32 : i32
    %1 = arith.extui %0 : i1 to i32
    %c0_i32_0 = arith.constant 0 : i32
    %2 = arith.cmpi ne, %1, %c0_i32_0 : i32
    scf.if %2 {
      %cst_11 = arith.constant 0.000000e+00 : f32
      %13 = vector.broadcast %cst_11 : f32 to vector<1x16x8xf32>
      %c0_12 = arith.constant 0 : index
      %c0_13 = arith.constant 0 : index
      %c0_14 = arith.constant 0 : index
      %14 = vector.load %arg5[%c0_12, %c0_13, %c0_14] : memref<1x16x8xf32, #tpu.memory_space<vmem>>, vector<1x16x8xf32>
      tpu.vector_store %arg5[%c0_12, %c0_13, %c0_14], %13 {strides = array<i32>} : memref<1x16x8xf32, #tpu.memory_space<vmem>>, vector<1x16x8xf32>,
    } else {
    }
    %c0 = arith.constant 0 : index
    %c0_1 = arith.constant 0 : index
    %c0_2 = arith.constant 0 : index
    %3 = vector.load %arg5[%c0, %c0_1, %c0_2] : memref<1x16x8xf32, #tpu.memory_space<vmem>>, vector<1x16x8xf32>
    %4 = vector.shape_cast %3 : vector<1x16x8xf32> to vector<16x8xf32>
    %c0_3 = arith.constant 0 : index
    %c0_4 = arith.constant 0 : index
    %5 = vector.load %arg3[%c0_3, %c0_4] : memref<16x216xbf16, #tpu.memory_space<vmem>>, vector<16x216xbf16>
    %c0_5 = arith.constant 0 : index
    %c0_6 = arith.constant 0 : index
    %c0_7 = arith.constant 0 : index
    %6 = vector.load %arg4[%c0_5, %c0_6, %c0_7] : memref<1x216x8xbf16, #tpu.memory_space<vmem>>, vector<1x216x8xbf16>
    %7 = vector.shape_cast %6 : vector<1x216x8xbf16> to vector<216x8xbf16>
    %cst = arith.constant dense<0.000000e+00> : vector<16x8xf32>
    %8 = tpu.matmul %5, %7, %cst {dimension_numbers = #tpu.dot_dimension_numbers<[1], [0], [0], [1], [0, 0, 1, 1], [], []>} : vector<16x216xbf16>, vector<216x8xbf16>, vector<16x8xf32> -> vector<16x8xf32>
    %9 = arith.addf %4, %8 : vector<16x8xf32>
    %c0_8 = arith.constant 0 : index
    %c0_9 = arith.constant 0 : index
    %c0_10 = arith.constant 0 : index
    %10 = vector.load %arg5[%c0_8, %c0_9, %c0_10] : memref<1x16x8xf32, #tpu.memory_space<vmem>>, vector<1x16x8xf32>
    %11 = vector.shape_cast %10 : vector<1x16x8xf32> to vector<16x8xf32>
    %12 = vector.shape_cast %9 : vector<16x8xf32> to vector<1x16x8xf32>
    tpu.vector_store %arg5[%c0_8, %c0_9, %c0_10], %12 {strides = array<i32>} : memref<1x16x8xf32, #tpu.memory_space<vmem>>, vector<1x16x8xf32>,
    return
  }
  func.func @transform_0(%arg0: i32, %arg1: i32, %arg2: i32) -> (i32, i32) {
    %c0_i32 = arith.constant 0 : i32
    %c0_i32_0 = arith.constant 0 : i32
    return %c0_i32, %arg2 : i32, i32
  }
  func.func @transform_1(%arg0: i32, %arg1: i32, %arg2: i32) -> (i32, i32, i32) {
    %c0_i32 = arith.constant 0 : i32
    return %arg0, %arg2, %arg1 : i32, i32, i32
  }
  func.func @transform_2(%arg0: i32, %arg1: i32, %arg2: i32) -> (i32, i32, i32) {
    %c0_i32 = arith.constant 0 : i32
    %c0_i32_0 = arith.constant 0 : i32
    return %arg0, %c0_i32, %arg1 : i32, i32, i32
  }
}

module attributes {stable_mosaic.version = 11 : i64} {
  func.func @_conv_gemm_kernel(%arg0: i32, %arg1: i32, %arg2: i32, %arg3: memref<16x432xbf16, #tpu.memory_space<vmem>>, %arg4: memref<1x432x8xbf16, #tpu.memory_space<vmem>>, %arg5: memref<1x16x8xf32, #tpu.memory_space<vmem>>) attributes {dimension_semantics = [#tpu.dimension_semantics<parallel>, #tpu.dimension_semantics<parallel>, #tpu.dimension_semantics<arbitrary>], iteration_bounds = array<i64: 2, 1, 1>, scalar_prefetch = 0 : i64, scratch_operands = 0 : i64, tpu.core_type = #tpu.core_type<tc>, window_params = [{transform_indices = @transform_0, window_bounds = array<i64: 16, 432>}, {transform_indices = @transform_1, window_bounds = array<i64: 1, 432, 8>}, {transform_indices = @transform_2, window_bounds = array<i64: 1, 16, 8>}]} {
    %c0_i32 = arith.constant 0 : i32
    %0 = arith.cmpi eq, %arg2, %c0_i32 : i32
    %1 = arith.extui %0 : i1 to i32
    %c0_i32_0 = arith.constant 0 : i32
    %2 = arith.cmpi ne, %1, %c0_i32_0 : i32
    scf.if %2 {
      %cst_11 = arith.constant 0.000000e+00 : f32
      %13 = vector.broadcast %cst_11 : f32 to vector<1x16x8xf32>
      %c0_12 = arith.constant 0 : index
      %c0_13 = arith.constant 0 : index
      %c0_14 = arith.constant 0 : index
      %14 = vector.load %arg5[%c0_12, %c0_13, %c0_14] : memref<1x16x8xf32, #tpu.memory_space<vmem>>, vector<1x16x8xf32>
      tpu.vector_store %arg5[%c0_12, %c0_13, %c0_14], %13 {strides = array<i32>} : memref<1x16x8xf32, #tpu.memory_space<vmem>>, vector<1x16x8xf32>,
    } else {
    }
    %c0 = arith.constant 0 : index
    %c0_1 = arith.constant 0 : index
    %c0_2 = arith.constant 0 : index
    %3 = vector.load %arg5[%c0, %c0_1, %c0_2] : memref<1x16x8xf32, #tpu.memory_space<vmem>>, vector<1x16x8xf32>
    %4 = vector.shape_cast %3 : vector<1x16x8xf32> to vector<16x8xf32>
    %c0_3 = arith.constant 0 : index
    %c0_4 = arith.constant 0 : index
    %5 = vector.load %arg3[%c0_3, %c0_4] : memref<16x432xbf16, #tpu.memory_space<vmem>>, vector<16x432xbf16>
    %c0_5 = arith.constant 0 : index
    %c0_6 = arith.constant 0 : index
    %c0_7 = arith.constant 0 : index
    %6 = vector.load %arg4[%c0_5, %c0_6, %c0_7] : memref<1x432x8xbf16, #tpu.memory_space<vmem>>, vector<1x432x8xbf16>
    %7 = vector.shape_cast %6 : vector<1x432x8xbf16> to vector<432x8xbf16>
    %cst = arith.constant dense<0.000000e+00> : vector<16x8xf32>
    %8 = tpu.matmul %5, %7, %cst {dimension_numbers = #tpu.dot_dimension_numbers<[1], [0], [0], [1], [0, 0, 1, 1], [], []>} : vector<16x432xbf16>, vector<432x8xbf16>, vector<16x8xf32> -> vector<16x8xf32>
    %9 = arith.addf %4, %8 : vector<16x8xf32>
    %c0_8 = arith.constant 0 : index
    %c0_9 = arith.constant 0 : index
    %c0_10 = arith.constant 0 : index
    %10 = vector.load %arg5[%c0_8, %c0_9, %c0_10] : memref<1x16x8xf32, #tpu.memory_space<vmem>>, vector<1x16x8xf32>
    %11 = vector.shape_cast %10 : vector<1x16x8xf32> to vector<16x8xf32>
    %12 = vector.shape_cast %9 : vector<16x8xf32> to vector<1x16x8xf32>
    tpu.vector_store %arg5[%c0_8, %c0_9, %c0_10], %12 {strides = array<i32>} : memref<1x16x8xf32, #tpu.memory_space<vmem>>, vector<1x16x8xf32>,
    return
  }
  func.func @transform_0(%arg0: i32, %arg1: i32, %arg2: i32) -> (i32, i32) {
    %c0_i32 = arith.constant 0 : i32
    %c0_i32_0 = arith.constant 0 : i32
    return %c0_i32, %arg2 : i32, i32
  }
  func.func @transform_1(%arg0: i32, %arg1: i32, %arg2: i32) -> (i32, i32, i32) {
    %c0_i32 = arith.constant 0 : i32
    return %arg0, %arg2, %arg1 : i32, i32, i32
  }
  func.func @transform_2(%arg0: i32, %arg1: i32, %arg2: i32) -> (i32, i32, i32) {
    %c0_i32 = arith.constant 0 : i32
    %c0_i32_0 = arith.constant 0 : i32
    return %arg0, %c0_i32, %arg1 : i32, i32, i32
  }
}

module attributes {stable_mosaic.version = 11 : i64} {
  func.func @_conv_gemm_kernel(%arg0: i32, %arg1: i32, %arg2: i32, %arg3: memref<8x16xbf16, #tpu.memory_space<vmem>>, %arg4: memref<1x16x8xbf16, #tpu.memory_space<vmem>>, %arg5: memref<1x8x8xf32, #tpu.memory_space<vmem>>) attributes {dimension_semantics = [#tpu.dimension_semantics<parallel>, #tpu.dimension_semantics<parallel>, #tpu.dimension_semantics<arbitrary>], iteration_bounds = array<i64: 2, 1, 1>, scalar_prefetch = 0 : i64, scratch_operands = 0 : i64, tpu.core_type = #tpu.core_type<tc>, window_params = [{transform_indices = @transform_0, window_bounds = array<i64: 8, 16>}, {transform_indices = @transform_1, window_bounds = array<i64: 1, 16, 8>}, {transform_indices = @transform_2, window_bounds = array<i64: 1, 8, 8>}]} {
    %c0_i32 = arith.constant 0 : i32
    %0 = arith.cmpi eq, %arg2, %c0_i32 : i32
    %1 = arith.extui %0 : i1 to i32
    %c0_i32_0 = arith.constant 0 : i32
    %2 = arith.cmpi ne, %1, %c0_i32_0 : i32
    scf.if %2 {
      %cst_11 = arith.constant 0.000000e+00 : f32
      %13 = vector.broadcast %cst_11 : f32 to vector<1x8x8xf32>
      %c0_12 = arith.constant 0 : index
      %c0_13 = arith.constant 0 : index
      %c0_14 = arith.constant 0 : index
      %14 = vector.load %arg5[%c0_12, %c0_13, %c0_14] : memref<1x8x8xf32, #tpu.memory_space<vmem>>, vector<1x8x8xf32>
      tpu.vector_store %arg5[%c0_12, %c0_13, %c0_14], %13 {strides = array<i32>} : memref<1x8x8xf32, #tpu.memory_space<vmem>>, vector<1x8x8xf32>,
    } else {
    }
    %c0 = arith.constant 0 : index
    %c0_1 = arith.constant 0 : index
    %c0_2 = arith.constant 0 : index
    %3 = vector.load %arg5[%c0, %c0_1, %c0_2] : memref<1x8x8xf32, #tpu.memory_space<vmem>>, vector<1x8x8xf32>
    %4 = vector.shape_cast %3 : vector<1x8x8xf32> to vector<8x8xf32>
    %c0_3 = arith.constant 0 : index
    %c0_4 = arith.constant 0 : index
    %5 = vector.load %arg3[%c0_3, %c0_4] : memref<8x16xbf16, #tpu.memory_space<vmem>>, vector<8x16xbf16>
    %c0_5 = arith.constant 0 : index
    %c0_6 = arith.constant 0 : index
    %c0_7 = arith.constant 0 : index
    %6 = vector.load %arg4[%c0_5, %c0_6, %c0_7] : memref<1x16x8xbf16, #tpu.memory_space<vmem>>, vector<1x16x8xbf16>
    %7 = vector.shape_cast %6 : vector<1x16x8xbf16> to vector<16x8xbf16>
    %cst = arith.constant dense<0.000000e+00> : vector<8x8xf32>
    %8 = tpu.matmul %5, %7, %cst {dimension_numbers = #tpu.dot_dimension_numbers<[1], [0], [0], [1], [0, 0, 1, 1], [], []>} : vector<8x16xbf16>, vector<16x8xbf16>, vector<8x8xf32> -> vector<8x8xf32>
    %9 = arith.addf %4, %8 : vector<8x8xf32>
    %c0_8 = arith.constant 0 : index
    %c0_9 = arith.constant 0 : index
    %c0_10 = arith.constant 0 : index
    %10 = vector.load %arg5[%c0_8, %c0_9, %c0_10] : memref<1x8x8xf32, #tpu.memory_space<vmem>>, vector<1x8x8xf32>
    %11 = vector.shape_cast %10 : vector<1x8x8xf32> to vector<8x8xf32>
    %12 = vector.shape_cast %9 : vector<8x8xf32> to vector<1x8x8xf32>
    tpu.vector_store %arg5[%c0_8, %c0_9, %c0_10], %12 {strides = array<i32>} : memref<1x8x8xf32, #tpu.memory_space<vmem>>, vector<1x8x8xf32>,
    return
  }
  func.func @transform_0(%arg0: i32, %arg1: i32, %arg2: i32) -> (i32, i32) {
    %c0_i32 = arith.constant 0 : i32
    %c0_i32_0 = arith.constant 0 : i32
    return %c0_i32, %arg2 : i32, i32
  }
  func.func @transform_1(%arg0: i32, %arg1: i32, %arg2: i32) -> (i32, i32, i32) {
    %c0_i32 = arith.constant 0 : i32
    return %arg0, %arg2, %arg1 : i32, i32, i32
  }
  func.func @transform_2(%arg0: i32, %arg1: i32, %arg2: i32) -> (i32, i32, i32) {
    %c0_i32 = arith.constant 0 : i32
    %c0_i32_0 = arith.constant 0 : i32
    return %arg0, %c0_i32, %arg1 : i32, i32, i32
  }
}

module attributes {stable_mosaic.version = 11 : i64} {
  func.func @_conv_gemm_kernel(%arg0: i32, %arg1: i32, %arg2: i32, %arg3: memref<8x128xbf16, #tpu.memory_space<vmem>>, %arg4: memref<1x128x8xbf16, #tpu.memory_space<vmem>>, %arg5: memref<1x8x8xf32, #tpu.memory_space<vmem>>) attributes {dimension_semantics = [#tpu.dimension_semantics<parallel>, #tpu.dimension_semantics<parallel>, #tpu.dimension_semantics<arbitrary>], iteration_bounds = array<i64: 2, 1, 1>, scalar_prefetch = 0 : i64, scratch_operands = 0 : i64, tpu.core_type = #tpu.core_type<tc>, window_params = [{transform_indices = @transform_0, window_bounds = array<i64: 8, 128>}, {transform_indices = @transform_1, window_bounds = array<i64: 1, 128, 8>}, {transform_indices = @transform_2, window_bounds = array<i64: 1, 8, 8>}]} {
    %c0_i32 = arith.constant 0 : i32
    %0 = arith.cmpi eq, %arg2, %c0_i32 : i32
    %1 = arith.extui %0 : i1 to i32
    %c0_i32_0 = arith.constant 0 : i32
    %2 = arith.cmpi ne, %1, %c0_i32_0 : i32
    scf.if %2 {
      %cst_11 = arith.constant 0.000000e+00 : f32
      %13 = vector.broadcast %cst_11 : f32 to vector<1x8x8xf32>
      %c0_12 = arith.constant 0 : index
      %c0_13 = arith.constant 0 : index
      %c0_14 = arith.constant 0 : index
      %14 = vector.load %arg5[%c0_12, %c0_13, %c0_14] : memref<1x8x8xf32, #tpu.memory_space<vmem>>, vector<1x8x8xf32>
      tpu.vector_store %arg5[%c0_12, %c0_13, %c0_14], %13 {strides = array<i32>} : memref<1x8x8xf32, #tpu.memory_space<vmem>>, vector<1x8x8xf32>,
    } else {
    }
    %c0 = arith.constant 0 : index
    %c0_1 = arith.constant 0 : index
    %c0_2 = arith.constant 0 : index
    %3 = vector.load %arg5[%c0, %c0_1, %c0_2] : memref<1x8x8xf32, #tpu.memory_space<vmem>>, vector<1x8x8xf32>
    %4 = vector.shape_cast %3 : vector<1x8x8xf32> to vector<8x8xf32>
    %c0_3 = arith.constant 0 : index
    %c0_4 = arith.constant 0 : index
    %5 = vector.load %arg3[%c0_3, %c0_4] : memref<8x128xbf16, #tpu.memory_space<vmem>>, vector<8x128xbf16>
    %c0_5 = arith.constant 0 : index
    %c0_6 = arith.constant 0 : index
    %c0_7 = arith.constant 0 : index
    %6 = vector.load %arg4[%c0_5, %c0_6, %c0_7] : memref<1x128x8xbf16, #tpu.memory_space<vmem>>, vector<1x128x8xbf16>
    %7 = vector.shape_cast %6 : vector<1x128x8xbf16> to vector<128x8xbf16>
    %cst = arith.constant dense<0.000000e+00> : vector<8x8xf32>
    %8 = tpu.matmul %5, %7, %cst {dimension_numbers = #tpu.dot_dimension_numbers<[1], [0], [0], [1], [0, 0, 1, 1], [], []>} : vector<8x128xbf16>, vector<128x8xbf16>, vector<8x8xf32> -> vector<8x8xf32>
    %9 = arith.addf %4, %8 : vector<8x8xf32>
    %c0_8 = arith.constant 0 : index
    %c0_9 = arith.constant 0 : index
    %c0_10 = arith.constant 0 : index
    %10 = vector.load %arg5[%c0_8, %c0_9, %c0_10] : memref<1x8x8xf32, #tpu.memory_space<vmem>>, vector<1x8x8xf32>
    %11 = vector.shape_cast %10 : vector<1x8x8xf32> to vector<8x8xf32>
    %12 = vector.shape_cast %9 : vector<8x8xf32> to vector<1x8x8xf32>
    tpu.vector_store %arg5[%c0_8, %c0_9, %c0_10], %12 {strides = array<i32>} : memref<1x8x8xf32, #tpu.memory_space<vmem>>, vector<1x8x8xf32>,
    return
  }
  func.func @transform_0(%arg0: i32, %arg1: i32, %arg2: i32) -> (i32, i32) {
    %c0_i32 = arith.constant 0 : i32
    %c0_i32_0 = arith.constant 0 : i32
    return %c0_i32, %arg2 : i32, i32
  }
  func.func @transform_1(%arg0: i32, %arg1: i32, %arg2: i32) -> (i32, i32, i32) {
    %c0_i32 = arith.constant 0 : i32
    return %arg0, %arg2, %arg1 : i32, i32, i32
  }
  func.func @transform_2(%arg0: i32, %arg1: i32, %arg2: i32) -> (i32, i32, i32) {
    %c0_i32 = arith.constant 0 : i32
    %c0_i32_0 = arith.constant 0 : i32
    return %arg0, %c0_i32, %arg1 : i32, i32, i32
  }
}

module attributes {stable_mosaic.version = 11 : i64} {
  func.func @_conv_gemm_kernel(%arg0: i32, %arg1: i32, %arg2: i32, %arg3: memref<8x32xbf16, #tpu.memory_space<vmem>>, %arg4: memref<1x32x8xbf16, #tpu.memory_space<vmem>>, %arg5: memref<1x8x8xf32, #tpu.memory_space<vmem>>) attributes {dimension_semantics = [#tpu.dimension_semantics<parallel>, #tpu.dimension_semantics<parallel>, #tpu.dimension_semantics<arbitrary>], iteration_bounds = array<i64: 2, 1, 1>, scalar_prefetch = 0 : i64, scratch_operands = 0 : i64, tpu.core_type = #tpu.core_type<tc>, window_params = [{transform_indices = @transform_0, window_bounds = array<i64: 8, 32>}, {transform_indices = @transform_1, window_bounds = array<i64: 1, 32, 8>}, {transform_indices = @transform_2, window_bounds = array<i64: 1, 8, 8>}]} {
    %c0_i32 = arith.constant 0 : i32
    %0 = arith.cmpi eq, %arg2, %c0_i32 : i32
    %1 = arith.extui %0 : i1 to i32
    %c0_i32_0 = arith.constant 0 : i32
    %2 = arith.cmpi ne, %1, %c0_i32_0 : i32
    scf.if %2 {
      %cst_11 = arith.constant 0.000000e+00 : f32
      %13 = vector.broadcast %cst_11 : f32 to vector<1x8x8xf32>
      %c0_12 = arith.constant 0 : index
      %c0_13 = arith.constant 0 : index
      %c0_14 = arith.constant 0 : index
      %14 = vector.load %arg5[%c0_12, %c0_13, %c0_14] : memref<1x8x8xf32, #tpu.memory_space<vmem>>, vector<1x8x8xf32>
      tpu.vector_store %arg5[%c0_12, %c0_13, %c0_14], %13 {strides = array<i32>} : memref<1x8x8xf32, #tpu.memory_space<vmem>>, vector<1x8x8xf32>,
    } else {
    }
    %c0 = arith.constant 0 : index
    %c0_1 = arith.constant 0 : index
    %c0_2 = arith.constant 0 : index
    %3 = vector.load %arg5[%c0, %c0_1, %c0_2] : memref<1x8x8xf32, #tpu.memory_space<vmem>>, vector<1x8x8xf32>
    %4 = vector.shape_cast %3 : vector<1x8x8xf32> to vector<8x8xf32>
    %c0_3 = arith.constant 0 : index
    %c0_4 = arith.constant 0 : index
    %5 = vector.load %arg3[%c0_3, %c0_4] : memref<8x32xbf16, #tpu.memory_space<vmem>>, vector<8x32xbf16>
    %c0_5 = arith.constant 0 : index
    %c0_6 = arith.constant 0 : index
    %c0_7 = arith.constant 0 : index
    %6 = vector.load %arg4[%c0_5, %c0_6, %c0_7] : memref<1x32x8xbf16, #tpu.memory_space<vmem>>, vector<1x32x8xbf16>
    %7 = vector.shape_cast %6 : vector<1x32x8xbf16> to vector<32x8xbf16>
    %cst = arith.constant dense<0.000000e+00> : vector<8x8xf32>
    %8 = tpu.matmul %5, %7, %cst {dimension_numbers = #tpu.dot_dimension_numbers<[1], [0], [0], [1], [0, 0, 1, 1], [], []>} : vector<8x32xbf16>, vector<32x8xbf16>, vector<8x8xf32> -> vector<8x8xf32>
    %9 = arith.addf %4, %8 : vector<8x8xf32>
    %c0_8 = arith.constant 0 : index
    %c0_9 = arith.constant 0 : index
    %c0_10 = arith.constant 0 : index
    %10 = vector.load %arg5[%c0_8, %c0_9, %c0_10] : memref<1x8x8xf32, #tpu.memory_space<vmem>>, vector<1x8x8xf32>
    %11 = vector.shape_cast %10 : vector<1x8x8xf32> to vector<8x8xf32>
    %12 = vector.shape_cast %9 : vector<8x8xf32> to vector<1x8x8xf32>
    tpu.vector_store %arg5[%c0_8, %c0_9, %c0_10], %12 {strides = array<i32>} : memref<1x8x8xf32, #tpu.memory_space<vmem>>, vector<1x8x8xf32>,
    return
  }
  func.func @transform_0(%arg0: i32, %arg1: i32, %arg2: i32) -> (i32, i32) {
    %c0_i32 = arith.constant 0 : i32
    %c0_i32_0 = arith.constant 0 : i32
    return %c0_i32, %arg2 : i32, i32
  }
  func.func @transform_1(%arg0: i32, %arg1: i32, %arg2: i32) -> (i32, i32, i32) {
    %c0_i32 = arith.constant 0 : i32
    return %arg0, %arg2, %arg1 : i32, i32, i32
  }
  func.func @transform_2(%arg0: i32, %arg1: i32, %arg2: i32) -> (i32, i32, i32) {
    %c0_i32 = arith.constant 0 : i32
    %c0_i32_0 = arith.constant 0 : i32
    return %arg0, %c0_i32, %arg1 : i32, i32, i32
  }
}

module attributes {stable_mosaic.version = 11 : i64} {
  func.func @_conv_gemm_kernel(%arg0: i32, %arg1: i32, %arg2: i32, %arg3: memref<8x64xbf16, #tpu.memory_space<vmem>>, %arg4: memref<1x64x8xbf16, #tpu.memory_space<vmem>>, %arg5: memref<1x8x8xf32, #tpu.memory_space<vmem>>) attributes {dimension_semantics = [#tpu.dimension_semantics<parallel>, #tpu.dimension_semantics<parallel>, #tpu.dimension_semantics<arbitrary>], iteration_bounds = array<i64: 2, 1, 1>, scalar_prefetch = 0 : i64, scratch_operands = 0 : i64, tpu.core_type = #tpu.core_type<tc>, window_params = [{transform_indices = @transform_0, window_bounds = array<i64: 8, 64>}, {transform_indices = @transform_1, window_bounds = array<i64: 1, 64, 8>}, {transform_indices = @transform_2, window_bounds = array<i64: 1, 8, 8>}]} {
    %c0_i32 = arith.constant 0 : i32
    %0 = arith.cmpi eq, %arg2, %c0_i32 : i32
    %1 = arith.extui %0 : i1 to i32
    %c0_i32_0 = arith.constant 0 : i32
    %2 = arith.cmpi ne, %1, %c0_i32_0 : i32
    scf.if %2 {
      %cst_11 = arith.constant 0.000000e+00 : f32
      %13 = vector.broadcast %cst_11 : f32 to vector<1x8x8xf32>
      %c0_12 = arith.constant 0 : index
      %c0_13 = arith.constant 0 : index
      %c0_14 = arith.constant 0 : index
      %14 = vector.load %arg5[%c0_12, %c0_13, %c0_14] : memref<1x8x8xf32, #tpu.memory_space<vmem>>, vector<1x8x8xf32>
      tpu.vector_store %arg5[%c0_12, %c0_13, %c0_14], %13 {strides = array<i32>} : memref<1x8x8xf32, #tpu.memory_space<vmem>>, vector<1x8x8xf32>,
    } else {
    }
    %c0 = arith.constant 0 : index
    %c0_1 = arith.constant 0 : index
    %c0_2 = arith.constant 0 : index
    %3 = vector.load %arg5[%c0, %c0_1, %c0_2] : memref<1x8x8xf32, #tpu.memory_space<vmem>>, vector<1x8x8xf32>
    %4 = vector.shape_cast %3 : vector<1x8x8xf32> to vector<8x8xf32>
    %c0_3 = arith.constant 0 : index
    %c0_4 = arith.constant 0 : index
    %5 = vector.load %arg3[%c0_3, %c0_4] : memref<8x64xbf16, #tpu.memory_space<vmem>>, vector<8x64xbf16>
    %c0_5 = arith.constant 0 : index
    %c0_6 = arith.constant 0 : index
    %c0_7 = arith.constant 0 : index
    %6 = vector.load %arg4[%c0_5, %c0_6, %c0_7] : memref<1x64x8xbf16, #tpu.memory_space<vmem>>, vector<1x64x8xbf16>
    %7 = vector.shape_cast %6 : vector<1x64x8xbf16> to vector<64x8xbf16>
    %cst = arith.constant dense<0.000000e+00> : vector<8x8xf32>
    %8 = tpu.matmul %5, %7, %cst {dimension_numbers = #tpu.dot_dimension_numbers<[1], [0], [0], [1], [0, 0, 1, 1], [], []>} : vector<8x64xbf16>, vector<64x8xbf16>, vector<8x8xf32> -> vector<8x8xf32>
    %9 = arith.addf %4, %8 : vector<8x8xf32>
    %c0_8 = arith.constant 0 : index
    %c0_9 = arith.constant 0 : index
    %c0_10 = arith.constant 0 : index
    %10 = vector.load %arg5[%c0_8, %c0_9, %c0_10] : memref<1x8x8xf32, #tpu.memory_space<vmem>>, vector<1x8x8xf32>
    %11 = vector.shape_cast %10 : vector<1x8x8xf32> to vector<8x8xf32>
    %12 = vector.shape_cast %9 : vector<8x8xf32> to vector<1x8x8xf32>
    tpu.vector_store %arg5[%c0_8, %c0_9, %c0_10], %12 {strides = array<i32>} : memref<1x8x8xf32, #tpu.memory_space<vmem>>, vector<1x8x8xf32>,
    return
  }
  func.func @transform_0(%arg0: i32, %arg1: i32, %arg2: i32) -> (i32, i32) {
    %c0_i32 = arith.constant 0 : i32
    %c0_i32_0 = arith.constant 0 : i32
    return %c0_i32, %arg2 : i32, i32
  }
  func.func @transform_1(%arg0: i32, %arg1: i32, %arg2: i32) -> (i32, i32, i32) {
    %c0_i32 = arith.constant 0 : i32
    return %arg0, %arg2, %arg1 : i32, i32, i32
  }
  func.func @transform_2(%arg0: i32, %arg1: i32, %arg2: i32) -> (i32, i32, i32) {
    %c0_i32 = arith.constant 0 : i32
    %c0_i32_0 = arith.constant 0 : i32
    return %arg0, %c0_i32, %arg1 : i32, i32, i32
  }
}

module attributes {stable_mosaic.version = 11 : i64} {
  func.func @_bn_stats_kernel(%arg0: i32, %arg1: i32, %arg2: memref<1x8x64xf32, #tpu.memory_space<vmem>>, %arg3: memref<8x1xf32, #tpu.memory_space<vmem>>, %arg4: memref<8x1xf32, #tpu.memory_space<vmem>>) attributes {dimension_semantics = [#tpu.dimension_semantics<arbitrary>, #tpu.dimension_semantics<arbitrary>], iteration_bounds = array<i64: 2, 1>, scalar_prefetch = 0 : i64, scratch_operands = 0 : i64, tpu.core_type = #tpu.core_type<tc>, window_params = [{transform_indices = @transform_0, window_bounds = array<i64: 1, 8, 64>}, {pipeline_mode = #tpu.pipeline_mode<synchronous>, transform_indices = @transform_1, window_bounds = array<i64: 8, 1>}, {pipeline_mode = #tpu.pipeline_mode<synchronous>, transform_indices = @transform_2, window_bounds = array<i64: 8, 1>}]} {
    %c0_i32 = arith.constant 0 : i32
    %0 = arith.cmpi eq, %arg0, %c0_i32 : i32
    %c0_i32_0 = arith.constant 0 : i32
    %1 = arith.cmpi eq, %arg1, %c0_i32_0 : i32
    %2 = arith.andi %0, %1 : i1
    %3 = arith.extui %2 : i1 to i32
    %c0_i32_1 = arith.constant 0 : i32
    %4 = arith.cmpi ne, %3, %c0_i32_1 : i32
    scf.if %4 {
      %cst_13 = arith.constant 0.000000e+00 : f32
      %18 = vector.broadcast %cst_13 : f32 to vector<8x1xf32>
      %c0_14 = arith.constant 0 : index
      %c0_15 = arith.constant 0 : index
      %19 = vector.load %arg3[%c0_14, %c0_15] : memref<8x1xf32, #tpu.memory_space<vmem>>, vector<8x1xf32>
      tpu.vector_store %arg3[%c0_14, %c0_15], %18 {strides = array<i32>} : memref<8x1xf32, #tpu.memory_space<vmem>>, vector<8x1xf32>,
      %cst_16 = arith.constant 0.000000e+00 : f32
      %20 = vector.broadcast %cst_16 : f32 to vector<8x1xf32>
      %c0_17 = arith.constant 0 : index
      %c0_18 = arith.constant 0 : index
      %21 = vector.load %arg4[%c0_17, %c0_18] : memref<8x1xf32, #tpu.memory_space<vmem>>, vector<8x1xf32>
      tpu.vector_store %arg4[%c0_17, %c0_18], %20 {strides = array<i32>} : memref<8x1xf32, #tpu.memory_space<vmem>>, vector<8x1xf32>,
    } else {
    }
    %c0 = arith.constant 0 : index
    %c0_2 = arith.constant 0 : index
    %c0_3 = arith.constant 0 : index
    %5 = vector.load %arg2[%c0, %c0_2, %c0_3] : memref<1x8x64xf32, #tpu.memory_space<vmem>>, vector<1x8x64xf32>
    %6 = vector.shape_cast %5 : vector<1x8x64xf32> to vector<8x64xf32>
    %c0_4 = arith.constant 0 : index
    %c0_5 = arith.constant 0 : index
    %7 = vector.load %arg3[%c0_4, %c0_5] : memref<8x1xf32, #tpu.memory_space<vmem>>, vector<8x1xf32>
    %cst = arith.constant dense<0.000000e+00> : vector<8xf32>
    %8 = vector.multi_reduction <add>, %6, %cst [1] : vector<8x64xf32> to vector<8xf32>
    %9 = vector.shape_cast %8 : vector<8xf32> to vector<8x1xf32>
    %10 = arith.addf %7, %9 : vector<8x1xf32>
    %c0_6 = arith.constant 0 : index
    %c0_7 = arith.constant 0 : index
    %11 = vector.load %arg3[%c0_6, %c0_7] : memref<8x1xf32, #tpu.memory_space<vmem>>, vector<8x1xf32>
    tpu.vector_store %arg3[%c0_6, %c0_7], %10 {strides = array<i32>} : memref<8x1xf32, #tpu.memory_space<vmem>>, vector<8x1xf32>,
    %c0_8 = arith.constant 0 : index
    %c0_9 = arith.constant 0 : index
    %12 = vector.load %arg4[%c0_8, %c0_9] : memref<8x1xf32, #tpu.memory_space<vmem>>, vector<8x1xf32>
    %13 = arith.mulf %6, %6 : vector<8x64xf32>
    %cst_10 = arith.constant dense<0.000000e+00> : vector<8xf32>
    %14 = vector.multi_reduction <add>, %13, %cst_10 [1] : vector<8x64xf32> to vector<8xf32>
    %15 = vector.shape_cast %14 : vector<8xf32> to vector<8x1xf32>
    %16 = arith.addf %12, %15 : vector<8x1xf32>
    %c0_11 = arith.constant 0 : index
    %c0_12 = arith.constant 0 : index
    %17 = vector.load %arg4[%c0_11, %c0_12] : memref<8x1xf32, #tpu.memory_space<vmem>>, vector<8x1xf32>
    tpu.vector_store %arg4[%c0_11, %c0_12], %16 {strides = array<i32>} : memref<8x1xf32, #tpu.memory_space<vmem>>, vector<8x1xf32>,
    return
  }
  func.func @transform_0(%arg0: i32, %arg1: i32) -> (i32, i32, i32) {
    %c0_i32 = arith.constant 0 : i32
    %c0_i32_0 = arith.constant 0 : i32
    return %arg0, %c0_i32, %arg1 : i32, i32, i32
  }
  func.func @transform_1(%arg0: i32, %arg1: i32) -> (i32, i32) {
    %c0_i32 = arith.constant 0 : i32
    %c0_i32_0 = arith.constant 0 : i32
    %c0_i32_1 = arith.constant 0 : i32
    return %c0_i32, %c0_i32_0 : i32, i32
  }
  func.func @transform_2(%arg0: i32, %arg1: i32) -> (i32, i32) {
    %c0_i32 = arith.constant 0 : i32
    %c0_i32_0 = arith.constant 0 : i32
    %c0_i32_1 = arith.constant 0 : i32
    return %c0_i32, %c0_i32_0 : i32, i32
  }
}

module attributes {stable_mosaic.version = 11 : i64} {
  func.func @_conv_gemm_kernel(%arg0: i32, %arg1: i32, %arg2: i32, %arg3: memref<4x8xbf16, #tpu.memory_space<vmem>>, %arg4: memref<1x8x64xbf16, #tpu.memory_space<vmem>>, %arg5: memref<1x4x64xf32, #tpu.memory_space<vmem>>) attributes {dimension_semantics = [#tpu.dimension_semantics<parallel>, #tpu.dimension_semantics<parallel>, #tpu.dimension_semantics<arbitrary>], iteration_bounds = array<i64: 2, 1, 1>, scalar_prefetch = 0 : i64, scratch_operands = 0 : i64, tpu.core_type = #tpu.core_type<tc>, window_params = [{transform_indices = @transform_0, window_bounds = array<i64: 4, 8>}, {transform_indices = @transform_1, window_bounds = array<i64: 1, 8, 64>}, {transform_indices = @transform_2, window_bounds = array<i64: 1, 4, 64>}]} {
    %c0_i32 = arith.constant 0 : i32
    %0 = arith.cmpi eq, %arg2, %c0_i32 : i32
    %1 = arith.extui %0 : i1 to i32
    %c0_i32_0 = arith.constant 0 : i32
    %2 = arith.cmpi ne, %1, %c0_i32_0 : i32
    scf.if %2 {
      %cst_11 = arith.constant 0.000000e+00 : f32
      %13 = vector.broadcast %cst_11 : f32 to vector<1x4x64xf32>
      %c0_12 = arith.constant 0 : index
      %c0_13 = arith.constant 0 : index
      %c0_14 = arith.constant 0 : index
      %14 = vector.load %arg5[%c0_12, %c0_13, %c0_14] : memref<1x4x64xf32, #tpu.memory_space<vmem>>, vector<1x4x64xf32>
      tpu.vector_store %arg5[%c0_12, %c0_13, %c0_14], %13 {strides = array<i32>} : memref<1x4x64xf32, #tpu.memory_space<vmem>>, vector<1x4x64xf32>,
    } else {
    }
    %c0 = arith.constant 0 : index
    %c0_1 = arith.constant 0 : index
    %c0_2 = arith.constant 0 : index
    %3 = vector.load %arg5[%c0, %c0_1, %c0_2] : memref<1x4x64xf32, #tpu.memory_space<vmem>>, vector<1x4x64xf32>
    %4 = vector.shape_cast %3 : vector<1x4x64xf32> to vector<4x64xf32>
    %c0_3 = arith.constant 0 : index
    %c0_4 = arith.constant 0 : index
    %5 = vector.load %arg3[%c0_3, %c0_4] : memref<4x8xbf16, #tpu.memory_space<vmem>>, vector<4x8xbf16>
    %c0_5 = arith.constant 0 : index
    %c0_6 = arith.constant 0 : index
    %c0_7 = arith.constant 0 : index
    %6 = vector.load %arg4[%c0_5, %c0_6, %c0_7] : memref<1x8x64xbf16, #tpu.memory_space<vmem>>, vector<1x8x64xbf16>
    %7 = vector.shape_cast %6 : vector<1x8x64xbf16> to vector<8x64xbf16>
    %cst = arith.constant dense<0.000000e+00> : vector<4x64xf32>
    %8 = tpu.matmul %5, %7, %cst {dimension_numbers = #tpu.dot_dimension_numbers<[1], [0], [0], [1], [0, 0, 1, 1], [], []>} : vector<4x8xbf16>, vector<8x64xbf16>, vector<4x64xf32> -> vector<4x64xf32>
    %9 = arith.addf %4, %8 : vector<4x64xf32>
    %c0_8 = arith.constant 0 : index
    %c0_9 = arith.constant 0 : index
    %c0_10 = arith.constant 0 : index
    %10 = vector.load %arg5[%c0_8, %c0_9, %c0_10] : memref<1x4x64xf32, #tpu.memory_space<vmem>>, vector<1x4x64xf32>
    %11 = vector.shape_cast %10 : vector<1x4x64xf32> to vector<4x64xf32>
    %12 = vector.shape_cast %9 : vector<4x64xf32> to vector<1x4x64xf32>
    tpu.vector_store %arg5[%c0_8, %c0_9, %c0_10], %12 {strides = array<i32>} : memref<1x4x64xf32, #tpu.memory_space<vmem>>, vector<1x4x64xf32>,
    return
  }
  func.func @transform_0(%arg0: i32, %arg1: i32, %arg2: i32) -> (i32, i32) {
    %c0_i32 = arith.constant 0 : i32
    %c0_i32_0 = arith.constant 0 : i32
    return %c0_i32, %arg2 : i32, i32
  }
  func.func @transform_1(%arg0: i32, %arg1: i32, %arg2: i32) -> (i32, i32, i32) {
    %c0_i32 = arith.constant 0 : i32
    return %arg0, %arg2, %arg1 : i32, i32, i32
  }
  func.func @transform_2(%arg0: i32, %arg1: i32, %arg2: i32) -> (i32, i32, i32) {
    %c0_i32 = arith.constant 0 : i32
    %c0_i32_0 = arith.constant 0 : i32
    return %arg0, %c0_i32, %arg1 : i32, i32, i32
  }
}

module attributes {stable_mosaic.version = 11 : i64} {
  func.func @_bn_apply_kernel(%arg0: i32, %arg1: i32, %arg2: memref<1x8x64xf32, #tpu.memory_space<vmem>>, %arg3: memref<1x8x64xf32, #tpu.memory_space<vmem>>, %arg4: memref<8x1xf32, #tpu.memory_space<vmem>>, %arg5: memref<8x1xf32, #tpu.memory_space<vmem>>, %arg6: memref<1x8x64xf32, #tpu.memory_space<vmem>>) attributes {dimension_semantics = [#tpu.dimension_semantics<parallel>, #tpu.dimension_semantics<parallel>], iteration_bounds = array<i64: 2, 1>, scalar_prefetch = 0 : i64, scratch_operands = 0 : i64, tpu.core_type = #tpu.core_type<tc>, window_params = [{transform_indices = @transform_0, window_bounds = array<i64: 1, 8, 64>}, {transform_indices = @transform_1, window_bounds = array<i64: 1, 8, 64>}, {pipeline_mode = #tpu.pipeline_mode<synchronous>, transform_indices = @transform_2, window_bounds = array<i64: 8, 1>}, {pipeline_mode = #tpu.pipeline_mode<synchronous>, transform_indices = @transform_3, window_bounds = array<i64: 8, 1>}, {transform_indices = @transform_4, window_bounds = array<i64: 1, 8, 64>}]} {
    %c0 = arith.constant 0 : index
    %c0_0 = arith.constant 0 : index
    %c0_1 = arith.constant 0 : index
    %0 = vector.load %arg2[%c0, %c0_0, %c0_1] : memref<1x8x64xf32, #tpu.memory_space<vmem>>, vector<1x8x64xf32>
    %c0_2 = arith.constant 0 : index
    %c0_3 = arith.constant 0 : index
    %1 = vector.load %arg4[%c0_2, %c0_3] : memref<8x1xf32, #tpu.memory_space<vmem>>, vector<8x1xf32>
    %2 = vector.shape_cast %1 : vector<8x1xf32> to vector<1x8x1xf32>
    %3 = vector.broadcast %2 : vector<1x8x1xf32> to vector<1x8x64xf32>
    %4 = arith.mulf %0, %3 : vector<1x8x64xf32>
    %c0_4 = arith.constant 0 : index
    %c0_5 = arith.constant 0 : index
    %5 = vector.load %arg5[%c0_4, %c0_5] : memref<8x1xf32, #tpu.memory_space<vmem>>, vector<8x1xf32>
    %6 = vector.shape_cast %5 : vector<8x1xf32> to vector<1x8x1xf32>
    %7 = vector.broadcast %6 : vector<1x8x1xf32> to vector<1x8x64xf32>
    %8 = arith.addf %4, %7 : vector<1x8x64xf32>
    %c0_6 = arith.constant 0 : index
    %c0_7 = arith.constant 0 : index
    %c0_8 = arith.constant 0 : index
    %9 = vector.load %arg3[%c0_6, %c0_7, %c0_8] : memref<1x8x64xf32, #tpu.memory_space<vmem>>, vector<1x8x64xf32>
    %10 = arith.addf %8, %9 : vector<1x8x64xf32>
    %cst = arith.constant 0.000000e+00 : f32
    %11 = vector.broadcast %cst : f32 to vector<1x8x64xf32>
    %12 = arith.maximumf %10, %11 : vector<1x8x64xf32>
    %c0_9 = arith.constant 0 : index
    %c0_10 = arith.constant 0 : index
    %c0_11 = arith.constant 0 : index
    %13 = vector.load %arg6[%c0_9, %c0_10, %c0_11] : memref<1x8x64xf32, #tpu.memory_space<vmem>>, vector<1x8x64xf32>
    tpu.vector_store %arg6[%c0_9, %c0_10, %c0_11], %12 {strides = array<i32>} : memref<1x8x64xf32, #tpu.memory_space<vmem>>, vector<1x8x64xf32>,
    return
  }
  func.func @transform_0(%arg0: i32, %arg1: i32) -> (i32, i32, i32) {
    %c0_i32 = arith.constant 0 : i32
    %c0_i32_0 = arith.constant 0 : i32
    return %arg0, %c0_i32, %arg1 : i32, i32, i32
  }
  func.func @transform_1(%arg0: i32, %arg1: i32) -> (i32, i32, i32) {
    %c0_i32 = arith.constant 0 : i32
    %c0_i32_0 = arith.constant 0 : i32
    return %arg0, %c0_i32, %arg1 : i32, i32, i32
  }
  func.func @transform_2(%arg0: i32, %arg1: i32) -> (i32, i32) {
    %c0_i32 = arith.constant 0 : i32
    %c0_i32_0 = arith.constant 0 : i32
    %c0_i32_1 = arith.constant 0 : i32
    return %c0_i32, %c0_i32_0 : i32, i32
  }
  func.func @transform_3(%arg0: i32, %arg1: i32) -> (i32, i32) {
    %c0_i32 = arith.constant 0 : i32
    %c0_i32_0 = arith.constant 0 : i32
    %c0_i32_1 = arith.constant 0 : i32
    return %c0_i32, %c0_i32_0 : i32, i32
  }
  func.func @transform_4(%arg0: i32, %arg1: i32) -> (i32, i32, i32) {
    %c0_i32 = arith.constant 0 : i32
    %c0_i32_0 = arith.constant 0 : i32
    return %arg0, %c0_i32, %arg1 : i32, i32, i32
  }
}

module attributes {stable_mosaic.version = 11 : i64} {
  func.func @_conv_gemm_kernel(%arg0: i32, %arg1: i32, %arg2: i32, %arg3: memref<4x64xbf16, #tpu.memory_space<vmem>>, %arg4: memref<1x64x64xbf16, #tpu.memory_space<vmem>>, %arg5: memref<1x4x64xf32, #tpu.memory_space<vmem>>) attributes {dimension_semantics = [#tpu.dimension_semantics<parallel>, #tpu.dimension_semantics<parallel>, #tpu.dimension_semantics<arbitrary>], iteration_bounds = array<i64: 2, 1, 1>, scalar_prefetch = 0 : i64, scratch_operands = 0 : i64, tpu.core_type = #tpu.core_type<tc>, window_params = [{transform_indices = @transform_0, window_bounds = array<i64: 4, 64>}, {transform_indices = @transform_1, window_bounds = array<i64: 1, 64, 64>}, {transform_indices = @transform_2, window_bounds = array<i64: 1, 4, 64>}]} {
    %c0_i32 = arith.constant 0 : i32
    %0 = arith.cmpi eq, %arg2, %c0_i32 : i32
    %1 = arith.extui %0 : i1 to i32
    %c0_i32_0 = arith.constant 0 : i32
    %2 = arith.cmpi ne, %1, %c0_i32_0 : i32
    scf.if %2 {
      %cst_11 = arith.constant 0.000000e+00 : f32
      %13 = vector.broadcast %cst_11 : f32 to vector<1x4x64xf32>
      %c0_12 = arith.constant 0 : index
      %c0_13 = arith.constant 0 : index
      %c0_14 = arith.constant 0 : index
      %14 = vector.load %arg5[%c0_12, %c0_13, %c0_14] : memref<1x4x64xf32, #tpu.memory_space<vmem>>, vector<1x4x64xf32>
      tpu.vector_store %arg5[%c0_12, %c0_13, %c0_14], %13 {strides = array<i32>} : memref<1x4x64xf32, #tpu.memory_space<vmem>>, vector<1x4x64xf32>,
    } else {
    }
    %c0 = arith.constant 0 : index
    %c0_1 = arith.constant 0 : index
    %c0_2 = arith.constant 0 : index
    %3 = vector.load %arg5[%c0, %c0_1, %c0_2] : memref<1x4x64xf32, #tpu.memory_space<vmem>>, vector<1x4x64xf32>
    %4 = vector.shape_cast %3 : vector<1x4x64xf32> to vector<4x64xf32>
    %c0_3 = arith.constant 0 : index
    %c0_4 = arith.constant 0 : index
    %5 = vector.load %arg3[%c0_3, %c0_4] : memref<4x64xbf16, #tpu.memory_space<vmem>>, vector<4x64xbf16>
    %c0_5 = arith.constant 0 : index
    %c0_6 = arith.constant 0 : index
    %c0_7 = arith.constant 0 : index
    %6 = vector.load %arg4[%c0_5, %c0_6, %c0_7] : memref<1x64x64xbf16, #tpu.memory_space<vmem>>, vector<1x64x64xbf16>
    %7 = vector.shape_cast %6 : vector<1x64x64xbf16> to vector<64x64xbf16>
    %cst = arith.constant dense<0.000000e+00> : vector<4x64xf32>
    %8 = tpu.matmul %5, %7, %cst {dimension_numbers = #tpu.dot_dimension_numbers<[1], [0], [0], [1], [0, 0, 1, 1], [], []>} : vector<4x64xbf16>, vector<64x64xbf16>, vector<4x64xf32> -> vector<4x64xf32>
    %9 = arith.addf %4, %8 : vector<4x64xf32>
    %c0_8 = arith.constant 0 : index
    %c0_9 = arith.constant 0 : index
    %c0_10 = arith.constant 0 : index
    %10 = vector.load %arg5[%c0_8, %c0_9, %c0_10] : memref<1x4x64xf32, #tpu.memory_space<vmem>>, vector<1x4x64xf32>
    %11 = vector.shape_cast %10 : vector<1x4x64xf32> to vector<4x64xf32>
    %12 = vector.shape_cast %9 : vector<4x64xf32> to vector<1x4x64xf32>
    tpu.vector_store %arg5[%c0_8, %c0_9, %c0_10], %12 {strides = array<i32>} : memref<1x4x64xf32, #tpu.memory_space<vmem>>, vector<1x4x64xf32>,
    return
  }
  func.func @transform_0(%arg0: i32, %arg1: i32, %arg2: i32) -> (i32, i32) {
    %c0_i32 = arith.constant 0 : i32
    %c0_i32_0 = arith.constant 0 : i32
    return %c0_i32, %arg2 : i32, i32
  }
  func.func @transform_1(%arg0: i32, %arg1: i32, %arg2: i32) -> (i32, i32, i32) {
    %c0_i32 = arith.constant 0 : i32
    return %arg0, %arg2, %arg1 : i32, i32, i32
  }
  func.func @transform_2(%arg0: i32, %arg1: i32, %arg2: i32) -> (i32, i32, i32) {
    %c0_i32 = arith.constant 0 : i32
    %c0_i32_0 = arith.constant 0 : i32
    return %arg0, %c0_i32, %arg1 : i32, i32, i32
  }
}

module attributes {stable_mosaic.version = 11 : i64} {
  func.func @_conv_gemm_kernel(%arg0: i32, %arg1: i32, %arg2: i32, %arg3: memref<4x16xbf16, #tpu.memory_space<vmem>>, %arg4: memref<1x16x64xbf16, #tpu.memory_space<vmem>>, %arg5: memref<1x4x64xf32, #tpu.memory_space<vmem>>) attributes {dimension_semantics = [#tpu.dimension_semantics<parallel>, #tpu.dimension_semantics<parallel>, #tpu.dimension_semantics<arbitrary>], iteration_bounds = array<i64: 2, 1, 1>, scalar_prefetch = 0 : i64, scratch_operands = 0 : i64, tpu.core_type = #tpu.core_type<tc>, window_params = [{transform_indices = @transform_0, window_bounds = array<i64: 4, 16>}, {transform_indices = @transform_1, window_bounds = array<i64: 1, 16, 64>}, {transform_indices = @transform_2, window_bounds = array<i64: 1, 4, 64>}]} {
    %c0_i32 = arith.constant 0 : i32
    %0 = arith.cmpi eq, %arg2, %c0_i32 : i32
    %1 = arith.extui %0 : i1 to i32
    %c0_i32_0 = arith.constant 0 : i32
    %2 = arith.cmpi ne, %1, %c0_i32_0 : i32
    scf.if %2 {
      %cst_11 = arith.constant 0.000000e+00 : f32
      %13 = vector.broadcast %cst_11 : f32 to vector<1x4x64xf32>
      %c0_12 = arith.constant 0 : index
      %c0_13 = arith.constant 0 : index
      %c0_14 = arith.constant 0 : index
      %14 = vector.load %arg5[%c0_12, %c0_13, %c0_14] : memref<1x4x64xf32, #tpu.memory_space<vmem>>, vector<1x4x64xf32>
      tpu.vector_store %arg5[%c0_12, %c0_13, %c0_14], %13 {strides = array<i32>} : memref<1x4x64xf32, #tpu.memory_space<vmem>>, vector<1x4x64xf32>,
    } else {
    }
    %c0 = arith.constant 0 : index
    %c0_1 = arith.constant 0 : index
    %c0_2 = arith.constant 0 : index
    %3 = vector.load %arg5[%c0, %c0_1, %c0_2] : memref<1x4x64xf32, #tpu.memory_space<vmem>>, vector<1x4x64xf32>
    %4 = vector.shape_cast %3 : vector<1x4x64xf32> to vector<4x64xf32>
    %c0_3 = arith.constant 0 : index
    %c0_4 = arith.constant 0 : index
    %5 = vector.load %arg3[%c0_3, %c0_4] : memref<4x16xbf16, #tpu.memory_space<vmem>>, vector<4x16xbf16>
    %c0_5 = arith.constant 0 : index
    %c0_6 = arith.constant 0 : index
    %c0_7 = arith.constant 0 : index
    %6 = vector.load %arg4[%c0_5, %c0_6, %c0_7] : memref<1x16x64xbf16, #tpu.memory_space<vmem>>, vector<1x16x64xbf16>
    %7 = vector.shape_cast %6 : vector<1x16x64xbf16> to vector<16x64xbf16>
    %cst = arith.constant dense<0.000000e+00> : vector<4x64xf32>
    %8 = tpu.matmul %5, %7, %cst {dimension_numbers = #tpu.dot_dimension_numbers<[1], [0], [0], [1], [0, 0, 1, 1], [], []>} : vector<4x16xbf16>, vector<16x64xbf16>, vector<4x64xf32> -> vector<4x64xf32>
    %9 = arith.addf %4, %8 : vector<4x64xf32>
    %c0_8 = arith.constant 0 : index
    %c0_9 = arith.constant 0 : index
    %c0_10 = arith.constant 0 : index
    %10 = vector.load %arg5[%c0_8, %c0_9, %c0_10] : memref<1x4x64xf32, #tpu.memory_space<vmem>>, vector<1x4x64xf32>
    %11 = vector.shape_cast %10 : vector<1x4x64xf32> to vector<4x64xf32>
    %12 = vector.shape_cast %9 : vector<4x64xf32> to vector<1x4x64xf32>
    tpu.vector_store %arg5[%c0_8, %c0_9, %c0_10], %12 {strides = array<i32>} : memref<1x4x64xf32, #tpu.memory_space<vmem>>, vector<1x4x64xf32>,
    return
  }
  func.func @transform_0(%arg0: i32, %arg1: i32, %arg2: i32) -> (i32, i32) {
    %c0_i32 = arith.constant 0 : i32
    %c0_i32_0 = arith.constant 0 : i32
    return %c0_i32, %arg2 : i32, i32
  }
  func.func @transform_1(%arg0: i32, %arg1: i32, %arg2: i32) -> (i32, i32, i32) {
    %c0_i32 = arith.constant 0 : i32
    return %arg0, %arg2, %arg1 : i32, i32, i32
  }
  func.func @transform_2(%arg0: i32, %arg1: i32, %arg2: i32) -> (i32, i32, i32) {
    %c0_i32 = arith.constant 0 : i32
    %c0_i32_0 = arith.constant 0 : i32
    return %arg0, %c0_i32, %arg1 : i32, i32, i32
  }
}

module attributes {stable_mosaic.version = 11 : i64} {
  func.func @_conv_gemm_kernel(%arg0: i32, %arg1: i32, %arg2: i32, %arg3: memref<4x32xbf16, #tpu.memory_space<vmem>>, %arg4: memref<1x32x64xbf16, #tpu.memory_space<vmem>>, %arg5: memref<1x4x64xf32, #tpu.memory_space<vmem>>) attributes {dimension_semantics = [#tpu.dimension_semantics<parallel>, #tpu.dimension_semantics<parallel>, #tpu.dimension_semantics<arbitrary>], iteration_bounds = array<i64: 2, 1, 1>, scalar_prefetch = 0 : i64, scratch_operands = 0 : i64, tpu.core_type = #tpu.core_type<tc>, window_params = [{transform_indices = @transform_0, window_bounds = array<i64: 4, 32>}, {transform_indices = @transform_1, window_bounds = array<i64: 1, 32, 64>}, {transform_indices = @transform_2, window_bounds = array<i64: 1, 4, 64>}]} {
    %c0_i32 = arith.constant 0 : i32
    %0 = arith.cmpi eq, %arg2, %c0_i32 : i32
    %1 = arith.extui %0 : i1 to i32
    %c0_i32_0 = arith.constant 0 : i32
    %2 = arith.cmpi ne, %1, %c0_i32_0 : i32
    scf.if %2 {
      %cst_11 = arith.constant 0.000000e+00 : f32
      %13 = vector.broadcast %cst_11 : f32 to vector<1x4x64xf32>
      %c0_12 = arith.constant 0 : index
      %c0_13 = arith.constant 0 : index
      %c0_14 = arith.constant 0 : index
      %14 = vector.load %arg5[%c0_12, %c0_13, %c0_14] : memref<1x4x64xf32, #tpu.memory_space<vmem>>, vector<1x4x64xf32>
      tpu.vector_store %arg5[%c0_12, %c0_13, %c0_14], %13 {strides = array<i32>} : memref<1x4x64xf32, #tpu.memory_space<vmem>>, vector<1x4x64xf32>,
    } else {
    }
    %c0 = arith.constant 0 : index
    %c0_1 = arith.constant 0 : index
    %c0_2 = arith.constant 0 : index
    %3 = vector.load %arg5[%c0, %c0_1, %c0_2] : memref<1x4x64xf32, #tpu.memory_space<vmem>>, vector<1x4x64xf32>
    %4 = vector.shape_cast %3 : vector<1x4x64xf32> to vector<4x64xf32>
    %c0_3 = arith.constant 0 : index
    %c0_4 = arith.constant 0 : index
    %5 = vector.load %arg3[%c0_3, %c0_4] : memref<4x32xbf16, #tpu.memory_space<vmem>>, vector<4x32xbf16>
    %c0_5 = arith.constant 0 : index
    %c0_6 = arith.constant 0 : index
    %c0_7 = arith.constant 0 : index
    %6 = vector.load %arg4[%c0_5, %c0_6, %c0_7] : memref<1x32x64xbf16, #tpu.memory_space<vmem>>, vector<1x32x64xbf16>
    %7 = vector.shape_cast %6 : vector<1x32x64xbf16> to vector<32x64xbf16>
    %cst = arith.constant dense<0.000000e+00> : vector<4x64xf32>
    %8 = tpu.matmul %5, %7, %cst {dimension_numbers = #tpu.dot_dimension_numbers<[1], [0], [0], [1], [0, 0, 1, 1], [], []>} : vector<4x32xbf16>, vector<32x64xbf16>, vector<4x64xf32> -> vector<4x64xf32>
    %9 = arith.addf %4, %8 : vector<4x64xf32>
    %c0_8 = arith.constant 0 : index
    %c0_9 = arith.constant 0 : index
    %c0_10 = arith.constant 0 : index
    %10 = vector.load %arg5[%c0_8, %c0_9, %c0_10] : memref<1x4x64xf32, #tpu.memory_space<vmem>>, vector<1x4x64xf32>
    %11 = vector.shape_cast %10 : vector<1x4x64xf32> to vector<4x64xf32>
    %12 = vector.shape_cast %9 : vector<4x64xf32> to vector<1x4x64xf32>
    tpu.vector_store %arg5[%c0_8, %c0_9, %c0_10], %12 {strides = array<i32>} : memref<1x4x64xf32, #tpu.memory_space<vmem>>, vector<1x4x64xf32>,
    return
  }
  func.func @transform_0(%arg0: i32, %arg1: i32, %arg2: i32) -> (i32, i32) {
    %c0_i32 = arith.constant 0 : i32
    %c0_i32_0 = arith.constant 0 : i32
    return %c0_i32, %arg2 : i32, i32
  }
  func.func @transform_1(%arg0: i32, %arg1: i32, %arg2: i32) -> (i32, i32, i32) {
    %c0_i32 = arith.constant 0 : i32
    return %arg0, %arg2, %arg1 : i32, i32, i32
  }
  func.func @transform_2(%arg0: i32, %arg1: i32, %arg2: i32) -> (i32, i32, i32) {
    %c0_i32 = arith.constant 0 : i32
    %c0_i32_0 = arith.constant 0 : i32
    return %arg0, %c0_i32, %arg1 : i32, i32, i32
  }
}

module attributes {stable_mosaic.version = 11 : i64} {
  func.func @_bn_stats_kernel(%arg0: i32, %arg1: i32, %arg2: memref<1x4x128xf32, #tpu.memory_space<vmem>>, %arg3: memref<4x1xf32, #tpu.memory_space<vmem>>, %arg4: memref<4x1xf32, #tpu.memory_space<vmem>>) attributes {dimension_semantics = [#tpu.dimension_semantics<arbitrary>, #tpu.dimension_semantics<arbitrary>], iteration_bounds = array<i64: 2, 4>, scalar_prefetch = 0 : i64, scratch_operands = 0 : i64, tpu.core_type = #tpu.core_type<tc>, window_params = [{transform_indices = @transform_0, window_bounds = array<i64: 1, 4, 128>}, {pipeline_mode = #tpu.pipeline_mode<synchronous>, transform_indices = @transform_1, window_bounds = array<i64: 4, 1>}, {pipeline_mode = #tpu.pipeline_mode<synchronous>, transform_indices = @transform_2, window_bounds = array<i64: 4, 1>}]} {
    %c0_i32 = arith.constant 0 : i32
    %0 = arith.cmpi eq, %arg0, %c0_i32 : i32
    %c0_i32_0 = arith.constant 0 : i32
    %1 = arith.cmpi eq, %arg1, %c0_i32_0 : i32
    %2 = arith.andi %0, %1 : i1
    %3 = arith.extui %2 : i1 to i32
    %c0_i32_1 = arith.constant 0 : i32
    %4 = arith.cmpi ne, %3, %c0_i32_1 : i32
    scf.if %4 {
      %cst_13 = arith.constant 0.000000e+00 : f32
      %18 = vector.broadcast %cst_13 : f32 to vector<4x1xf32>
      %c0_14 = arith.constant 0 : index
      %c0_15 = arith.constant 0 : index
      %19 = vector.load %arg3[%c0_14, %c0_15] : memref<4x1xf32, #tpu.memory_space<vmem>>, vector<4x1xf32>
      tpu.vector_store %arg3[%c0_14, %c0_15], %18 {strides = array<i32>} : memref<4x1xf32, #tpu.memory_space<vmem>>, vector<4x1xf32>,
      %cst_16 = arith.constant 0.000000e+00 : f32
      %20 = vector.broadcast %cst_16 : f32 to vector<4x1xf32>
      %c0_17 = arith.constant 0 : index
      %c0_18 = arith.constant 0 : index
      %21 = vector.load %arg4[%c0_17, %c0_18] : memref<4x1xf32, #tpu.memory_space<vmem>>, vector<4x1xf32>
      tpu.vector_store %arg4[%c0_17, %c0_18], %20 {strides = array<i32>} : memref<4x1xf32, #tpu.memory_space<vmem>>, vector<4x1xf32>,
    } else {
    }
    %c0 = arith.constant 0 : index
    %c0_2 = arith.constant 0 : index
    %c0_3 = arith.constant 0 : index
    %5 = vector.load %arg2[%c0, %c0_2, %c0_3] : memref<1x4x128xf32, #tpu.memory_space<vmem>>, vector<1x4x128xf32>
    %6 = vector.shape_cast %5 : vector<1x4x128xf32> to vector<4x128xf32>
    %c0_4 = arith.constant 0 : index
    %c0_5 = arith.constant 0 : index
    %7 = vector.load %arg3[%c0_4, %c0_5] : memref<4x1xf32, #tpu.memory_space<vmem>>, vector<4x1xf32>
    %cst = arith.constant dense<0.000000e+00> : vector<4xf32>
    %8 = vector.multi_reduction <add>, %6, %cst [1] : vector<4x128xf32> to vector<4xf32>
    %9 = vector.shape_cast %8 : vector<4xf32> to vector<4x1xf32>
    %10 = arith.addf %7, %9 : vector<4x1xf32>
    %c0_6 = arith.constant 0 : index
    %c0_7 = arith.constant 0 : index
    %11 = vector.load %arg3[%c0_6, %c0_7] : memref<4x1xf32, #tpu.memory_space<vmem>>, vector<4x1xf32>
    tpu.vector_store %arg3[%c0_6, %c0_7], %10 {strides = array<i32>} : memref<4x1xf32, #tpu.memory_space<vmem>>, vector<4x1xf32>,
    %c0_8 = arith.constant 0 : index
    %c0_9 = arith.constant 0 : index
    %12 = vector.load %arg4[%c0_8, %c0_9] : memref<4x1xf32, #tpu.memory_space<vmem>>, vector<4x1xf32>
    %13 = arith.mulf %6, %6 : vector<4x128xf32>
    %cst_10 = arith.constant dense<0.000000e+00> : vector<4xf32>
    %14 = vector.multi_reduction <add>, %13, %cst_10 [1] : vector<4x128xf32> to vector<4xf32>
    %15 = vector.shape_cast %14 : vector<4xf32> to vector<4x1xf32>
    %16 = arith.addf %12, %15 : vector<4x1xf32>
    %c0_11 = arith.constant 0 : index
    %c0_12 = arith.constant 0 : index
    %17 = vector.load %arg4[%c0_11, %c0_12] : memref<4x1xf32, #tpu.memory_space<vmem>>, vector<4x1xf32>
    tpu.vector_store %arg4[%c0_11, %c0_12], %16 {strides = array<i32>} : memref<4x1xf32, #tpu.memory_space<vmem>>, vector<4x1xf32>,
    return
  }
  func.func @transform_0(%arg0: i32, %arg1: i32) -> (i32, i32, i32) {
    %c0_i32 = arith.constant 0 : i32
    %c0_i32_0 = arith.constant 0 : i32
    return %arg0, %c0_i32, %arg1 : i32, i32, i32
  }
  func.func @transform_1(%arg0: i32, %arg1: i32) -> (i32, i32) {
    %c0_i32 = arith.constant 0 : i32
    %c0_i32_0 = arith.constant 0 : i32
    %c0_i32_1 = arith.constant 0 : i32
    return %c0_i32, %c0_i32_0 : i32, i32
  }
  func.func @transform_2(%arg0: i32, %arg1: i32) -> (i32, i32) {
    %c0_i32 = arith.constant 0 : i32
    %c0_i32_0 = arith.constant 0 : i32
    %c0_i32_1 = arith.constant 0 : i32
    return %c0_i32, %c0_i32_0 : i32, i32
  }
}

module attributes {stable_mosaic.version = 11 : i64} {
  func.func @_bn_apply_kernel(%arg0: i32, %arg1: i32, %arg2: memref<1x4x128xf32, #tpu.memory_space<vmem>>, %arg3: memref<1x4x128xf32, #tpu.memory_space<vmem>>, %arg4: memref<4x1xf32, #tpu.memory_space<vmem>>, %arg5: memref<4x1xf32, #tpu.memory_space<vmem>>, %arg6: memref<1x4x128xf32, #tpu.memory_space<vmem>>) attributes {dimension_semantics = [#tpu.dimension_semantics<parallel>, #tpu.dimension_semantics<parallel>], iteration_bounds = array<i64: 2, 4>, scalar_prefetch = 0 : i64, scratch_operands = 0 : i64, tpu.core_type = #tpu.core_type<tc>, window_params = [{transform_indices = @transform_0, window_bounds = array<i64: 1, 4, 128>}, {transform_indices = @transform_1, window_bounds = array<i64: 1, 4, 128>}, {pipeline_mode = #tpu.pipeline_mode<synchronous>, transform_indices = @transform_2, window_bounds = array<i64: 4, 1>}, {pipeline_mode = #tpu.pipeline_mode<synchronous>, transform_indices = @transform_3, window_bounds = array<i64: 4, 1>}, {transform_indices = @transform_4, window_bounds = array<i64: 1, 4, 128>}]} {
    %c0 = arith.constant 0 : index
    %c0_0 = arith.constant 0 : index
    %c0_1 = arith.constant 0 : index
    %0 = vector.load %arg2[%c0, %c0_0, %c0_1] : memref<1x4x128xf32, #tpu.memory_space<vmem>>, vector<1x4x128xf32>
    %c0_2 = arith.constant 0 : index
    %c0_3 = arith.constant 0 : index
    %1 = vector.load %arg4[%c0_2, %c0_3] : memref<4x1xf32, #tpu.memory_space<vmem>>, vector<4x1xf32>
    %2 = vector.shape_cast %1 : vector<4x1xf32> to vector<1x4x1xf32>
    %3 = vector.broadcast %2 : vector<1x4x1xf32> to vector<1x4x128xf32>
    %4 = arith.mulf %0, %3 : vector<1x4x128xf32>
    %c0_4 = arith.constant 0 : index
    %c0_5 = arith.constant 0 : index
    %5 = vector.load %arg5[%c0_4, %c0_5] : memref<4x1xf32, #tpu.memory_space<vmem>>, vector<4x1xf32>
    %6 = vector.shape_cast %5 : vector<4x1xf32> to vector<1x4x1xf32>
    %7 = vector.broadcast %6 : vector<1x4x1xf32> to vector<1x4x128xf32>
    %8 = arith.addf %4, %7 : vector<1x4x128xf32>
    %c0_6 = arith.constant 0 : index
    %c0_7 = arith.constant 0 : index
    %c0_8 = arith.constant 0 : index
    %9 = vector.load %arg3[%c0_6, %c0_7, %c0_8] : memref<1x4x128xf32, #tpu.memory_space<vmem>>, vector<1x4x128xf32>
    %10 = arith.addf %8, %9 : vector<1x4x128xf32>
    %cst = arith.constant 0.000000e+00 : f32
    %11 = vector.broadcast %cst : f32 to vector<1x4x128xf32>
    %12 = arith.maximumf %10, %11 : vector<1x4x128xf32>
    %c0_9 = arith.constant 0 : index
    %c0_10 = arith.constant 0 : index
    %c0_11 = arith.constant 0 : index
    %13 = vector.load %arg6[%c0_9, %c0_10, %c0_11] : memref<1x4x128xf32, #tpu.memory_space<vmem>>, vector<1x4x128xf32>
    tpu.vector_store %arg6[%c0_9, %c0_10, %c0_11], %12 {strides = array<i32>} : memref<1x4x128xf32, #tpu.memory_space<vmem>>, vector<1x4x128xf32>,
    return
  }
  func.func @transform_0(%arg0: i32, %arg1: i32) -> (i32, i32, i32) {
    %c0_i32 = arith.constant 0 : i32
    %c0_i32_0 = arith.constant 0 : i32
    return %arg0, %c0_i32, %arg1 : i32, i32, i32
  }
  func.func @transform_1(%arg0: i32, %arg1: i32) -> (i32, i32, i32) {
    %c0_i32 = arith.constant 0 : i32
    %c0_i32_0 = arith.constant 0 : i32
    return %arg0, %c0_i32, %arg1 : i32, i32, i32
  }
  func.func @transform_2(%arg0: i32, %arg1: i32) -> (i32, i32) {
    %c0_i32 = arith.constant 0 : i32
    %c0_i32_0 = arith.constant 0 : i32
    %c0_i32_1 = arith.constant 0 : i32
    return %c0_i32, %c0_i32_0 : i32, i32
  }
  func.func @transform_3(%arg0: i32, %arg1: i32) -> (i32, i32) {
    %c0_i32 = arith.constant 0 : i32
    %c0_i32_0 = arith.constant 0 : i32
    %c0_i32_1 = arith.constant 0 : i32
    return %c0_i32, %c0_i32_0 : i32, i32
  }
  func.func @transform_4(%arg0: i32, %arg1: i32) -> (i32, i32, i32) {
    %c0_i32 = arith.constant 0 : i32
    %c0_i32_0 = arith.constant 0 : i32
    return %arg0, %c0_i32, %arg1 : i32, i32, i32
  }
}

</mosaic_0001>

<bundles_post_ra>
// kernel: hourglass_forward.52
= control target key start
LH: loop header
LB: loop body
LE: loop exit
PB: predicated region body
PF: predicated region fallthrough
CT: control target
= control target key end

     0   :  { %s503_s9 = smov 0   ;;  %s505_s10 = smov 0   ;;  %s557_s0 = inlined_call_operand.vmem [shape: bf16[4,4], index: 0, kind: input, shape index: {}]   ;;  %s558_s1 = inlined_call_operand.vmem [shape: bf16[2,4,512], index: 1, kind: input, shape index: {}]   ;;  %s559_s2 = inlined_call_operand.vmem [shape: f32[2,4,512], index: 2, kind: output, shape index: {}]  }
   0x1   :  { %s507_s11 = smov 0   ;;  %s509_s12 = smov 0  }
   0x2   :  { %s511_s13 = smov 0  }
   0x3 LB: > { %s27_s14 = sadd.s32 1, %s476_s11  ;;  %s31_s15 = sadd.s32 1, %s480_s12  ;;  %s484_s13 = sphi %s511_s13, %s12_s13   ;;  %s480_s12 = sphi %s509_s12, %s563_s12   ;;  %s476_s11 = sphi %s507_s11, %s562_s11   ;;  %s472_s10 = sphi %s505_s10, %s561_s10   ;;  %s468_s9 = sphi %s503_s9, %s560_s9  }
   0x4   : > { %p29_p0 = scmp.ge.s32.totalorder %s27_s14, 4  ;;  %p388_p1 = scmp.ge.s32.totalorder %s484_s13, 1 }
   0x5   : > { %p153_p2 = scmp.lt.s32.totalorder %s484_s13, 9 }
   0x6   : > { %s565_s14 = smov (%p29_p0, %s27_s14), 0  ;;  %s567_s15 = smov (!%p29_p0, %s31_s15), %s480_s12 }
   0x7   : > { %p154_p3 = pnand %p388_p1, %p153_p2  ;;  %p33_p4 = scmp.ge.s32.totalorder %s567_s15, 2 }
   0x8   : > { %p193_p5 = scmp.lt.s32.totalorder (!%p154_p3), %s472_s10, 1  ;;  %p197_p6 = scmp.lt.s32.totalorder (!%p154_p3), %s468_s9, 3  ;;  %v486_v0 = vmov (!%p154_p3), 0.0   ;;  %vm487_vm0 = vmmov (!%p154_p3), 0   ;;  %vm226_vm1 = vcmask (!%p154_p3), 1041408   ;;  %vm222_vm2 = vcmask (!%p154_p3), 31744  }
   0x9   : > { %s569_s15 = smov (%p33_p4, %s567_s15), 0  ;;  %157 = sbr.rel (%p154_p3) target bundleno = 241 (0xf1), region = 28 }
   0xa   : > { %398 = vmatprep.subr.bf16.mxu0 (!%p154_p3), %v486_v0  ;;  %400 = vmatprep.mubr.msk.bf16.mxu0 (!%p154_p3), %vm487_vm0, %v486_v0  ;;  %v220_v3 = vld [vmem:[%s557_s0] sm:$0x3] (!%p154_p3) }
  0x10   : > { %s571_s10 = smov (!%p193_p5, %s472_s10), 1  ;;  %s573_s9 = smov (!%p197_p6, %s468_s9), 3 }
  0x11   : > { %s389_s16 = sshll.u32 %s571_s10, 2 }
  0x12   : > { %s202_s17 = sadd.s32 %s389_s16, %s573_s9 }
  0x13   : > { %s390_s18 = sshll.u32 %s202_s17, 1  ;;  %s392_s19 = sshll.u32 %s202_s17, 2 }
  0x14   : > { %s204_s22 = scalar_lea.vmem %s558_s1, %s390_s18  ;;  %s212_s25 = scalar_lea.vmem %s559_s2, %s392_s19 }
  0x15   : > { %v221_v1 = vld [vmem:[%s204_s22] sm:$0x3]  ;;  %218 = vst [vmem:[%s212_s25] sm:$0xf] %v486_v0 }
  0x16   : > { %v228_v2 = vsel %vm226_vm1, %v221_v1, 0 }
  0x17   : > { %399 = vmatpush3.bf16.msra.mxu0 %v228_v2 }
  0x1a   : > { %401 = vmatmul.mubr.msk.bf16.vlgmr.msra.gmra.mrb[0].mxu0 %vm222_vm2, %v220_v3 }
  0x1c   : > { %v219_v4 = vld [vmem:[%s212_s25] sm:$0xf] }
  0xed   : > { %v264_v5 = vpop.f32.mrb[0].mxu0 }
  0xee   : > { %v270_v6 = vadd.f32 %v264_v5, %v219_v4  ;;  %v402_v7 = vpop.f32.mrb[1].mxu0 }
  0xef   : > { %v267_v8 = vpop.f32.mrb[2].mxu0 }
  0xf0   : > { %271 = vst [vmem:[%s212_s25] sm:$0xf] %v270_v6  ;;  %v403_v9 = vpop.f32.mrb[3].mxu0 }
  0xf1 PF: > { %s12_s13 = sadd.s32 1, %s484_s13   ;;  %s560_s9 = smov %s476_s11 }
  0xf2   : > { %p9_p7 = scmp.ge.s32.totalorder %s12_s13, 10   ;;  %s561_s10 = smov %s480_s12 }
  0xf3   : > { %s562_s11 = smov %s565_s14  ;;  %s563_s12 = smov %s569_s15 }
  0xf4   :  { %11 = sbr.rel (!%p9_p7) target bundleno = 3 (0x3), region = 65 }

// kernel: hourglass_forward.53
= control target key start
LH: loop header
LB: loop body
LE: loop exit
PB: predicated region body
PF: predicated region fallthrough
CT: control target
= control target key end

     0   :  { %s607_s12 = smov 0   ;;  %s609_s13 = smov 0   ;;  %s683_s0 = inlined_call_operand.vmem [shape: f32[2,2,2,512], index: 0, kind: input, shape index: {}]   ;;  %s684_s1 = inlined_call_operand.vmem [shape: f32[2,2,1], index: 1, kind: input, shape index: {}]   ;;  %s685_s2 = inlined_call_operand.vmem [shape: f32[2,2,1], index: 2, kind: input, shape index: {}]   ;;  %s686_s3 = inlined_call_operand.vmem [shape: f32[2,2,2,512], index: 3, kind: output, shape index: {}]  }
   0x1   :  { %s611_s14 = smov 0   ;;  %s613_s15 = smov 0  }
   0x2   :  { %s615_s16 = smov 0  }
   0x3 LB: > { %s22_s17 = sadd.s32 1, %s574_s14  ;;  %s25_s18 = sadd.s32 1, %s578_s15  ;;  %s582_s16 = sphi %s615_s16, %s13_s16   ;;  %s578_s15 = sphi %s613_s15, %s690_s15   ;;  %s574_s14 = sphi %s611_s14, %s689_s14   ;;  %s570_s13 = sphi %s609_s13, %s688_s13   ;;  %s566_s12 = sphi %s607_s12, %s687_s12  }
   0x4   : > { %p23_p0 = scmp.ge.s32.totalorder %s22_s17, 2  ;;  %p481_p1 = scmp.ge.s32.totalorder %s582_s16, 1 }
   0x5   : > { %p175_p2 = scmp.lt.s32.totalorder %s582_s16, 5 }
   0x6   : > { %s692_s17 = smov (%p23_p0, %s22_s17), 0  ;;  %s694_s18 = smov (!%p23_p0, %s25_s18), %s578_s15 }
   0x7   : > { %p176_p3 = pnand %p481_p1, %p175_p2  ;;  %p27_p4 = scmp.ge.s32.totalorder %s694_s18, 2 }
   0x8   : > { %p215_p5 = scmp.lt.s32.totalorder (!%p176_p3), %s570_s13, 1  ;;  %p217_p6 = scmp.lt.s32.totalorder (!%p176_p3), %s566_s12, 1  ;;  %v249_v0 = vlaneseq (!%p176_p3)  ;;  %v584_v1 = vmov (!%p176_p3), 1983009808   ;;  %vm266_vm0 = vcmask (!%p176_p3), 1041408   ;;  %v585_v19 = vmov (!%p176_p3), 0  }
   0x9   : > { %s696_s18 = smov (%p27_p4, %s694_s18), 0  ;;  %179 = sbr.rel (%p176_p3) target bundleno = 482 (0x1e2), region = 32 }
   0xa   : > { %v247_v2 = vunpack.c.l.s4 (!%p176_p3), %v584_v1  ;;  %v637_v3 = vshrl.u32 (!%p176_p3), %v249_v0, 7  ;;  %539 = vset.pattern.permute.xlu1 (!%p176_p3), %v585_v19  ;;  %540 = vset.pattern.permute.xlu0 (!%p176_p3), %v585_v19  ;;  %v586_v55 = vmov (!%p176_p3), 269488144  }
   0xb   : > { %v336_v56 = vunpack.c.l.s4 (!%p176_p3), %v586_v55 }
   0xc   : > { %v248_v4 = vunpack.c.0.s8 (!%p176_p3), %v247_v2 }
   0xd   : > { %v337_v57 = vunpack.c.0.s8 (!%p176_p3), %v336_v56 }
   0xe   : > { %v251_v5 = vsub.s32 (!%p176_p3), %v248_v4, %v637_v3 }
   0xf   : > { %v340_v59 = vsub.s32 (!%p176_p3), %v337_v57, %v637_v3 }
  0x10   : > { %s698_s13 = smov (!%p215_p5, %s570_s13), 1  ;;  %s700_s12 = smov (!%p217_p6, %s566_s12), 1 }
  0x11   : > { %s483_s19 = sshll.u32 %s698_s13, 3  ;;  %s482_s20 = sshll.u32 %s700_s12, 2 }
  0x12   : > { %s639_s21 = sadd.s32 %s483_s19, %s482_s20  ;;  %s485_s26 = sshll.u32 %s700_s12, 1 }
  0x13   : > { %s484_s22 = sshll.u32 %s639_s21, 1  ;;  %s227_s29 = scalar_lea.vmem %s684_s1, %s485_s26 }
  0x14   : > { %s223_s25 = scalar_lea.vmem %s683_s0, %s484_s22  ;;  %s231_s5 = scalar_lea.vmem %s685_s2, %s485_s26  ;;  %v242_v20 = vld [vmem:[%s227_s29] sm:$0x3] }
  0x15   : > { %v241_v6 = vld [vmem:[%s223_s25] sm:$0xff]  ;;  %333 = vperm.xlu1 %539, %v242_v20   ;;  %s240_s10 = scalar_lea.vmem %s686_s3, %s484_s22 }
  0x16   : > { %v245_v7 = vcombine.high %v241_v6, %v241_v6  ;;  %v252_v8 = vrot.slane %v241_v6, %v251_v5  ;;  %v243_v21 = vld [vmem:[%s231_s5] sm:$0x3] }
  0x18   : > { %v259_v9 = vrot.slane %v245_v7, %v251_v5  ;;  %v260_v10 = vcombine.high %v252_v8, %v252_v8  ;;  %v267_v11 = vsel %vm266_vm0, %v252_v8, 0.0 }
  0x19   : > { %346 = vperm.xlu1 %539, %v243_v21  }
  0x1a   : > { %v261_v12 = vcombine.high %v259_v9, %v259_v9  ;;  %v268_v13 = vsel %vm266_vm0, %v260_v10, 0.0  ;;  %v270_v14 = vsel %vm266_vm0, %v259_v9, 0.0 }
  0x1b   : > { %v269_v15 = vadd.f32 %v268_v13, %v267_v11 }
  0x1c   : > { %v272_v16 = vsel %vm266_vm0, %v261_v12, 0.0 }
  0x1d   : > { %v271_v17 = vadd.f32 %v270_v14, %v269_v15 }
  0x1f   : > { %v273_v18 = vadd.f32 %v272_v16, %v271_v17 }
  0x21   : > { %274 = vadd.xlane.f32.xlu0 %v273_v18 }
  0x94   : > { %v334_v58 = vpop.permute.xlu1 %333 }
  0x95   : > { %v341_v63 = vrot.slane %v334_v58, %v340_v59 }
  0x98   : > { %v347_v61 = vpop.permute.xlu1 %346 }
  0x99   : > { %v354_v1 = vrot.slane %v347_v61, %v340_v59 }
  0xae   : > { %v275_v22 = vpop.xlane.xlu0 %274 }
  0xaf   : > { %v276_v23 = vrot.slane %v275_v22, 4 }
  0xb1   : > { %v277_v24 = vadd.f32 %v276_v23, %v275_v22 }
  0xb3   : > { %v278_v25 = vrot.slane %v277_v24, 2 }
  0xb5   : > { %v279_v26 = vadd.f32 %v278_v25, %v277_v24 }
  0xb7   : > { %v280_v27 = vrot.slane %v279_v26, 1 }
  0xb9   : > { %v281_v28 = vadd.f32 %v280_v27, %v279_v26 }
  0xbb   : > { %492 = vpush %v281_v28 }
  0xec   : > { %s493_s6 = spop %492 }
  0xed   : > { %v283_v29 = vstv %s493_s6 }
  0xee   : > { %v285_v30 = vmul.f32 0.0009765625, %v283_v29 }
  0xf0   : > { %v286_v31 = vsub.f32 %v241_v6, %v285_v30 }
  0xf2   : > { %v287_v32 = vmul.f32 %v286_v31, %v286_v31 }
  0xf4   : > { %v289_v33 = vcombine.high %v287_v32, %v287_v32  ;;  %v296_v34 = vrot.slane %v287_v32, %v251_v5 }
  0xf6   : > { %v303_v35 = vrot.slane %v289_v33, %v251_v5  ;;  %v304_v36 = vcombine.high %v296_v34, %v296_v34  ;;  %v310_v38 = vsel %vm266_vm0, %v296_v34, 0.0 }
  0xf8   : > { %v305_v37 = vcombine.high %v303_v35, %v303_v35  ;;  %v311_v39 = vsel %vm266_vm0, %v304_v36, 0.0  ;;  %v313_v41 = vsel %vm266_vm0, %v303_v35, 0.0 }
  0xf9   : > { %v312_v40 = vadd.f32 %v311_v39, %v310_v38 }
  0xfa   : > { %v315_v43 = vsel %vm266_vm0, %v305_v37, 0.0 }
  0xfb   : > { %v314_v42 = vadd.f32 %v313_v41, %v312_v40 }
  0xfd   : > { %v316_v44 = vadd.f32 %v315_v43, %v314_v42 }
  0xff   : > { %317 = vadd.xlane.f32.xlu0 %v316_v44 }
 0x18c   : > { %v318_v45 = vpop.xlane.xlu0 %317 }
 0x18d   : > { %v319_v46 = vrot.slane %v318_v45, 4 }
 0x18f   : > { %v320_v47 = vadd.f32 %v319_v46, %v318_v45 }
 0x191   : > { %v321_v48 = vrot.slane %v320_v47, 2 }
 0x193   : > { %v322_v49 = vadd.f32 %v321_v48, %v320_v47 }
 0x195   : > { %v323_v50 = vrot.slane %v322_v49, 1 }
 0x197   : > { %v324_v51 = vadd.f32 %v323_v50, %v322_v49 }
 0x199   : > { %494 = vpush %v324_v51 }
 0x1ca   : > { %s495_s7 = spop %494 }
 0x1cb   : > { %v326_v52 = vstv %s495_s7 }
 0x1cc   : > { %v327_v53 = vmul.f32 0.0009765625, %v326_v52 }
 0x1ce   : > { %v328_v54 = vadd.f32 1e-05, %v327_v53 }
 0x1d0   : > { %542 = vrsqrt.f32 %v328_v54 }
 0x1da   : > { %v543_v60 = vpop.eup %542 }
 0x1db   : > { %v330_v62 = vmul.f32 %v543_v60, %v286_v31 }
 0x1dd   : > { %v343_v0 = vmul.f32 %v341_v63, %v330_v62 }
 0x1df   : > { %v356_v2 = vadd.f32 %v354_v1, %v343_v0 }
 0x1e1   : > { %357 = vst [vmem:[%s240_s10] sm:$0xff] %v356_v2 }
 0x1e2 PF: > { %s13_s16 = sadd.s32 1, %s582_s16   ;;  %s687_s12 = smov %s574_s14 }
 0x1e3   : > { %p10_p7 = scmp.ge.s32.totalorder %s13_s16, 6   ;;  %s688_s13 = smov %s578_s15 }
 0x1e4   : > { %s689_s14 = smov %s692_s17  ;;  %s690_s15 = smov %s696_s18 }
 0x1e5   :  { %12 = sbr.rel (!%p10_p7) target bundleno = 3 (0x3), region = 68 }

// kernel: hourglass_forward.33
= control target key start
LH: loop header
LB: loop body
LE: loop exit
PB: predicated region body
PF: predicated region fallthrough
CT: control target
= control target key end

     0   :  { %s517_s12 = smov 0   ;;  %s519_s13 = smov 0   ;;  %s584_s0 = inlined_call_operand.vmem [shape: f32[2,2,4,64], index: 0, kind: input, shape index: {}]   ;;  %s585_s1 = inlined_call_operand.vmem [shape: f32[2,4,1], index: 1, kind: input, shape index: {}]   ;;  %s586_s2 = inlined_call_operand.vmem [shape: f32[2,4,1], index: 2, kind: input, shape index: {}]   ;;  %s587_s3 = inlined_call_operand.vmem [shape: f32[2,2,4,64], index: 3, kind: output, shape index: {}]  }
   0x1   :  { %s521_s14 = smov 0   ;;  %s523_s15 = smov 0  }
   0x2   :  { %s525_s16 = smov 0  }
   0x3 LB: > { %s22_s17 = sadd.s32 1, %s486_s14  ;;  %s25_s18 = sadd.s32 1, %s490_s15  ;;  %s494_s16 = sphi %s525_s16, %s13_s16   ;;  %s490_s15 = sphi %s523_s15, %s591_s15   ;;  %s486_s14 = sphi %s521_s14, %s590_s14   ;;  %s482_s13 = sphi %s519_s13, %s589_s13   ;;  %s478_s12 = sphi %s517_s12, %s588_s12  }
   0x4   : > { %p23_p0 = scmp.ge.s32.totalorder %s22_s17, 2  ;;  %p398_p1 = scmp.ge.s32.totalorder %s494_s16, 1 }
   0x5   : > { %p174_p2 = scmp.lt.s32.totalorder %s494_s16, 5 }
   0x6   : > { %s593_s17 = smov (%p23_p0, %s22_s17), 0  ;;  %s595_s18 = smov (!%p23_p0, %s25_s18), %s490_s15 }
   0x7   : > { %p175_p3 = pnand %p398_p1, %p174_p2  ;;  %p27_p4 = scmp.ge.s32.totalorder %s595_s18, 2 }
   0x8   : > { %p212_p5 = scmp.lt.s32.totalorder (!%p175_p3), %s482_s13, 1  ;;  %p214_p6 = scmp.lt.s32.totalorder (!%p175_p3), %s478_s12, 1  ;;  %vm239_vm0 = vcmask (!%p175_p3), 519168   ;;  %v496_v2 = vmov (!%p175_p3), 0  }
   0x9   : > { %s597_s18 = smov (%p27_p4, %s595_s18), 0  ;;  %178 = sbr.rel (%p175_p3) target bundleno = 464 (0x1d0), region = 32 }
   0xa   : > { %452 = vset.pattern.permute.xlu1 (!%p175_p3), %v496_v2  ;;  %453 = vset.pattern.permute.xlu0 (!%p175_p3), %v496_v2 }
  0x10   : > { %s599_s13 = smov (!%p212_p5, %s482_s13), 1  ;;  %s601_s12 = smov (!%p214_p6, %s478_s12), 1 }
  0x11   : > { %s399_s19 = sshll.u32 %s599_s13, 1  ;;  %s401_s25 = sshll.u32 %s601_s12, 2 }
  0x12   : > { %s547_s20 = sadd.s32 %s399_s19, %s601_s12  ;;  %s223_s28 = scalar_lea.vmem %s585_s1, %s401_s25 }
  0x13   : > { %s400_s21 = sshll.u32 %s547_s20, 2  ;;  %s227_s4 = scalar_lea.vmem %s586_s2, %s401_s25  ;;  %v237_v3 = vld [vmem:[%s223_s28] sm:$0xf] }
  0x14   : > { %s219_s24 = scalar_lea.vmem %s584_s0, %s400_s21  ;;  %272 = vperm.xlu1 %452, %v237_v3   ;;  %v238_v4 = vld [vmem:[%s227_s4] sm:$0xf]  ;;  %s235_s9 = scalar_lea.vmem %s587_s3, %s400_s21 }
  0x15   : > { %v236_v0 = vld [vmem:[%s219_s24] sm:$0xf] }
  0x16   : > { %v240_v1 = vsel %vm239_vm0, %v236_v0, 0.0 }
  0x17   : > { %241 = vadd.xlane.f32.xlu0 %v240_v1 }
  0x18   : > { %278 = vperm.xlu1 %452, %v238_v4  }
  0x93   : > { %v273_v27 = vpop.permute.xlu1 %272 }
  0x97   : > { %v279_v31 = vpop.permute.xlu1 %278 }
  0xa4   : > { %v242_v5 = vpop.xlane.xlu0 %241 }
  0xa5   : > { %v243_v6 = vrot.slane %v242_v5, 4 }
  0xa7   : > { %v244_v7 = vadd.f32 %v243_v6, %v242_v5 }
  0xa9   : > { %v245_v8 = vrot.slane %v244_v7, 2 }
  0xab   : > { %v246_v9 = vadd.f32 %v245_v8, %v244_v7 }
  0xad   : > { %v247_v10 = vrot.slane %v246_v9, 1 }
  0xaf   : > { %v248_v11 = vadd.f32 %v247_v10, %v246_v9 }
  0xb1   : > { %407 = vpush %v248_v11 }
  0xe2   : > { %s408_s5 = spop %407 }
  0xe3   : > { %v250_v12 = vstv %s408_s5 }
  0xe4   : > { %v252_v13 = vmul.f32 0.00390625, %v250_v12 }
  0xe6   : > { %v253_v14 = vsub.f32 %v236_v0, %v252_v13 }
  0xe8   : > { %v254_v15 = vmul.f32 %v253_v14, %v253_v14 }
  0xea   : > { %v255_v16 = vsel %vm239_vm0, %v254_v15, 0.0 }
  0xeb   : > { %256 = vadd.xlane.f32.xlu0 %v255_v16 }
 0x178   : > { %v257_v17 = vpop.xlane.xlu0 %256 }
 0x179   : > { %v258_v18 = vrot.slane %v257_v17, 4 }
 0x17b   : > { %v259_v19 = vadd.f32 %v258_v18, %v257_v17 }
 0x17d   : > { %v260_v20 = vrot.slane %v259_v19, 2 }
 0x17f   : > { %v261_v21 = vadd.f32 %v260_v20, %v259_v19 }
 0x181   : > { %v262_v22 = vrot.slane %v261_v21, 1 }
 0x183   : > { %v263_v23 = vadd.f32 %v262_v22, %v261_v21 }
 0x185   : > { %409 = vpush %v263_v23 }
 0x1b6   : > { %s410_s6 = spop %409 }
 0x1b7   : > { %v265_v24 = vstv %s410_s6 }
 0x1b8   : > { %v266_v25 = vmul.f32 0.00390625, %v265_v24 }
 0x1ba   : > { %v267_v26 = vadd.f32 1e-05, %v266_v25 }
 0x1bc   : > { %454 = vrsqrt.f32 %v267_v26 }
 0x1c6   : > { %v455_v28 = vpop.eup %454 }
 0x1c7   : > { %v269_v29 = vmul.f32 %v455_v28, %v253_v14 }
 0x1c9   : > { %v275_v30 = vmul.f32 %v273_v27, %v269_v29 }
 0x1cb   : > { %v281_v32 = vadd.f32 %v279_v31, %v275_v30 }
 0x1cd   : > { %v282_v33 = vmax.f32 %v281_v32, 0.0 }
 0x1cf   : > { %283 = vst.msk [vmem:[%s235_s9] sm:$0xf] %vm239_vm0, %v282_v33 }
 0x1d0 PF: > { %s13_s16 = sadd.s32 1, %s494_s16   ;;  %s588_s12 = smov %s486_s14 }
 0x1d1   : > { %p10_p7 = scmp.ge.s32.totalorder %s13_s16, 6   ;;  %s589_s13 = smov %s490_s15 }
 0x1d2   : > { %s590_s14 = smov %s593_s17  ;;  %s591_s15 = smov %s597_s18 }
 0x1d3   :  { %12 = sbr.rel (!%p10_p7) target bundleno = 3 (0x3), region = 68 }

// kernel: hourglass_forward.32
= control target key start
LH: loop header
LB: loop body
LE: loop exit
PB: predicated region body
PF: predicated region fallthrough
CT: control target
= control target key end

     0   :  { %s546_s9 = smov 0   ;;  %s548_s10 = smov 0   ;;  %s589_s0 = inlined_call_operand.vmem [shape: bf16[8,108], index: 0, kind: input, shape index: {}]   ;;  %s590_s1 = inlined_call_operand.vmem [shape: bf16[2,108,64], index: 1, kind: input, shape index: {}]   ;;  %s591_s2 = inlined_call_operand.vmem [shape: f32[2,8,64], index: 2, kind: output, shape index: {}]  }
   0x1   :  { %s550_s11 = smov 0  }
   0x2 LB: > { %s31_s12 = sadd.s32 1, %s523_s10  ;;  %p432_p0 = scmp.ge.s32.totalorder %s527_s11, 1  ;;  %s527_s11 = sphi %s550_s11, %s12_s11   ;;  %s523_s10 = sphi %s548_s10, %s593_s10   ;;  %s519_s9 = sphi %s546_s9, %s592_s9  }
   0x3   : > { %p33_p1 = scmp.ge.s32.totalorder %s31_s12, 2  ;;  %p154_p2 = scmp.lt.s32.totalorder %s527_s11, 3 }
   0x5   : > { %s595_s12 = smov (%p33_p1, %s31_s12), 0  ;;  %p155_p3 = pnand %p432_p0, %p154_p2 }
   0x6   : > { %p194_p4 = scmp.lt.s32.totalorder (!%p155_p3), %s519_s9, 1  ;;  %v529_v0 = vmov (!%p155_p3), 0.0   ;;  %vm530_vm0 = vmmov (!%p155_p3), 0   ;;  %vm218_vm1 = vcmask (!%p155_p3), 523264   ;;  %vm281_vm2 = vcmask (!%p155_p3), 1045504  }
   0x7   : > { %158 = sbr.rel (%p155_p3) target bundleno = 261 (0x105), region = 28  ;;  %453 = vmatprep.subr.bf16.mxu0 (!%p155_p3), %v529_v0  ;;  %467 = vmatprep.mubr.msk.bf16.mxu0 (!%p155_p3), %vm530_vm0, %v529_v0  ;;  %v221_v9 = vld [vmem:[%s589_s0] sm:$0xf] (!%p155_p3)  ;;  %vm277_vm3 = vcmask (!%p155_p3), 883712  }
   0xe   : > { %s597_s9 = smov (!%p194_p4, %s519_s9), 1 }
   0xf   : > { %s471_s13 = smul.u32 56, %s597_s9  ;;  %s434_s14 = sshll.u32 %s597_s9, 3 }
  0x10   : > { %s567_s17 = scalar_lea.vmem %s591_s2, %s434_s14 }
  0x11   : > { %s204_s20 = scalar_lea.vmem %s590_s1, %s471_s13  ;;  %219 = vst.msk [vmem:[%s567_s17] sm:$0xff] %vm218_vm1, %v529_v0 }
  0x12   : > { %v498_v1 = vld [vmem:[%s204_s20] sm:$0xff]   ;;  %v499_v2 = vld [vmem:[%s204_s20 + $0x8] sm:$0xff]   ;;  %v500_v3 = vld [vmem:[%s204_s20 + $0x10] sm:$0xff]  }
  0x13   : > { %454 = vmatpush3.bf16.msra.mxu0 %v498_v1  ;;  %v501_v4 = vld [vmem:[%s204_s20 + $0x18] sm:$0xff]   ;;  %v502_v5 = vld [vmem:[%s204_s20 + $0x20] sm:$0xff]   ;;  %v503_v6 = vld [vmem:[%s204_s20 + $0x28] sm:$0xff]  }
  0x14   : > { %455 = vmatprep.subr.bf16.mxu0 %v529_v0  ;;  %v504_v7 = vld [vmem:[%s204_s20 + $0x30] sm:$0x3f]  }
  0x15   : > { %v283_v8 = vsel %vm281_vm2, %v504_v7, 0 }
  0x17   : > { %456 = vmatpush3.bf16.msra.mxu0 %v499_v2 }
  0x18   : > { %457 = vmatprep.subr.bf16.mxu0 %v529_v0  ;;  %v220_v10 = vld [vmem:[%s567_s17] sm:$0xff] }
  0x1b   : > { %458 = vmatpush3.bf16.msra.mxu0 %v500_v3 }
  0x1c   : > { %459 = vmatprep.subr.bf16.mxu0 %v529_v0 }
  0x1f   : > { %460 = vmatpush3.bf16.msra.mxu0 %v501_v4 }
  0x20   : > { %461 = vmatprep.subr.bf16.mxu0 %v529_v0 }
  0x23   : > { %462 = vmatpush3.bf16.msra.mxu0 %v502_v5 }
  0x24   : > { %463 = vmatprep.subr.bf16.mxu0 %v529_v0 }
  0x27   : > { %464 = vmatpush3.bf16.msra.mxu0 %v503_v6 }
  0x28   : > { %465 = vmatprep.subr.bf16.mxu0 %v529_v0 }
  0x2b   : > { %466 = vmatpush3.bf16.msra.mxu0 %v283_v8 }
  0x2e   : > { %468 = vmatmul.mubr.msk.bf16.vlgmr.msra.gmra.mrb[0].mxu0 %vm277_vm3, %v221_v9 }
 0x101   : > { %v319_v11 = vpop.f32.mrb[0].mxu0 }
 0x102   : > { %v325_v12 = vadd.f32 %v319_v11, %v220_v10  ;;  %v469_v13 = vpop.f32.mrb[1].mxu0 }
 0x103   : > { %v322_v14 = vpop.f32.mrb[2].mxu0 }
 0x104   : > { %327 = vst.msk [vmem:[%s567_s17] sm:$0xff] %vm218_vm1, %v325_v12  ;;  %v470_v15 = vpop.f32.mrb[3].mxu0 }
 0x105 PF: > { %s12_s11 = sadd.s32 1, %s527_s11   ;;  %s592_s9 = smov %s523_s10 }
 0x106   : > { %p9_p5 = scmp.ge.s32.totalorder %s12_s11, 4   ;;  %s593_s10 = smov %s595_s12 }
 0x108   :  { %11 = sbr.rel (!%p9_p5) target bundleno = 2 (0x2), region = 65 }

// kernel: hourglass_forward.40
= control target key start
LH: loop header
LB: loop body
LE: loop exit
PB: predicated region body
PF: predicated region fallthrough
CT: control target
= control target key end

     0   :  { %s448_s9 = smov 0   ;;  %s450_s10 = smov 0   ;;  %s486_s0 = inlined_call_operand.vmem [shape: bf16[8,8], index: 0, kind: input, shape index: {}]   ;;  %s487_s1 = inlined_call_operand.vmem [shape: bf16[2,8,64], index: 1, kind: input, shape index: {}]   ;;  %s488_s2 = inlined_call_operand.vmem [shape: f32[2,8,64], index: 2, kind: output, shape index: {}]  }
   0x1   :  { %s452_s11 = smov 0  }
   0x2 LB: > { %s31_s12 = sadd.s32 1, %s425_s10  ;;  %p367_p0 = scmp.ge.s32.totalorder %s429_s11, 1  ;;  %s429_s11 = sphi %s452_s11, %s12_s11   ;;  %s425_s10 = sphi %s450_s10, %s490_s10   ;;  %s421_s9 = sphi %s448_s9, %s489_s9  }
   0x3   : > { %p33_p1 = scmp.ge.s32.totalorder %s31_s12, 2  ;;  %p151_p2 = scmp.lt.s32.totalorder %s429_s11, 3 }
   0x5   : > { %s492_s12 = smov (%p33_p1, %s31_s12), 0  ;;  %p152_p3 = pnand %p367_p0, %p151_p2 }
   0x6   : > { %p188_p4 = scmp.lt.s32.totalorder (!%p152_p3), %s421_s9, 1  ;;  %v431_v0 = vmov (!%p152_p3), 0.0   ;;  %vm432_vm0 = vmmov (!%p152_p3), 0   ;;  %vm210_vm1 = vcmask (!%p152_p3), 523264   ;;  %vm219_vm2 = vcmask (!%p152_p3), 1043456  }
   0x7   : > { %155 = sbr.rel (%p152_p3) target bundleno = 237 (0xed), region = 28  ;;  %375 = vmatprep.subr.bf16.mxu0 (!%p152_p3), %v431_v0  ;;  %377 = vmatprep.mubr.msk.bf16.mxu0 (!%p152_p3), %vm432_vm0, %v431_v0  ;;  %v213_v3 = vld [vmem:[%s486_s0] sm:$0xf] (!%p152_p3)  ;;  %vm215_vm3 = vcmask (!%p152_p3), 64512  }
   0xe   : > { %s494_s9 = smov (!%p188_p4, %s421_s9), 1 }
   0xf   : > { %s368_s13 = sshll.u32 %s494_s9, 2  ;;  %s369_s14 = sshll.u32 %s494_s9, 3 }
  0x10   : > { %s197_s17 = scalar_lea.vmem %s487_s1, %s368_s13  ;;  %s204_s20 = scalar_lea.vmem %s488_s2, %s369_s14 }
  0x11   : > { %v214_v1 = vld [vmem:[%s197_s17] sm:$0xf]  ;;  %211 = vst.msk [vmem:[%s204_s20] sm:$0xff] %vm210_vm1, %v431_v0 }
  0x12   : > { %v221_v2 = vsel %vm219_vm2, %v214_v1, 0 }
  0x13   : > { %376 = vmatpush3.bf16.msra.mxu0 %v221_v2 }
  0x16   : > { %378 = vmatmul.mubr.msk.bf16.vlgmr.msra.gmra.mrb[0].mxu0 %vm215_vm3, %v213_v3 }
  0x18   : > { %v212_v4 = vld [vmem:[%s204_s20] sm:$0xff] }
  0xe9   : > { %v257_v5 = vpop.f32.mrb[0].mxu0 }
  0xea   : > { %v263_v6 = vadd.f32 %v257_v5, %v212_v4  ;;  %v379_v7 = vpop.f32.mrb[1].mxu0 }
  0xeb   : > { %v260_v8 = vpop.f32.mrb[2].mxu0 }
  0xec   : > { %265 = vst.msk [vmem:[%s204_s20] sm:$0xff] %vm210_vm1, %v263_v6  ;;  %v380_v9 = vpop.f32.mrb[3].mxu0 }
  0xed PF: > { %s12_s11 = sadd.s32 1, %s429_s11   ;;  %s489_s9 = smov %s425_s10 }
  0xee   : > { %p9_p5 = scmp.ge.s32.totalorder %s12_s11, 4   ;;  %s490_s10 = smov %s492_s12 }
  0xf0   :  { %11 = sbr.rel (!%p9_p5) target bundleno = 2 (0x2), region = 65 }

// kernel: hourglass_forward.34
= control target key start
LH: loop header
LB: loop body
LE: loop exit
PB: predicated region body
PF: predicated region fallthrough
CT: control target
= control target key end

     0   :  { %s602_s9 = smov 0   ;;  %s604_s10 = smov 0   ;;  %s661_s0 = inlined_call_operand.vmem [shape: bf16[8,216], index: 0, kind: input, shape index: {}]   ;;  %s662_s1 = inlined_call_operand.vmem [shape: bf16[2,216,64], index: 1, kind: input, shape index: {}]   ;;  %s663_s2 = inlined_call_operand.vmem [shape: f32[2,8,64], index: 2, kind: output, shape index: {}]  }
   0x1   :  { %s606_s11 = smov 0  }
   0x2 LB: > { %s31_s12 = sadd.s32 1, %s579_s10  ;;  %p496_p0 = scmp.ge.s32.totalorder %s583_s11, 1  ;;  %s583_s11 = sphi %s606_s11, %s12_s11   ;;  %s579_s10 = sphi %s604_s10, %s665_s10   ;;  %s575_s9 = sphi %s602_s9, %s664_s9  }
   0x3   : > { %p33_p1 = scmp.ge.s32.totalorder %s31_s12, 2  ;;  %p156_p2 = scmp.lt.s32.totalorder %s583_s11, 3 }
   0x5   : > { %s667_s12 = smov (%p33_p1, %s31_s12), 0  ;;  %p157_p3 = pnand %p496_p0, %p156_p2 }
   0x6   : > { %p199_p4 = scmp.lt.s32.totalorder (!%p157_p3), %s575_s9, 1  ;;  %v226_v0 = vld [vmem:[%s661_s0] sm:$0xff] (!%p157_p3)  ;;  %vm341_vm0 = vcmask (!%p157_p3), 719872   ;;  %v585_v1 = vmov (!%p157_p3), 0   ;;  %vm223_vm1 = vcmask (!%p157_p3), 523264   ;;  %v586_v3 = vmov (!%p157_p3), 0.0  }
   0x7   : > { %160 = sbr.rel (%p157_p3) target bundleno = 289 (0x121), region = 28  ;;  %349 = vmatprep.subr.bf16.mxu0 (!%p157_p3), %v585_v1  ;;  %v500_v2 = vcombine.high (!%p157_p3), %v226_v0, %v226_v0  ;;  %vm345_vm2 = vcmask (!%p157_p3), 1043456   ;;  %v499_v19 = vcombine.low (!%p157_p3), %v226_v0, %v226_v0 }
   0x9   : > { %515 = vmatprep.mubr.msk.bf16.mxu0 (!%p157_p3), %vm341_vm0, %v500_v2 }
   0xe   : > { %s669_s9 = smov (!%p199_p4, %s575_s9), 1 }
   0xf   : > { %s518_s15 = smul.u32 108, %s669_s9  ;;  %s498_s16 = sshll.u32 %s669_s9, 3 }
  0x10   : > { %s626_s19 = scalar_lea.vmem %s663_s2, %s498_s16 }
  0x11   : > { %s631_s22 = scalar_lea.vmem %s662_s1, %s518_s15  ;;  %224 = vst.msk [vmem:[%s626_s19] sm:$0xff] %vm223_vm1, %v586_v3 }
  0x12   : > { %v545_v4 = vld [vmem:[%s631_s22] sm:$0xff]   ;;  %v546_v5 = vld [vmem:[%s631_s22 + $0x8] sm:$0xff]   ;;  %v547_v6 = vld [vmem:[%s631_s22 + $0x10] sm:$0xff]  }
  0x13   : > { %350 = vmatpush1.bf16.msra.mxu0 %v545_v4  ;;  %v548_v7 = vld [vmem:[%s631_s22 + $0x18] sm:$0xff]   ;;  %v549_v8 = vld [vmem:[%s631_s22 + $0x20] sm:$0xff]   ;;  %v550_v9 = vld [vmem:[%s631_s22 + $0x28] sm:$0xff]  }
  0x14   : > { %351 = vmatprep.subr.bf16.mxu0 %v585_v1  ;;  %v551_v10 = vld [vmem:[%s631_s22 + $0x30] sm:$0xff]   ;;  %v552_v11 = vld [vmem:[%s631_s22 + $0x38] sm:$0xff]   ;;  %v553_v12 = vld [vmem:[%s631_s22 + $0x40] sm:$0xff]  }
  0x15   : > { %v554_v13 = vld [vmem:[%s631_s22 + $0x48] sm:$0xff]   ;;  %v555_v14 = vld [vmem:[%s631_s22 + $0x50] sm:$0xff]   ;;  %v556_v15 = vld [vmem:[%s631_s22 + $0x58] sm:$0xff]  }
  0x16   : > { %v557_v16 = vld [vmem:[%s631_s22 + $0x60] sm:$0xff]   ;;  %v558_v17 = vld [vmem:[%s631_s22 + $0x68] ss:$0 sps:$4 sm:$0xff]  }
  0x17   : > { %352 = vmatpush1.bf16.msra.mxu0 %v546_v5  ;;  %v347_v18 = vsel %vm345_vm2, %v558_v17, 0 }
  0x18   : > { %353 = vmatprep.subr.bf16.mxu0 %v585_v1  ;;  %v225_v20 = vld [vmem:[%s626_s19] sm:$0xff] }
  0x1b   : > { %354 = vmatpush1.bf16.msra.mxu0 %v547_v6 }
  0x1c   : > { %355 = vmatprep.subr.bf16.mxu0 %v585_v1 }
  0x1f   : > { %356 = vmatpush1.bf16.msra.mxu0 %v548_v7 }
  0x20   : > { %357 = vmatprep.subr.bf16.mxu0 %v585_v1 }
  0x23   : > { %358 = vmatpush1.bf16.msra.mxu0 %v549_v8 }
  0x24   : > { %359 = vmatprep.subr.bf16.mxu0 %v585_v1 }
  0x27   : > { %360 = vmatpush1.bf16.msra.mxu0 %v550_v9 }
  0x28   : > { %361 = vmatprep.subr.bf16.mxu0 %v585_v1 }
  0x2b   : > { %362 = vmatpush1.bf16.msra.mxu0 %v551_v10 }
  0x2c   : > { %363 = vmatprep.subr.bf16.mxu0 %v585_v1 }
  0x2f   : > { %364 = vmatpush1.bf16.msra.mxu0 %v552_v11 }
  0x30   : > { %365 = vmatprep.subr.bf16.mxu0 %v585_v1 }
  0x33   : > { %366 = vmatpush1.bf16.msra.mxu0 %v553_v12 }
  0x34   : > { %367 = vmatprep.subr.bf16.mxu0 %v585_v1 }
  0x37   : > { %368 = vmatpush1.bf16.msra.mxu0 %v554_v13 }
  0x38   : > { %369 = vmatprep.subr.bf16.mxu0 %v585_v1 }
  0x3b   : > { %370 = vmatpush1.bf16.msra.mxu0 %v555_v14 }
  0x3c   : > { %371 = vmatprep.subr.bf16.mxu0 %v585_v1 }
  0x3f   : > { %372 = vmatpush1.bf16.msra.mxu0 %v556_v15 }
  0x40   : > { %373 = vmatprep.subr.bf16.mxu0 %v585_v1 }
  0x43   : > { %374 = vmatpush1.bf16.msra.mxu0 %v557_v16 }
  0x44   : > { %375 = vmatprep.subr.bf16.mxu0 %v585_v1 }
  0x47   : > { %376 = vmatpush1.bf16.msra.mxu0 %v347_v18 }
  0x4a   : > { %382 = vmatmul.mubr.bf16.vlgmr.msra.gmra.mrb[0].mxu0 %v499_v19 }
 0x11d   : > { %v383_v21 = vpop.f32.mrb[0].mxu0 }
 0x11e   : > { %v389_v22 = vadd.f32 %v383_v21, %v225_v20  ;;  %v385_v23 = vpop.f32.mrb[1].mxu0 }
 0x11f   : > { %v386_v24 = vpop.f32.mrb[2].mxu0 }
 0x120   : > { %391 = vst.msk [vmem:[%s626_s19] sm:$0xff] %vm223_vm1, %v389_v22  ;;  %v387_v25 = vpop.f32.mrb[3].mxu0 }
 0x121 PF: > { %s12_s11 = sadd.s32 1, %s583_s11   ;;  %s664_s9 = smov %s579_s10 }
 0x122   : > { %p9_p5 = scmp.ge.s32.totalorder %s12_s11, 4   ;;  %s665_s10 = smov %s667_s12 }
 0x124   :  { %11 = sbr.rel (!%p9_p5) target bundleno = 2 (0x2), region = 65 }

// kernel: hourglass_forward.41
= control target key start
LH: loop header
LB: loop body
LE: loop exit
PB: predicated region body
PF: predicated region fallthrough
CT: control target
= control target key end

     0   :  { %s516_s12 = smov 0   ;;  %s518_s13 = smov 0   ;;  %s583_s0 = inlined_call_operand.vmem [shape: f32[2,2,4,64], index: 0, kind: input, shape index: {}]   ;;  %s584_s1 = inlined_call_operand.vmem [shape: f32[2,4,1], index: 1, kind: input, shape index: {}]   ;;  %s585_s2 = inlined_call_operand.vmem [shape: f32[2,4,1], index: 2, kind: input, shape index: {}]   ;;  %s586_s3 = inlined_call_operand.vmem [shape: f32[2,2,4,64], index: 3, kind: output, shape index: {}]  }
   0x1   :  { %s520_s14 = smov 0   ;;  %s522_s15 = smov 0  }
   0x2   :  { %s524_s16 = smov 0  }
   0x3 LB: > { %s22_s17 = sadd.s32 1, %s485_s14  ;;  %s25_s18 = sadd.s32 1, %s489_s15  ;;  %s493_s16 = sphi %s524_s16, %s13_s16   ;;  %s489_s15 = sphi %s522_s15, %s590_s15   ;;  %s485_s14 = sphi %s520_s14, %s589_s14   ;;  %s481_s13 = sphi %s518_s13, %s588_s13   ;;  %s477_s12 = sphi %s516_s12, %s587_s12  }
   0x4   : > { %p23_p0 = scmp.ge.s32.totalorder %s22_s17, 2  ;;  %p397_p1 = scmp.ge.s32.totalorder %s493_s16, 1 }
   0x5   : > { %p174_p2 = scmp.lt.s32.totalorder %s493_s16, 5 }
   0x6   : > { %s592_s17 = smov (%p23_p0, %s22_s17), 0  ;;  %s594_s18 = smov (!%p23_p0, %s25_s18), %s489_s15 }
   0x7   : > { %p175_p3 = pnand %p397_p1, %p174_p2  ;;  %p27_p4 = scmp.ge.s32.totalorder %s594_s18, 2 }
   0x8   : > { %p212_p5 = scmp.lt.s32.totalorder (!%p175_p3), %s481_s13, 1  ;;  %p214_p6 = scmp.lt.s32.totalorder (!%p175_p3), %s477_s12, 1  ;;  %vm239_vm0 = vcmask (!%p175_p3), 519168   ;;  %v495_v2 = vmov (!%p175_p3), 0  }
   0x9   : > { %s596_s18 = smov (%p27_p4, %s594_s18), 0  ;;  %178 = sbr.rel (%p175_p3) target bundleno = 462 (0x1ce), region = 32 }
   0xa   : > { %451 = vset.pattern.permute.xlu1 (!%p175_p3), %v495_v2  ;;  %452 = vset.pattern.permute.xlu0 (!%p175_p3), %v495_v2 }
  0x10   : > { %s598_s13 = smov (!%p212_p5, %s481_s13), 1  ;;  %s600_s12 = smov (!%p214_p6, %s477_s12), 1 }
  0x11   : > { %s398_s19 = sshll.u32 %s598_s13, 1  ;;  %s400_s25 = sshll.u32 %s600_s12, 2 }
  0x12   : > { %s546_s20 = sadd.s32 %s398_s19, %s600_s12  ;;  %s223_s28 = scalar_lea.vmem %s584_s1, %s400_s25 }
  0x13   : > { %s399_s21 = sshll.u32 %s546_s20, 2  ;;  %s227_s4 = scalar_lea.vmem %s585_s2, %s400_s25  ;;  %v237_v3 = vld [vmem:[%s223_s28] sm:$0xf] }
  0x14   : > { %s219_s24 = scalar_lea.vmem %s583_s0, %s399_s21  ;;  %272 = vperm.xlu1 %451, %v237_v3   ;;  %v238_v4 = vld [vmem:[%s227_s4] sm:$0xf]  ;;  %s235_s9 = scalar_lea.vmem %s586_s3, %s399_s21 }
  0x15   : > { %v236_v0 = vld [vmem:[%s219_s24] sm:$0xf] }
  0x16   : > { %v240_v1 = vsel %vm239_vm0, %v236_v0, 0.0 }
  0x17   : > { %241 = vadd.xlane.f32.xlu0 %v240_v1 }
  0x18   : > { %278 = vperm.xlu1 %451, %v238_v4  }
  0x93   : > { %v273_v27 = vpop.permute.xlu1 %272 }
  0x97   : > { %v279_v31 = vpop.permute.xlu1 %278 }
  0xa4   : > { %v242_v5 = vpop.xlane.xlu0 %241 }
  0xa5   : > { %v243_v6 = vrot.slane %v242_v5, 4 }
  0xa7   : > { %v244_v7 = vadd.f32 %v243_v6, %v242_v5 }
  0xa9   : > { %v245_v8 = vrot.slane %v244_v7, 2 }
  0xab   : > { %v246_v9 = vadd.f32 %v245_v8, %v244_v7 }
  0xad   : > { %v247_v10 = vrot.slane %v246_v9, 1 }
  0xaf   : > { %v248_v11 = vadd.f32 %v247_v10, %v246_v9 }
  0xb1   : > { %406 = vpush %v248_v11 }
  0xe2   : > { %s407_s5 = spop %406 }
  0xe3   : > { %v250_v12 = vstv %s407_s5 }
  0xe4   : > { %v252_v13 = vmul.f32 0.00390625, %v250_v12 }
  0xe6   : > { %v253_v14 = vsub.f32 %v236_v0, %v252_v13 }
  0xe8   : > { %v254_v15 = vmul.f32 %v253_v14, %v253_v14 }
  0xea   : > { %v255_v16 = vsel %vm239_vm0, %v254_v15, 0.0 }
  0xeb   : > { %256 = vadd.xlane.f32.xlu0 %v255_v16 }
 0x178   : > { %v257_v17 = vpop.xlane.xlu0 %256 }
 0x179   : > { %v258_v18 = vrot.slane %v257_v17, 4 }
 0x17b   : > { %v259_v19 = vadd.f32 %v258_v18, %v257_v17 }
 0x17d   : > { %v260_v20 = vrot.slane %v259_v19, 2 }
 0x17f   : > { %v261_v21 = vadd.f32 %v260_v20, %v259_v19 }
 0x181   : > { %v262_v22 = vrot.slane %v261_v21, 1 }
 0x183   : > { %v263_v23 = vadd.f32 %v262_v22, %v261_v21 }
 0x185   : > { %408 = vpush %v263_v23 }
 0x1b6   : > { %s409_s6 = spop %408 }
 0x1b7   : > { %v265_v24 = vstv %s409_s6 }
 0x1b8   : > { %v266_v25 = vmul.f32 0.00390625, %v265_v24 }
 0x1ba   : > { %v267_v26 = vadd.f32 1e-05, %v266_v25 }
 0x1bc   : > { %453 = vrsqrt.f32 %v267_v26 }
 0x1c6   : > { %v454_v28 = vpop.eup %453 }
 0x1c7   : > { %v269_v29 = vmul.f32 %v454_v28, %v253_v14 }
 0x1c9   : > { %v275_v30 = vmul.f32 %v273_v27, %v269_v29 }
 0x1cb   : > { %v281_v32 = vadd.f32 %v279_v31, %v275_v30 }
 0x1cd   : > { %282 = vst.msk [vmem:[%s235_s9] sm:$0xf] %vm239_vm0, %v281_v32 }
 0x1ce PF: > { %s13_s16 = sadd.s32 1, %s493_s16   ;;  %s587_s12 = smov %s485_s14 }
 0x1cf   : > { %p10_p7 = scmp.ge.s32.totalorder %s13_s16, 6   ;;  %s588_s13 = smov %s489_s15 }
 0x1d0   : > { %s589_s14 = smov %s592_s17  ;;  %s590_s15 = smov %s596_s18 }
 0x1d1   :  { %12 = sbr.rel (!%p10_p7) target bundleno = 3 (0x3), region = 68 }

// kernel: hourglass_forward.37
= control target key start
LH: loop header
LB: loop body
LE: loop exit
PB: predicated region body
PF: predicated region fallthrough
CT: control target
= control target key end

     0   :  { %s517_s12 = smov 0   ;;  %s519_s13 = smov 0   ;;  %s584_s0 = inlined_call_operand.vmem [shape: f32[2,2,8,8], index: 0, kind: input, shape index: {}]   ;;  %s585_s1 = inlined_call_operand.vmem [shape: f32[2,8,1], index: 1, kind: input, shape index: {}]   ;;  %s586_s2 = inlined_call_operand.vmem [shape: f32[2,8,1], index: 2, kind: input, shape index: {}]   ;;  %s587_s3 = inlined_call_operand.vmem [shape: f32[2,2,8,8], index: 3, kind: output, shape index: {}]  }
   0x1   :  { %s521_s14 = smov 0   ;;  %s523_s15 = smov 0  }
   0x2   :  { %s525_s16 = smov 0  }
   0x3 LB: > { %s22_s17 = sadd.s32 1, %s486_s14  ;;  %s25_s18 = sadd.s32 1, %s490_s15  ;;  %s494_s16 = sphi %s525_s16, %s13_s16   ;;  %s490_s15 = sphi %s523_s15, %s591_s15   ;;  %s486_s14 = sphi %s521_s14, %s590_s14   ;;  %s482_s13 = sphi %s519_s13, %s589_s13   ;;  %s478_s12 = sphi %s517_s12, %s588_s12  }
   0x4   : > { %p23_p0 = scmp.ge.s32.totalorder %s22_s17, 2  ;;  %p398_p1 = scmp.ge.s32.totalorder %s494_s16, 1 }
   0x5   : > { %p174_p2 = scmp.lt.s32.totalorder %s494_s16, 5 }
   0x6   : > { %s593_s17 = smov (%p23_p0, %s22_s17), 0  ;;  %s595_s18 = smov (!%p23_p0, %s25_s18), %s490_s15 }
   0x7   : > { %p175_p3 = pnand %p398_p1, %p174_p2  ;;  %p27_p4 = scmp.ge.s32.totalorder %s595_s18, 2 }
   0x8   : > { %p212_p5 = scmp.lt.s32.totalorder (!%p175_p3), %s482_s13, 1  ;;  %p214_p6 = scmp.lt.s32.totalorder (!%p175_p3), %s478_s12, 1  ;;  %vm239_vm0 = vcmask (!%p175_p3), 64512   ;;  %v496_v2 = vmov (!%p175_p3), 0  }
   0x9   : > { %s597_s18 = smov (%p27_p4, %s595_s18), 0  ;;  %178 = sbr.rel (%p175_p3) target bundleno = 464 (0x1d0), region = 32 }
   0xa   : > { %452 = vset.pattern.permute.xlu1 (!%p175_p3), %v496_v2  ;;  %453 = vset.pattern.permute.xlu0 (!%p175_p3), %v496_v2 }
  0x10   : > { %s599_s13 = smov (!%p212_p5, %s482_s13), 1  ;;  %s601_s12 = smov (!%p214_p6, %s478_s12), 1 }
  0x11   : > { %s399_s19 = sshll.u32 %s599_s13, 1  ;;  %s401_s25 = sshll.u32 %s601_s12, 3 }
  0x12   : > { %s547_s20 = sadd.s32 %s399_s19, %s601_s12  ;;  %s223_s28 = scalar_lea.vmem %s585_s1, %s401_s25 }
  0x13   : > { %s400_s21 = sshll.u32 %s547_s20, 3  ;;  %s227_s4 = scalar_lea.vmem %s586_s2, %s401_s25  ;;  %v237_v3 = vld [vmem:[%s223_s28] sm:$0xff] }
  0x14   : > { %s219_s24 = scalar_lea.vmem %s584_s0, %s400_s21  ;;  %272 = vperm.xlu1 %452, %v237_v3   ;;  %v238_v4 = vld [vmem:[%s227_s4] sm:$0xff]  ;;  %s235_s9 = scalar_lea.vmem %s587_s3, %s400_s21 }
  0x15   : > { %v236_v0 = vld [vmem:[%s219_s24] sm:$0xff] }
  0x16   : > { %v240_v1 = vsel %vm239_vm0, %v236_v0, 0.0 }
  0x17   : > { %241 = vadd.xlane.f32.xlu0 %v240_v1 }
  0x18   : > { %278 = vperm.xlu1 %452, %v238_v4  }
  0x93   : > { %v273_v27 = vpop.permute.xlu1 %272 }
  0x97   : > { %v279_v31 = vpop.permute.xlu1 %278 }
  0xa4   : > { %v242_v5 = vpop.xlane.xlu0 %241 }
  0xa5   : > { %v243_v6 = vrot.slane %v242_v5, 4 }
  0xa7   : > { %v244_v7 = vadd.f32 %v243_v6, %v242_v5 }
  0xa9   : > { %v245_v8 = vrot.slane %v244_v7, 2 }
  0xab   : > { %v246_v9 = vadd.f32 %v245_v8, %v244_v7 }
  0xad   : > { %v247_v10 = vrot.slane %v246_v9, 1 }
  0xaf   : > { %v248_v11 = vadd.f32 %v247_v10, %v246_v9 }
  0xb1   : > { %407 = vpush %v248_v11 }
  0xe2   : > { %s408_s5 = spop %407 }
  0xe3   : > { %v250_v12 = vstv %s408_s5 }
  0xe4   : > { %v252_v13 = vmul.f32 0.015625, %v250_v12 }
  0xe6   : > { %v253_v14 = vsub.f32 %v236_v0, %v252_v13 }
  0xe8   : > { %v254_v15 = vmul.f32 %v253_v14, %v253_v14 }
  0xea   : > { %v255_v16 = vsel %vm239_vm0, %v254_v15, 0.0 }
  0xeb   : > { %256 = vadd.xlane.f32.xlu0 %v255_v16 }
 0x178   : > { %v257_v17 = vpop.xlane.xlu0 %256 }
 0x179   : > { %v258_v18 = vrot.slane %v257_v17, 4 }
 0x17b   : > { %v259_v19 = vadd.f32 %v258_v18, %v257_v17 }
 0x17d   : > { %v260_v20 = vrot.slane %v259_v19, 2 }
 0x17f   : > { %v261_v21 = vadd.f32 %v260_v20, %v259_v19 }
 0x181   : > { %v262_v22 = vrot.slane %v261_v21, 1 }
 0x183   : > { %v263_v23 = vadd.f32 %v262_v22, %v261_v21 }
 0x185   : > { %409 = vpush %v263_v23 }
 0x1b6   : > { %s410_s6 = spop %409 }
 0x1b7   : > { %v265_v24 = vstv %s410_s6 }
 0x1b8   : > { %v266_v25 = vmul.f32 0.015625, %v265_v24 }
 0x1ba   : > { %v267_v26 = vadd.f32 1e-05, %v266_v25 }
 0x1bc   : > { %454 = vrsqrt.f32 %v267_v26 }
 0x1c6   : > { %v455_v28 = vpop.eup %454 }
 0x1c7   : > { %v269_v29 = vmul.f32 %v455_v28, %v253_v14 }
 0x1c9   : > { %v275_v30 = vmul.f32 %v273_v27, %v269_v29 }
 0x1cb   : > { %v281_v32 = vadd.f32 %v279_v31, %v275_v30 }
 0x1cd   : > { %v282_v33 = vmax.f32 %v281_v32, 0.0 }
 0x1cf   : > { %283 = vst.msk [vmem:[%s235_s9] sm:$0xff] %vm239_vm0, %v282_v33 }
 0x1d0 PF: > { %s13_s16 = sadd.s32 1, %s494_s16   ;;  %s588_s12 = smov %s486_s14 }
 0x1d1   : > { %p10_p7 = scmp.ge.s32.totalorder %s13_s16, 6   ;;  %s589_s13 = smov %s490_s15 }
 0x1d2   : > { %s590_s14 = smov %s593_s17  ;;  %s591_s15 = smov %s597_s18 }
 0x1d3   :  { %12 = sbr.rel (!%p10_p7) target bundleno = 3 (0x3), region = 68 }

// kernel: hourglass_forward.36
= control target key start
LH: loop header
LB: loop body
LE: loop exit
PB: predicated region body
PF: predicated region fallthrough
CT: control target
= control target key end

     0   :  { %s622_s9 = smov 0   ;;  %s624_s10 = smov 0   ;;  %s689_s0 = inlined_call_operand.vmem [shape: bf16[16,216], index: 0, kind: input, shape index: {}]   ;;  %s690_s1 = inlined_call_operand.vmem [shape: bf16[2,216,8], index: 1, kind: input, shape index: {}]   ;;  %s691_s2 = inlined_call_operand.vmem [shape: f32[2,16,8], index: 2, kind: output, shape index: {}]  }
   0x1   :  { %s626_s11 = smov 0  }
   0x2 LB: > { %s31_s12 = sadd.s32 1, %s599_s10  ;;  %p513_p0 = scmp.ge.s32.totalorder %s603_s11, 1  ;;  %s603_s11 = sphi %s626_s11, %s12_s11   ;;  %s599_s10 = sphi %s624_s10, %s693_s10   ;;  %s595_s9 = sphi %s622_s9, %s692_s9  }
   0x3   : > { %p33_p1 = scmp.ge.s32.totalorder %s31_s12, 2  ;;  %p156_p2 = scmp.lt.s32.totalorder %s603_s11, 3 }
   0x5   : > { %s695_s12 = smov (%p33_p1, %s31_s12), 0  ;;  %p157_p3 = pnand %p513_p0, %p156_p2 }
   0x6   : > { %p200_p4 = scmp.lt.s32.totalorder (!%p157_p3), %s595_s9, 1  ;;  %vm349_vm0 = vcmask (!%p157_p3), 719872   ;;  %v605_v0 = vmov (!%p157_p3), 0   ;;  %v580_v1 = vld [vmem:[%s689_s0 + $0x4] ss:$8 sps:$4 sm:$0xff] (!%p157_p3)   ;;  %vm225_vm1 = vcmask (!%p157_p3), 64512  }
   0x7   : > { %160 = sbr.rel (%p157_p3) target bundleno = 291 (0x123), region = 28  ;;  %357 = vmatprep.subr.bf16.mxu0 (!%p157_p3), %v605_v0  ;;  %533 = vmatprep.mubr.msk.bf16.mxu0 (!%p157_p3), %vm349_vm0, %v580_v1  ;;  %v606_v2 = vmov (!%p157_p3), 0.0   ;;  %vm353_vm2 = vcmask (!%p157_p3), 1043456   ;;  %v578_v18 = vld [vmem:[%s689_s0] ss:$8 sps:$4 sm:$0xff] (!%p157_p3)  }
   0xe   : > { %s697_s9 = smov (!%p200_p4, %s595_s9), 1 }
   0xf   : > { %s537_s15 = smul.u32 108, %s697_s9  ;;  %s536_s16 = sshll.u32 %s697_s9, 4 }
  0x10   : > { %s646_s19 = scalar_lea.vmem %s691_s2, %s536_s16 }
  0x11   : > { %s651_s22 = scalar_lea.vmem %s690_s1, %s537_s15  ;;  %226 = vst.msk [vmem:[%s646_s19] sm:$0xff] %vm225_vm1, %v606_v2  ;;  %227 = vst.msk [vmem:[%s646_s19 + $0x8] sm:$0xff] %vm225_vm1, %v606_v2 }
  0x12   : > { %v564_v3 = vld [vmem:[%s651_s22] sm:$0xff]   ;;  %v565_v4 = vld [vmem:[%s651_s22 + $0x8] sm:$0xff]   ;;  %v566_v5 = vld [vmem:[%s651_s22 + $0x10] sm:$0xff]  }
  0x13   : > { %358 = vmatpush1.bf16.msra.mxu0 %v564_v3  ;;  %v567_v6 = vld [vmem:[%s651_s22 + $0x18] sm:$0xff]   ;;  %v568_v7 = vld [vmem:[%s651_s22 + $0x20] sm:$0xff]   ;;  %v569_v8 = vld [vmem:[%s651_s22 + $0x28] sm:$0xff]  }
  0x14   : > { %359 = vmatprep.subr.bf16.mxu0 %v605_v0  ;;  %v570_v9 = vld [vmem:[%s651_s22 + $0x30] sm:$0xff]   ;;  %v571_v10 = vld [vmem:[%s651_s22 + $0x38] sm:$0xff]   ;;  %v572_v11 = vld [vmem:[%s651_s22 + $0x40] sm:$0xff]  }
  0x15   : > { %v573_v12 = vld [vmem:[%s651_s22 + $0x48] sm:$0xff]   ;;  %v574_v13 = vld [vmem:[%s651_s22 + $0x50] sm:$0xff]   ;;  %v575_v14 = vld [vmem:[%s651_s22 + $0x58] sm:$0xff]  }
  0x16   : > { %v576_v15 = vld [vmem:[%s651_s22 + $0x60] sm:$0xff]   ;;  %v577_v16 = vld [vmem:[%s651_s22 + $0x68] ss:$0 sps:$4 sm:$0xff]  }
  0x17   : > { %360 = vmatpush1.bf16.msra.mxu0 %v565_v4  ;;  %v355_v17 = vsel %vm353_vm2, %v577_v16, 0 }
  0x18   : > { %361 = vmatprep.subr.bf16.mxu0 %v605_v0  ;;  %v228_v19 = vld [vmem:[%s646_s19] sm:$0xff]  ;;  %v229_v21 = vld [vmem:[%s646_s19 + $0x8] sm:$0xff] }
  0x1b   : > { %362 = vmatpush1.bf16.msra.mxu0 %v566_v5 }
  0x1c   : > { %363 = vmatprep.subr.bf16.mxu0 %v605_v0 }
  0x1f   : > { %364 = vmatpush1.bf16.msra.mxu0 %v567_v6 }
  0x20   : > { %365 = vmatprep.subr.bf16.mxu0 %v605_v0 }
  0x23   : > { %366 = vmatpush1.bf16.msra.mxu0 %v568_v7 }
  0x24   : > { %367 = vmatprep.subr.bf16.mxu0 %v605_v0 }
  0x27   : > { %368 = vmatpush1.bf16.msra.mxu0 %v569_v8 }
  0x28   : > { %369 = vmatprep.subr.bf16.mxu0 %v605_v0 }
  0x2b   : > { %370 = vmatpush1.bf16.msra.mxu0 %v570_v9 }
  0x2c   : > { %371 = vmatprep.subr.bf16.mxu0 %v605_v0 }
  0x2f   : > { %372 = vmatpush1.bf16.msra.mxu0 %v571_v10 }
  0x30   : > { %373 = vmatprep.subr.bf16.mxu0 %v605_v0 }
  0x33   : > { %374 = vmatpush1.bf16.msra.mxu0 %v572_v11 }
  0x34   : > { %375 = vmatprep.subr.bf16.mxu0 %v605_v0 }
  0x37   : > { %376 = vmatpush1.bf16.msra.mxu0 %v573_v12 }
  0x38   : > { %377 = vmatprep.subr.bf16.mxu0 %v605_v0 }
  0x3b   : > { %378 = vmatpush1.bf16.msra.mxu0 %v574_v13 }
  0x3c   : > { %379 = vmatprep.subr.bf16.mxu0 %v605_v0 }
  0x3f   : > { %380 = vmatpush1.bf16.msra.mxu0 %v575_v14 }
  0x40   : > { %381 = vmatprep.subr.bf16.mxu0 %v605_v0 }
  0x43   : > { %382 = vmatpush1.bf16.msra.mxu0 %v576_v15 }
  0x44   : > { %383 = vmatprep.subr.bf16.mxu0 %v605_v0 }
  0x47   : > { %384 = vmatpush1.bf16.msra.mxu0 %v355_v17 }
  0x4a   : > { %390 = vmatmul.mubr.bf16.vlgmr.msra.gmra.mrb[0].mxu0 %v578_v18 }
 0x11d   : > { %v391_v20 = vpop.f32.mrb[0].mxu0 }
 0x11e   : > { %v398_v22 = vadd.f32 %v391_v20, %v228_v19  ;;  %v393_v23 = vpop.f32.mrb[1].mxu0 }
 0x11f   : > { %v394_v24 = vpop.f32.mrb[2].mxu0 }
 0x120   : > { %401 = vst.msk [vmem:[%s646_s19] sm:$0xff] %vm225_vm1, %v398_v22  ;;  %v399_v25 = vadd.f32 %v394_v24, %v229_v21  ;;  %v396_v26 = vpop.f32.mrb[3].mxu0 }
 0x122   : > { %402 = vst.msk [vmem:[%s646_s19 + $0x8] sm:$0xff] %vm225_vm1, %v399_v25 }
 0x123 PF: > { %s12_s11 = sadd.s32 1, %s603_s11   ;;  %s692_s9 = smov %s599_s10 }
 0x124   : > { %p9_p5 = scmp.ge.s32.totalorder %s12_s11, 4   ;;  %s693_s10 = smov %s695_s12 }
 0x126   :  { %11 = sbr.rel (!%p9_p5) target bundleno = 2 (0x2), region = 65 }

// kernel: hourglass_forward.42
= control target key start
LH: loop header
LB: loop body
LE: loop exit
PB: predicated region body
PF: predicated region fallthrough
CT: control target
= control target key end

     0   :  { %s466_s9 = smov 0   ;;  %s468_s10 = smov 0   ;;  %s502_s0 = inlined_call_operand.vmem [shape: bf16[8,16], index: 0, kind: input, shape index: {}]   ;;  %s503_s1 = inlined_call_operand.vmem [shape: bf16[2,16,8], index: 1, kind: input, shape index: {}]   ;;  %s504_s2 = inlined_call_operand.vmem [shape: f32[2,8,8], index: 2, kind: output, shape index: {}]  }
   0x1   :  { %s470_s11 = smov 0  }
   0x2 LB: > { %s31_s12 = sadd.s32 1, %s443_s10  ;;  %p381_p0 = scmp.ge.s32.totalorder %s447_s11, 1  ;;  %s447_s11 = sphi %s470_s11, %s12_s11   ;;  %s443_s10 = sphi %s468_s10, %s506_s10   ;;  %s439_s9 = sphi %s466_s9, %s505_s9  }
   0x3   : > { %p33_p1 = scmp.ge.s32.totalorder %s31_s12, 2  ;;  %p154_p2 = scmp.lt.s32.totalorder %s447_s11, 3 }
   0x5   : > { %s508_s12 = smov (%p33_p1, %s31_s12), 0  ;;  %p155_p3 = pnand %p381_p0, %p154_p2 }
   0x6   : > { %p194_p4 = scmp.lt.s32.totalorder (!%p155_p3), %s439_s9, 1  ;;  %v449_v0 = vmov (!%p155_p3), 0.0   ;;  %vm450_vm0 = vmmov (!%p155_p3), 0   ;;  %vm218_vm1 = vcmask (!%p155_p3), 64512   ;;  %v221_v2 = vld [vmem:[%s502_s0] sm:$0xf] (!%p155_p3) }
   0x7   : > { %158 = sbr.rel (%p155_p3) target bundleno = 236 (0xec), region = 28  ;;  %392 = vmatprep.subr.bf16.mxu0 (!%p155_p3), %v449_v0  ;;  %394 = vmatprep.mubr.msk.bf16.mxu0 (!%p155_p3), %vm450_vm0, %v449_v0  ;;  %vm230_vm2 = vcmask (!%p155_p3), 130048  }
   0xe   : > { %s510_s9 = smov (!%p194_p4, %s439_s9), 1 }
   0xf   : > { %s389_s13 = sshll.u32 %s510_s9, 3 }
  0x10   : > { %s204_s16 = scalar_lea.vmem %s503_s1, %s389_s13  ;;  %s212_s19 = scalar_lea.vmem %s504_s2, %s389_s13 }
  0x11   : > { %v424_v1 = vld [vmem:[%s204_s16] sm:$0xff]   ;;  %219 = vst.msk [vmem:[%s212_s19] sm:$0xff] %vm218_vm1, %v449_v0 }
  0x12   : > { %393 = vmatpush3.bf16.msra.mxu0 %v424_v1 }
  0x15   : > { %395 = vmatmul.mubr.msk.bf16.vlgmr.msra.gmra.mrb[0].mxu0 %vm230_vm2, %v221_v2 }
  0x18   : > { %v220_v3 = vld [vmem:[%s212_s19] sm:$0xff] }
  0xe8   : > { %v268_v4 = vpop.f32.mrb[0].mxu0 }
  0xe9   : > { %v274_v5 = vadd.f32 %v268_v4, %v220_v3  ;;  %v396_v6 = vpop.f32.mrb[1].mxu0 }
  0xea   : > { %v271_v7 = vpop.f32.mrb[2].mxu0 }
  0xeb   : > { %276 = vst.msk [vmem:[%s212_s19] sm:$0xff] %vm218_vm1, %v274_v5  ;;  %v397_v8 = vpop.f32.mrb[3].mxu0 }
  0xec PF: > { %s12_s11 = sadd.s32 1, %s447_s11   ;;  %s505_s9 = smov %s443_s10 }
  0xed   : > { %p9_p5 = scmp.ge.s32.totalorder %s12_s11, 4   ;;  %s506_s10 = smov %s508_s12 }
  0xef   :  { %11 = sbr.rel (!%p9_p5) target bundleno = 2 (0x2), region = 65 }

// kernel: hourglass_forward.38
= control target key start
LH: loop header
LB: loop body
LE: loop exit
PB: predicated region body
PF: predicated region fallthrough
CT: control target
= control target key end

     0   :  { %s832_s9 = smov 0   ;;  %s834_s10 = smov 0   ;;  %s925_s0 = inlined_call_operand.vmem [shape: bf16[16,432], index: 0, kind: input, shape index: {}]   ;;  %s926_s1 = inlined_call_operand.vmem [shape: bf16[2,432,8], index: 1, kind: input, shape index: {}]   ;;  %s927_s2 = inlined_call_operand.vmem [shape: f32[2,16,8], index: 2, kind: output, shape index: {}]  }
   0x1   :  { %s836_s11 = smov 0  }
   0x2 LB: > { %s31_s12 = sadd.s32 1, %s809_s10  ;;  %p670_p0 = scmp.ge.s32.totalorder %s813_s11, 1  ;;  %s813_s11 = sphi %s836_s11, %s12_s11   ;;  %s809_s10 = sphi %s834_s10, %s929_s10   ;;  %s805_s9 = sphi %s832_s9, %s928_s9  }
   0x3   : > { %p33_p1 = scmp.ge.s32.totalorder %s31_s12, 2  ;;  %p156_p2 = scmp.lt.s32.totalorder %s813_s11, 3 }
   0x5   : > { %s931_s12 = smov (%p33_p1, %s31_s12), 0  ;;  %p157_p3 = pnand %p670_p0, %p156_p2 }
   0x6   : > { %p200_p4 = scmp.lt.s32.totalorder (!%p157_p3), %s805_s9, 1  ;;  %v815_v0 = vmov (!%p157_p3), 0   ;;  %v785_v1 = vld [vmem:[%s925_s0 + $0x4] ss:$16 sps:$4 sm:$0xff] (!%p157_p3)   ;;  %vm469_vm0 = vcmask (!%p157_p3), 392192   ;;  %vm225_vm1 = vcmask (!%p157_p3), 64512  }
   0x7   : > { %160 = sbr.rel (%p157_p3) target bundleno = 281 (0x119), region = 28  ;;  %514 = vmatprep.subr.bf16.mxu1 (!%p157_p3), %v815_v0  ;;  %v790_v2 = vld [vmem:[%s925_s0 + $0xc] ss:$16 sps:$4 sm:$0xff] (!%p157_p3)   ;;  %505 = vmatprep.mubr.bf16.mxu0 (!%p157_p3), %v785_v1  ;;  %v783_v28 = vld [vmem:[%s925_s0] ss:$16 sps:$4 sm:$0xff] (!%p157_p3)   ;;  %v816_v32 = vmov (!%p157_p3), 0.0  }
   0x8   : > { %705 = vmatprep.mubr.msk.bf16.mxu1 (!%p157_p3), %vm469_vm0, %v790_v2  ;;  %v788_v31 = vld [vmem:[%s925_s0 + $0x8] ss:$16 sps:$4 sm:$0xff] (!%p157_p3)  }
   0xe   : > { %s933_s9 = smov (!%p200_p4, %s805_s9), 1 }
   0xf   : > { %s731_s17 = smul.u32 216, %s933_s9  ;;  %s708_s25 = sshll.u32 %s933_s9, 4 }
  0x10   : > { %s219_s28 = scalar_lea.vmem %s927_s2, %s708_s25 }
  0x11   : > { %s863_s20 = scalar_lea.vmem %s926_s1, %s731_s17  ;;  %226 = vst.msk [vmem:[%s219_s28] sm:$0xff] %vm225_vm1, %v816_v32  ;;  %227 = vst.msk [vmem:[%s219_s28 + $0x8] sm:$0xff] %vm225_vm1, %v816_v32 }
  0x12   : > { %v758_v3 = vld [vmem:[%s863_s20 + $0x80] sm:$0xff]   ;;  %v759_v4 = vld [vmem:[%s863_s20 + $0x88] sm:$0xff]   ;;  %v762_v7 = vld [vmem:[%s863_s20 + $0x90] sm:$0xff]  }
  0x13   : > { %515 = vmatpush1.bf16.msra.mxu1 %v758_v3  ;;  %v760_v5 = vld [vmem:[%s863_s20 + $0x40] sm:$0xff]   ;;  %v763_v8 = vld [vmem:[%s863_s20 + $0x48] sm:$0xff]   ;;  %v766_v10 = vld [vmem:[%s863_s20 + $0x50] sm:$0xff]  }
  0x14   : > { %516 = vmatprep.subr.bf16.mxu1 %v815_v0  ;;  %v761_v6 = vld [vmem:[%s863_s20] sm:$0xff]   ;;  %709 = vmatprep.subr.bf16.mxu0 %v760_v5  ;;  %v764_v9 = vld [vmem:[%s863_s20 + $0x8] sm:$0xff]   ;;  %v767_v11 = vld [vmem:[%s863_s20 + $0x10] sm:$0xff]  }
  0x15   : > { %710 = vmatpush3.bf16.msra.mxu0 %v761_v6  ;;  %v765_v12 = vld [vmem:[%s863_s20 + $0x98] sm:$0xff]   ;;  %v768_v14 = vld [vmem:[%s863_s20 + $0xa0] sm:$0xff]   ;;  %v771_v17 = vld [vmem:[%s863_s20 + $0xa8] sm:$0xff]  }
  0x16   : > { %711 = vmatprep.subr.bf16.mxu0 %v763_v8  ;;  %v769_v13 = vld [vmem:[%s863_s20 + $0x58] sm:$0xff]   ;;  %v772_v16 = vld [vmem:[%s863_s20 + $0x60] sm:$0xff]   ;;  %v775_v19 = vld [vmem:[%s863_s20 + $0x68] sm:$0xff]  }
  0x17   : > { %517 = vmatpush1.bf16.msra.mxu1 %v759_v4  ;;  %v770_v15 = vld [vmem:[%s863_s20 + $0x18] sm:$0xff]   ;;  %v773_v18 = vld [vmem:[%s863_s20 + $0x20] sm:$0xff]   ;;  %v774_v20 = vld [vmem:[%s863_s20 + $0xb0] sm:$0xff]  }
  0x18   : > { %518 = vmatprep.subr.bf16.mxu1 %v815_v0  ;;  %v776_v21 = vld [vmem:[%s863_s20 + $0x28] sm:$0xff]   ;;  %v778_v22 = vld [vmem:[%s863_s20 + $0x70] sm:$0xff]   ;;  %v777_v23 = vld [vmem:[%s863_s20 + $0xb8] sm:$0xff]  }
  0x19   : > { %712 = vmatpush3.bf16.msra.mxu0 %v764_v9  ;;  %v779_v24 = vld [vmem:[%s863_s20 + $0x30] sm:$0xff]   ;;  %v781_v25 = vld [vmem:[%s863_s20 + $0x78] sm:$0xff]   ;;  %v780_v27 = vld [vmem:[%s863_s20 + $0xc0] sm:$0xff]  }
  0x1a   : > { %713 = vmatprep.subr.bf16.mxu0 %v766_v10  ;;  %v782_v26 = vld [vmem:[%s863_s20 + $0x38] sm:$0xff]   ;;  %v786_v29 = vld [vmem:[%s863_s20 + $0xc8] sm:$0xff]   ;;  %v787_v30 = vld [vmem:[%s863_s20 + $0xd0] sm:$0xff]  }
  0x1b   : > { %519 = vmatpush1.bf16.msra.mxu1 %v762_v7  ;;  %v228_v39 = vld [vmem:[%s219_s28] sm:$0xff]  ;;  %v229_v43 = vld [vmem:[%s219_s28 + $0x8] sm:$0xff] }
  0x1c   : > { %520 = vmatprep.subr.bf16.mxu1 %v815_v0 }
  0x1d   : > { %714 = vmatpush3.bf16.msra.mxu0 %v767_v11 }
  0x1e   : > { %715 = vmatprep.subr.bf16.mxu0 %v769_v13 }
  0x1f   : > { %521 = vmatpush1.bf16.msra.mxu1 %v765_v12 }
  0x20   : > { %522 = vmatprep.subr.bf16.mxu1 %v815_v0 }
  0x21   : > { %716 = vmatpush3.bf16.msra.mxu0 %v770_v15 }
  0x22   : > { %717 = vmatprep.subr.bf16.mxu0 %v772_v16 }
  0x23   : > { %523 = vmatpush1.bf16.msra.mxu1 %v768_v14 }
  0x24   : > { %524 = vmatprep.subr.bf16.mxu1 %v815_v0 }
  0x25   : > { %718 = vmatpush3.bf16.msra.mxu0 %v773_v18 }
  0x26   : > { %719 = vmatprep.subr.bf16.mxu0 %v775_v19 }
  0x27   : > { %525 = vmatpush1.bf16.msra.mxu1 %v771_v17 }
  0x28   : > { %526 = vmatprep.subr.bf16.mxu1 %v815_v0 }
  0x29   : > { %720 = vmatpush3.bf16.msra.mxu0 %v776_v21 }
  0x2a   : > { %721 = vmatprep.subr.bf16.mxu0 %v778_v22 }
  0x2b   : > { %527 = vmatpush1.bf16.msra.mxu1 %v774_v20 }
  0x2c   : > { %528 = vmatprep.subr.bf16.mxu1 %v815_v0 }
  0x2d   : > { %722 = vmatpush3.bf16.msra.mxu0 %v779_v24 }
  0x2e   : > { %723 = vmatprep.subr.bf16.mxu0 %v781_v25 }
  0x2f   : > { %529 = vmatpush1.bf16.msra.mxu1 %v777_v23 }
  0x30   : > { %530 = vmatprep.subr.bf16.mxu1 %v815_v0 }
  0x31   : > { %724 = vmatpush3.bf16.msra.mxu0 %v782_v26 }
  0x33   : > { %531 = vmatpush1.bf16.msra.mxu1 %v780_v27 }
  0x34   : > { %532 = vmatprep.subr.bf16.mxu1 %v815_v0  ;;  %506 = vmatmul.mubr.bf16.vlgmr.msra.gmra.mrb[0].mxu0 %v783_v28 }
  0x37   : > { %533 = vmatpush1.bf16.msra.mxu1 %v786_v29 }
  0x38   : > { %534 = vmatprep.subr.bf16.mxu1 %v815_v0 }
  0x3b   : > { %535 = vmatpush1.bf16.msra.mxu1 %v787_v30 }
  0x3e   : > { %547 = vmatmul.mubr.bf16.vlgmr.msra.gmra.mrb[0].mxu1 %v788_v31 }
 0x107   : > { %v725_v33 = vpop.f32.mrb[0].mxu0 }
 0x108   : > { %v726_v34 = vpop.f32.mrb[1].mxu0 }
 0x109   : > { %v727_v35 = vadd.f32 %v726_v34, %v725_v33  ;;  %v728_v36 = vpop.f32.mrb[2].mxu0 }
 0x10a   : > { %v729_v37 = vpop.f32.mrb[3].mxu0 }
 0x10b   : > { %v730_v38 = vadd.f32 %v729_v37, %v728_v36 }
 0x111   : > { %v548_v40 = vpop.f32.mrb[0].mxu1 }
 0x112   : > { %v549_v41 = vadd.f32 %v727_v35, %v548_v40  ;;  %v550_v42 = vpop.f32.mrb[1].mxu1 }
 0x113   : > { %v551_v44 = vpop.f32.mrb[2].mxu1 }
 0x114   : > { %v555_v45 = vadd.f32 %v549_v41, %v228_v39  ;;  %v552_v46 = vadd.f32 %v730_v38, %v551_v44  ;;  %v553_v47 = vpop.f32.mrb[3].mxu1 }
 0x116   : > { %558 = vst.msk [vmem:[%s219_s28] sm:$0xff] %vm225_vm1, %v555_v45  ;;  %v556_v48 = vadd.f32 %v552_v46, %v229_v43 }
 0x118   : > { %559 = vst.msk [vmem:[%s219_s28 + $0x8] sm:$0xff] %vm225_vm1, %v556_v48 }
 0x119 PF: > { %s12_s11 = sadd.s32 1, %s813_s11   ;;  %s928_s9 = smov %s809_s10 }
 0x11a   : > { %p9_p5 = scmp.ge.s32.totalorder %s12_s11, 4   ;;  %s929_s10 = smov %s931_s12 }
 0x11c   :  { %11 = sbr.rel (!%p9_p5) target bundleno = 2 (0x2), region = 65 }

// kernel: hourglass_forward.49
= control target key start
LH: loop header
LB: loop body
LE: loop exit
PB: predicated region body
PF: predicated region fallthrough
CT: control target
= control target key end

     0   :  { %s552_s9 = smov 0   ;;  %s554_s10 = smov 0   ;;  %s595_s0 = inlined_call_operand.vmem [shape: bf16[8,128], index: 0, kind: input, shape index: {}]   ;;  %s596_s1 = inlined_call_operand.vmem [shape: bf16[2,128,8], index: 1, kind: input, shape index: {}]   ;;  %s597_s2 = inlined_call_operand.vmem [shape: f32[2,8,8], index: 2, kind: output, shape index: {}]  }
   0x1   :  { %s556_s11 = smov 0  }
   0x2 LB: > { %s31_s12 = sadd.s32 1, %s529_s10  ;;  %p433_p0 = scmp.ge.s32.totalorder %s533_s11, 1  ;;  %s533_s11 = sphi %s556_s11, %s12_s11   ;;  %s529_s10 = sphi %s554_s10, %s599_s10   ;;  %s525_s9 = sphi %s552_s9, %s598_s9  }
   0x3   : > { %p33_p1 = scmp.ge.s32.totalorder %s31_s12, 2  ;;  %p154_p2 = scmp.lt.s32.totalorder %s533_s11, 3 }
   0x5   : > { %s601_s12 = smov (%p33_p1, %s31_s12), 0  ;;  %p155_p3 = pnand %p433_p0, %p154_p2 }
   0x6   : > { %p194_p4 = scmp.lt.s32.totalorder (!%p155_p3), %s525_s9, 1  ;;  %v535_v0 = vmov (!%p155_p3), 0.0   ;;  %vm536_vm0 = vmmov (!%p155_p3), 0   ;;  %vm218_vm1 = vcmask (!%p155_p3), 64512   ;;  %v221_v9 = vld [vmem:[%s595_s0] sm:$0xf] (!%p155_p3) }
   0x7   : > { %158 = sbr.rel (%p155_p3) target bundleno = 264 (0x108), region = 28  ;;  %457 = vmatprep.subr.bf16.mxu0 (!%p155_p3), %v535_v0  ;;  %473 = vmatprep.mubr.msk.bf16.mxu0 (!%p155_p3), %vm536_vm0, %v535_v0 }
   0xe   : > { %s603_s9 = smov (!%p194_p4, %s525_s9), 1 }
   0xf   : > { %s447_s13 = sshll.u32 %s603_s9, 6  ;;  %s436_s14 = sshll.u32 %s603_s9, 3 }
  0x10   : > { %s204_s17 = scalar_lea.vmem %s596_s1, %s447_s13  ;;  %s576_s20 = scalar_lea.vmem %s597_s2, %s436_s14 }
  0x11   : > { %v503_v1 = vld [vmem:[%s204_s17] sm:$0xff]   ;;  %219 = vst.msk [vmem:[%s576_s20] sm:$0xff] %vm218_vm1, %v535_v0  ;;  %v504_v2 = vld [vmem:[%s204_s17 + $0x8] sm:$0xff]   ;;  %v505_v3 = vld [vmem:[%s204_s17 + $0x10] sm:$0xff]  }
  0x12   : > { %458 = vmatpush3.bf16.msra.mxu0 %v503_v1  ;;  %v506_v4 = vld [vmem:[%s204_s17 + $0x18] sm:$0xff]   ;;  %v507_v5 = vld [vmem:[%s204_s17 + $0x20] sm:$0xff]   ;;  %v508_v6 = vld [vmem:[%s204_s17 + $0x28] sm:$0xff]  }
  0x13   : > { %459 = vmatprep.subr.bf16.mxu0 %v535_v0  ;;  %v509_v7 = vld [vmem:[%s204_s17 + $0x30] sm:$0xff]   ;;  %v510_v8 = vld [vmem:[%s204_s17 + $0x38] sm:$0xff]  }
  0x16   : > { %460 = vmatpush3.bf16.msra.mxu0 %v504_v2 }
  0x17   : > { %461 = vmatprep.subr.bf16.mxu0 %v535_v0 }
  0x18   : > { %v220_v10 = vld [vmem:[%s576_s20] sm:$0xff] }
  0x1a   : > { %462 = vmatpush3.bf16.msra.mxu0 %v505_v3 }
  0x1b   : > { %463 = vmatprep.subr.bf16.mxu0 %v535_v0 }
  0x1e   : > { %464 = vmatpush3.bf16.msra.mxu0 %v506_v4 }
  0x1f   : > { %465 = vmatprep.subr.bf16.mxu0 %v535_v0 }
  0x22   : > { %466 = vmatpush3.bf16.msra.mxu0 %v507_v5 }
  0x23   : > { %467 = vmatprep.subr.bf16.mxu0 %v535_v0 }
  0x26   : > { %468 = vmatpush3.bf16.msra.mxu0 %v508_v6 }
  0x27   : > { %469 = vmatprep.subr.bf16.mxu0 %v535_v0 }
  0x2a   : > { %470 = vmatpush3.bf16.msra.mxu0 %v509_v7 }
  0x2b   : > { %471 = vmatprep.subr.bf16.mxu0 %v535_v0 }
  0x2e   : > { %472 = vmatpush3.bf16.msra.mxu0 %v510_v8 }
  0x31   : > { %474 = vmatmul.mubr.bf16.vlgmr.msra.gmra.mrb[0].mxu0 %v221_v9 }
 0x104   : > { %v320_v11 = vpop.f32.mrb[0].mxu0 }
 0x105   : > { %v326_v12 = vadd.f32 %v320_v11, %v220_v10  ;;  %v475_v13 = vpop.f32.mrb[1].mxu0 }
 0x106   : > { %v323_v14 = vpop.f32.mrb[2].mxu0 }
 0x107   : > { %328 = vst.msk [vmem:[%s576_s20] sm:$0xff] %vm218_vm1, %v326_v12  ;;  %v476_v15 = vpop.f32.mrb[3].mxu0 }
 0x108 PF: > { %s12_s11 = sadd.s32 1, %s533_s11   ;;  %s598_s9 = smov %s529_s10 }
 0x109   : > { %p9_p5 = scmp.ge.s32.totalorder %s12_s11, 4   ;;  %s599_s10 = smov %s601_s12 }
 0x10b   :  { %11 = sbr.rel (!%p9_p5) target bundleno = 2 (0x2), region = 65 }

// kernel: hourglass_forward.46
= control target key start
LH: loop header
LB: loop body
LE: loop exit
PB: predicated region body
PF: predicated region fallthrough
CT: control target
= control target key end

     0   :  { %s479_s9 = smov 0   ;;  %s481_s10 = smov 0   ;;  %s517_s0 = inlined_call_operand.vmem [shape: bf16[8,32], index: 0, kind: input, shape index: {}]   ;;  %s518_s1 = inlined_call_operand.vmem [shape: bf16[2,32,8], index: 1, kind: input, shape index: {}]   ;;  %s519_s2 = inlined_call_operand.vmem [shape: f32[2,8,8], index: 2, kind: output, shape index: {}]  }
   0x1   :  { %s483_s11 = smov 0  }
   0x2 LB: > { %s31_s12 = sadd.s32 1, %s456_s10  ;;  %p389_p0 = scmp.ge.s32.totalorder %s460_s11, 1  ;;  %s460_s11 = sphi %s483_s11, %s12_s11   ;;  %s456_s10 = sphi %s481_s10, %s521_s10   ;;  %s452_s9 = sphi %s479_s9, %s520_s9  }
   0x3   : > { %p33_p1 = scmp.ge.s32.totalorder %s31_s12, 2  ;;  %p154_p2 = scmp.lt.s32.totalorder %s460_s11, 3 }
   0x5   : > { %s523_s12 = smov (%p33_p1, %s31_s12), 0  ;;  %p155_p3 = pnand %p389_p0, %p154_p2 }
   0x6   : > { %p194_p4 = scmp.lt.s32.totalorder (!%p155_p3), %s452_s9, 1  ;;  %v462_v0 = vmov (!%p155_p3), 0.0   ;;  %vm463_vm0 = vmmov (!%p155_p3), 0   ;;  %vm218_vm1 = vcmask (!%p155_p3), 64512   ;;  %v221_v3 = vld [vmem:[%s517_s0] sm:$0xf] (!%p155_p3) }
   0x7   : > { %158 = sbr.rel (%p155_p3) target bundleno = 240 (0xf0), region = 28  ;;  %402 = vmatprep.subr.bf16.mxu0 (!%p155_p3), %v462_v0  ;;  %406 = vmatprep.mubr.msk.bf16.mxu0 (!%p155_p3), %vm463_vm0, %v462_v0  ;;  %vm238_vm2 = vcmask (!%p155_p3), 261120  }
   0xe   : > { %s525_s9 = smov (!%p194_p4, %s452_s9), 1 }
   0xf   : > { %s398_s13 = sshll.u32 %s525_s9, 4  ;;  %s392_s14 = sshll.u32 %s525_s9, 3 }
  0x10   : > { %s204_s17 = scalar_lea.vmem %s518_s1, %s398_s13  ;;  %s212_s20 = scalar_lea.vmem %s519_s2, %s392_s14 }
  0x11   : > { %v436_v1 = vld [vmem:[%s204_s17] sm:$0xff]   ;;  %219 = vst.msk [vmem:[%s212_s20] sm:$0xff] %vm218_vm1, %v462_v0  ;;  %v437_v2 = vld [vmem:[%s204_s17 + $0x8] sm:$0xff]  }
  0x12   : > { %403 = vmatpush3.bf16.msra.mxu0 %v436_v1 }
  0x13   : > { %404 = vmatprep.subr.bf16.mxu0 %v462_v0 }
  0x16   : > { %405 = vmatpush3.bf16.msra.mxu0 %v437_v2 }
  0x18   : > { %v220_v4 = vld [vmem:[%s212_s20] sm:$0xff] }
  0x19   : > { %407 = vmatmul.mubr.msk.bf16.vlgmr.msra.gmra.mrb[0].mxu0 %vm238_vm2, %v221_v3 }
  0xec   : > { %v276_v5 = vpop.f32.mrb[0].mxu0 }
  0xed   : > { %v282_v6 = vadd.f32 %v276_v5, %v220_v4  ;;  %v408_v7 = vpop.f32.mrb[1].mxu0 }
  0xee   : > { %v279_v8 = vpop.f32.mrb[2].mxu0 }
  0xef   : > { %284 = vst.msk [vmem:[%s212_s20] sm:$0xff] %vm218_vm1, %v282_v6  ;;  %v409_v9 = vpop.f32.mrb[3].mxu0 }
  0xf0 PF: > { %s12_s11 = sadd.s32 1, %s460_s11   ;;  %s520_s9 = smov %s456_s10 }
  0xf1   : > { %p9_p5 = scmp.ge.s32.totalorder %s12_s11, 4   ;;  %s521_s10 = smov %s523_s12 }
  0xf3   :  { %11 = sbr.rel (!%p9_p5) target bundleno = 2 (0x2), region = 65 }

// kernel: hourglass_forward.48
= control target key start
LH: loop header
LB: loop body
LE: loop exit
PB: predicated region body
PF: predicated region fallthrough
CT: control target
= control target key end

     0   :  { %s505_s9 = smov 0   ;;  %s507_s10 = smov 0   ;;  %s543_s0 = inlined_call_operand.vmem [shape: bf16[8,64], index: 0, kind: input, shape index: {}]   ;;  %s544_s1 = inlined_call_operand.vmem [shape: bf16[2,64,8], index: 1, kind: input, shape index: {}]   ;;  %s545_s2 = inlined_call_operand.vmem [shape: f32[2,8,8], index: 2, kind: output, shape index: {}]  }
   0x1   :  { %s509_s11 = smov 0  }
   0x2 LB: > { %s31_s12 = sadd.s32 1, %s482_s10  ;;  %p405_p0 = scmp.ge.s32.totalorder %s486_s11, 1  ;;  %s486_s11 = sphi %s509_s11, %s12_s11   ;;  %s482_s10 = sphi %s507_s10, %s547_s10   ;;  %s478_s9 = sphi %s505_s9, %s546_s9  }
   0x3   : > { %p33_p1 = scmp.ge.s32.totalorder %s31_s12, 2  ;;  %p154_p2 = scmp.lt.s32.totalorder %s486_s11, 3 }
   0x5   : > { %s549_s12 = smov (%p33_p1, %s31_s12), 0  ;;  %p155_p3 = pnand %p405_p0, %p154_p2 }
   0x6   : > { %p194_p4 = scmp.lt.s32.totalorder (!%p155_p3), %s478_s9, 1  ;;  %v488_v0 = vmov (!%p155_p3), 0.0   ;;  %vm489_vm0 = vmmov (!%p155_p3), 0   ;;  %vm218_vm1 = vcmask (!%p155_p3), 64512   ;;  %v221_v5 = vld [vmem:[%s543_s0] sm:$0xf] (!%p155_p3) }
   0x7   : > { %158 = sbr.rel (%p155_p3) target bundleno = 248 (0xf8), region = 28  ;;  %422 = vmatprep.subr.bf16.mxu0 (!%p155_p3), %v488_v0  ;;  %430 = vmatprep.mubr.msk.bf16.mxu0 (!%p155_p3), %vm489_vm0, %v488_v0  ;;  %vm254_vm2 = vcmask (!%p155_p3), 523264  }
   0xe   : > { %s551_s9 = smov (!%p194_p4, %s478_s9), 1 }
   0xf   : > { %s416_s13 = sshll.u32 %s551_s9, 5  ;;  %s408_s14 = sshll.u32 %s551_s9, 3 }
  0x10   : > { %s204_s17 = scalar_lea.vmem %s544_s1, %s416_s13  ;;  %s212_s20 = scalar_lea.vmem %s545_s2, %s408_s14 }
  0x11   : > { %v460_v1 = vld [vmem:[%s204_s17] sm:$0xff]   ;;  %219 = vst.msk [vmem:[%s212_s20] sm:$0xff] %vm218_vm1, %v488_v0  ;;  %v461_v2 = vld [vmem:[%s204_s17 + $0x8] sm:$0xff]   ;;  %v462_v3 = vld [vmem:[%s204_s17 + $0x10] sm:$0xff]  }
  0x12   : > { %423 = vmatpush3.bf16.msra.mxu0 %v460_v1  ;;  %v463_v4 = vld [vmem:[%s204_s17 + $0x18] sm:$0xff]  }
  0x13   : > { %424 = vmatprep.subr.bf16.mxu0 %v488_v0 }
  0x16   : > { %425 = vmatpush3.bf16.msra.mxu0 %v461_v2 }
  0x17   : > { %426 = vmatprep.subr.bf16.mxu0 %v488_v0 }
  0x18   : > { %v220_v6 = vld [vmem:[%s212_s20] sm:$0xff] }
  0x1a   : > { %427 = vmatpush3.bf16.msra.mxu0 %v462_v3 }
  0x1b   : > { %428 = vmatprep.subr.bf16.mxu0 %v488_v0 }
  0x1e   : > { %429 = vmatpush3.bf16.msra.mxu0 %v463_v4 }
  0x21   : > { %431 = vmatmul.mubr.msk.bf16.vlgmr.msra.gmra.mrb[0].mxu0 %vm254_vm2, %v221_v5 }
  0xf4   : > { %v292_v7 = vpop.f32.mrb[0].mxu0 }
  0xf5   : > { %v298_v8 = vadd.f32 %v292_v7, %v220_v6  ;;  %v432_v9 = vpop.f32.mrb[1].mxu0 }
  0xf6   : > { %v295_v10 = vpop.f32.mrb[2].mxu0 }
  0xf7   : > { %300 = vst.msk [vmem:[%s212_s20] sm:$0xff] %vm218_vm1, %v298_v8  ;;  %v433_v11 = vpop.f32.mrb[3].mxu0 }
  0xf8 PF: > { %s12_s11 = sadd.s32 1, %s486_s11   ;;  %s546_s9 = smov %s482_s10 }
  0xf9   : > { %p9_p5 = scmp.ge.s32.totalorder %s12_s11, 4   ;;  %s547_s10 = smov %s549_s12 }
  0xfb   :  { %11 = sbr.rel (!%p9_p5) target bundleno = 2 (0x2), region = 65 }

// kernel: hourglass_forward.50
= control target key start
LH: loop header
LB: loop body
LE: loop exit
PB: predicated region body
PF: predicated region fallthrough
CT: control target
= control target key end

     0   :  { %s291_s9 = smov 0   ;;  %s293_s10 = smov 0   ;;  %s339_s0 = inlined_call_operand.vmem [shape: f32[2,8,64], index: 0, kind: input, shape index: {}]   ;;  %s340_s1 = inlined_call_operand.vmem [shape: f32[8,1], index: 1, kind: output, shape index: {0}]   ;;  %s341_s2 = inlined_call_operand.vmem [shape: f32[8,1], index: 2, kind: output, shape index: {1}]  }
   0x1   :  { %s295_s11 = smov 0  }
   0x2 LB: > { %s25_s12 = sadd.s32 1, %s269_s10  ;;  %p220_p0 = scmp.ge.s32.totalorder %s273_s11, 1  ;;  %s273_s11 = sphi %s295_s11, %s13_s11   ;;  %s269_s10 = sphi %s293_s10, %s343_s10   ;;  %s265_s9 = sphi %s291_s9, %s342_s9  }
   0x3   : > { %p27_p1 = scmp.ge.s32.totalorder %s25_s12, 2  ;;  %p121_p2 = scmp.lt.s32.totalorder %s273_s11, 3 }
   0x5   : > { %s345_s12 = smov (%p27_p1, %s25_s12), 0  ;;  %p122_p3 = pnand %p220_p0, %p121_p2 }
   0x6   : > { %p140_p4 = scmp.lt.s32.totalorder (!%p122_p3), %s265_s9, 1  ;;  %p147_p5 = scmp.eq.s32.totalorder (!%p122_p3), %s265_s9, 0 }
   0x7   : > { %125 = sbr.rel (%p122_p3) target bundleno = 172 (0xac), region = 24 }
   0xe   : > { %s347_s9 = smov (!%p140_p4, %s265_s9), 1  ;;  %152 = sbr.rel (!%p147_p5) target bundleno = 21 (0x15), region = 28 }
   0xf   : > { %s221_s13 = sshll.u32 %s347_s9, 3  ;;  %vm153_vm0 = vcmask (%p147_p5), 7168   ;;  %v275_v0 = vmov (%p147_p5), 0.0  }
  0x10   : > { %s146_s16 = scalar_lea.vmem %s339_s0, %s221_s13  ;;  %154 = vst.msk [vmem:[%s340_s1] sm:$0xff] (%p147_p5), %vm153_vm0, %v275_v0  ;;  %155 = vst.msk [vmem:[%s341_s2] sm:$0xff] (%p147_p5), %vm153_vm0, %v275_v0 }
  0x15 PF: > { %v156_v1 = vld [vmem:[%s146_s16] sm:$0xff]  ;;  %vm158_vm1 = vcmask 523264   ;;  %vm163_vm2 = vcmask 7168  }
  0x16   : > { %v159_v2 = vsel %vm158_vm1, %v156_v1, 0.0  ;;  %v166_v3 = vmul.f32 %v156_v1, %v156_v1 }
  0x17   : > { %160 = vadd.xlane.f32.xlu0 %v159_v2  ;;  %v157_v5 = vld [vmem:[%s340_s1] sm:$0xff] }
  0x18   : > { %v167_v4 = vsel %vm158_vm1, %v166_v3, 0.0  ;;  %v165_v8 = vld [vmem:[%s341_s2] sm:$0xff] }
  0x1b   : > { %168 = vadd.xlane.f32.xlu0 %v167_v4 }
  0xa4   : > { %v161_v6 = vpop.xlane.xlu0 %160 }
  0xa5   : > { %v162_v7 = vadd.f32 %v161_v6, %v157_v5 }
  0xa7   : > { %164 = vst.msk [vmem:[%s340_s1] sm:$0xff] %vm163_vm2, %v162_v7 }
  0xa8   : > { %v169_v9 = vpop.xlane.xlu0 %168 }
  0xa9   : > { %v170_v10 = vadd.f32 %v169_v9, %v165_v8 }
  0xab   : > { %171 = vst.msk [vmem:[%s341_s2] sm:$0xff] %vm163_vm2, %v170_v10 }
  0xac PF: > { %s13_s11 = sadd.s32 1, %s273_s11   ;;  %s342_s9 = smov %s269_s10 }
  0xad   : > { %p10_p6 = scmp.ge.s32.totalorder %s13_s11, 4   ;;  %s343_s10 = smov %s345_s12 }
  0xaf   :  { %12 = sbr.rel (!%p10_p6) target bundleno = 2 (0x2), region = 62 }

// kernel: hourglass_forward.54
= control target key start
LH: loop header
LB: loop body
LE: loop exit
PB: predicated region body
PF: predicated region fallthrough
CT: control target
= control target key end

     0   :  { %s448_s9 = smov 0   ;;  %s450_s10 = smov 0   ;;  %s486_s0 = inlined_call_operand.vmem [shape: bf16[4,8], index: 0, kind: input, shape index: {}]   ;;  %s487_s1 = inlined_call_operand.vmem [shape: bf16[2,8,64], index: 1, kind: input, shape index: {}]   ;;  %s488_s2 = inlined_call_operand.vmem [shape: f32[2,4,64], index: 2, kind: output, shape index: {}]  }
   0x1   :  { %s452_s11 = smov 0  }
   0x2 LB: > { %s31_s12 = sadd.s32 1, %s425_s10  ;;  %p367_p0 = scmp.ge.s32.totalorder %s429_s11, 1  ;;  %s429_s11 = sphi %s452_s11, %s12_s11   ;;  %s425_s10 = sphi %s450_s10, %s490_s10   ;;  %s421_s9 = sphi %s448_s9, %s489_s9  }
   0x3   : > { %p33_p1 = scmp.ge.s32.totalorder %s31_s12, 2  ;;  %p151_p2 = scmp.lt.s32.totalorder %s429_s11, 3 }
   0x5   : > { %s492_s12 = smov (%p33_p1, %s31_s12), 0  ;;  %p152_p3 = pnand %p367_p0, %p151_p2 }
   0x6   : > { %p188_p4 = scmp.lt.s32.totalorder (!%p152_p3), %s421_s9, 1  ;;  %v431_v0 = vmov (!%p152_p3), 0.0   ;;  %vm432_vm0 = vmmov (!%p152_p3), 0   ;;  %vm210_vm1 = vcmask (!%p152_p3), 519168   ;;  %vm219_vm2 = vcmask (!%p152_p3), 1043456  }
   0x7   : > { %155 = sbr.rel (%p152_p3) target bundleno = 237 (0xed), region = 28  ;;  %375 = vmatprep.subr.bf16.mxu0 (!%p152_p3), %v431_v0  ;;  %377 = vmatprep.mubr.msk.bf16.mxu0 (!%p152_p3), %vm432_vm0, %v431_v0  ;;  %v213_v3 = vld [vmem:[%s486_s0] sm:$0x3] (!%p152_p3)  ;;  %vm215_vm3 = vcmask (!%p152_p3), 64512  }
   0xe   : > { %s494_s9 = smov (!%p188_p4, %s421_s9), 1 }
   0xf   : > { %s368_s13 = sshll.u32 %s494_s9, 2 }
  0x10   : > { %s197_s16 = scalar_lea.vmem %s487_s1, %s368_s13  ;;  %s204_s19 = scalar_lea.vmem %s488_s2, %s368_s13 }
  0x11   : > { %v214_v1 = vld [vmem:[%s197_s16] sm:$0xf]  ;;  %211 = vst.msk [vmem:[%s204_s19] sm:$0xf] %vm210_vm1, %v431_v0 }
  0x12   : > { %v221_v2 = vsel %vm219_vm2, %v214_v1, 0 }
  0x13   : > { %376 = vmatpush3.bf16.msra.mxu0 %v221_v2 }
  0x16   : > { %378 = vmatmul.mubr.msk.bf16.vlgmr.msra.gmra.mrb[0].mxu0 %vm215_vm3, %v213_v3 }
  0x18   : > { %v212_v4 = vld [vmem:[%s204_s19] sm:$0xf] }
  0xe9   : > { %v257_v5 = vpop.f32.mrb[0].mxu0 }
  0xea   : > { %v263_v6 = vadd.f32 %v257_v5, %v212_v4  ;;  %v379_v7 = vpop.f32.mrb[1].mxu0 }
  0xeb   : > { %v260_v8 = vpop.f32.mrb[2].mxu0 }
  0xec   : > { %265 = vst.msk [vmem:[%s204_s19] sm:$0xf] %vm210_vm1, %v263_v6  ;;  %v380_v9 = vpop.f32.mrb[3].mxu0 }
  0xed PF: > { %s12_s11 = sadd.s32 1, %s429_s11   ;;  %s489_s9 = smov %s425_s10 }
  0xee   : > { %p9_p5 = scmp.ge.s32.totalorder %s12_s11, 4   ;;  %s490_s10 = smov %s492_s12 }
  0xf0   :  { %11 = sbr.rel (!%p9_p5) target bundleno = 2 (0x2), region = 65 }

// kernel: hourglass_forward.51
= control target key start
LH: loop header
LB: loop body
LE: loop exit
PB: predicated region body
PF: predicated region fallthrough
CT: control target
= control target key end

     0   :  { %s447_s15 = smov 0   ;;  %s449_s16 = smov 0   ;;  %s486_s0 = inlined_call_operand.vmem [shape: f32[2,8,64], index: 0, kind: input, shape index: {}]   ;;  %s487_s1 = inlined_call_operand.vmem [shape: f32[2,8,64], index: 1, kind: input, shape index: {}]   ;;  %s488_s2 = inlined_call_operand.vmem [shape: f32[8,1], index: 2, kind: input, shape index: {}]   ;;  %s489_s3 = inlined_call_operand.vmem [shape: f32[8,1], index: 3, kind: input, shape index: {}]   ;;  %s490_s4 = inlined_call_operand.vmem [shape: f32[2,8,64], index: 4, kind: output, shape index: {}]  }
   0x1   :  { %s451_s17 = smov 0  }
   0x2 LB: > { %s26_s18 = sadd.s32 1, %s415_s16  ;;  %p365_p0 = scmp.ge.s32.totalorder %s419_s17, 1  ;;  %s419_s17 = sphi %s451_s17, %s14_s17   ;;  %s415_s16 = sphi %s449_s16, %s492_s16   ;;  %s411_s15 = sphi %s447_s15, %s491_s15  }
   0x3   : > { %p28_p1 = scmp.ge.s32.totalorder %s26_s18, 2  ;;  %p194_p2 = scmp.lt.s32.totalorder %s419_s17, 3 }
   0x5   : > { %s494_s18 = smov (%p28_p1, %s26_s18), 0  ;;  %p195_p3 = pnand %p365_p0, %p194_p2 }
   0x6   : > { %v253_v0 = vld [vmem:[%s488_s2] sm:$0xff] (!%p195_p3)  ;;  %v421_v1 = vmov (!%p195_p3), 0   ;;  %p231_p4 = scmp.lt.s32.totalorder (!%p195_p3), %s411_s15, 1  ;;  %vm270_vm0 = vcmask (!%p195_p3), 523264  }
   0x7   : > { %198 = sbr.rel (%p195_p3) target bundleno = 147 (0x93), region = 36  ;;  %396 = vset.pattern.permute.xlu0 (!%p195_p3), %v421_v1  ;;  %v260_v2 = vld [vmem:[%s489_s3] sm:$0xff] (!%p195_p3) }
   0x8   : > { %256 = vperm.xlu0 (!%p195_p3), %396, %v253_v0  }
   0xc   : > { %263 = vperm.xlu0 (!%p195_p3), %396, %v260_v2  }
   0xe   : > { %s496_s15 = smov (!%p231_p4, %s411_s15), 1 }
   0xf   : > { %s366_s23 = sshll.u32 %s496_s15, 3 }
  0x10   : > { %s237_s26 = scalar_lea.vmem %s486_s0, %s366_s23  ;;  %s244_s29 = scalar_lea.vmem %s487_s1, %s366_s23 }
  0x11   : > { %v252_v4 = vld [vmem:[%s237_s26] sm:$0xff]  ;;  %s251_s6 = scalar_lea.vmem %s490_s4, %s366_s23 }
  0x12   : > { %v267_v7 = vld [vmem:[%s244_s29] sm:$0xff] }
  0x87   : > { %v257_v3 = vpop.permute.xlu0 %256 }
  0x88   : > { %v259_v5 = vmul.f32 %v257_v3, %v252_v4 }
  0x8b   : > { %v264_v6 = vpop.permute.xlu0 %263 }
  0x8c   : > { %v266_v8 = vadd.f32 %v264_v6, %v259_v5 }
  0x8e   : > { %v268_v9 = vadd.f32 %v267_v7, %v266_v8 }
  0x90   : > { %v269_v10 = vmax.f32 %v268_v9, 0.0 }
  0x92   : > { %271 = vst.msk [vmem:[%s251_s6] sm:$0xff] %vm270_vm0, %v269_v10 }
  0x93 PF: > { %s14_s17 = sadd.s32 1, %s419_s17   ;;  %s491_s15 = smov %s415_s16 }
  0x94   : > { %p11_p5 = scmp.ge.s32.totalorder %s14_s17, 4   ;;  %s492_s16 = smov %s494_s18 }
  0x96   :  { %13 = sbr.rel (!%p11_p5) target bundleno = 2 (0x2), region = 69 }

// kernel: hourglass_forward.61
= control target key start
LH: loop header
LB: loop body
LE: loop exit
PB: predicated region body
PF: predicated region fallthrough
CT: control target
= control target key end

     0   :  { %s505_s9 = smov 0   ;;  %s507_s10 = smov 0   ;;  %s543_s0 = inlined_call_operand.vmem [shape: bf16[4,64], index: 0, kind: input, shape index: {}]   ;;  %s544_s1 = inlined_call_operand.vmem [shape: bf16[2,64,64], index: 1, kind: input, shape index: {}]   ;;  %s545_s2 = inlined_call_operand.vmem [shape: f32[2,4,64], index: 2, kind: output, shape index: {}]  }
   0x1   :  { %s509_s11 = smov 0  }
   0x2 LB: > { %s31_s12 = sadd.s32 1, %s482_s10  ;;  %p405_p0 = scmp.ge.s32.totalorder %s486_s11, 1  ;;  %s486_s11 = sphi %s509_s11, %s12_s11   ;;  %s482_s10 = sphi %s507_s10, %s547_s10   ;;  %s478_s9 = sphi %s505_s9, %s546_s9  }
   0x3   : > { %p33_p1 = scmp.ge.s32.totalorder %s31_s12, 2  ;;  %p154_p2 = scmp.lt.s32.totalorder %s486_s11, 3 }
   0x5   : > { %s549_s12 = smov (%p33_p1, %s31_s12), 0  ;;  %p155_p3 = pnand %p405_p0, %p154_p2 }
   0x6   : > { %p194_p4 = scmp.lt.s32.totalorder (!%p155_p3), %s478_s9, 1  ;;  %v488_v0 = vmov (!%p155_p3), 0.0   ;;  %vm489_vm0 = vmmov (!%p155_p3), 0   ;;  %vm218_vm1 = vcmask (!%p155_p3), 519168   ;;  %v221_v5 = vld [vmem:[%s543_s0] sm:$0x3] (!%p155_p3) }
   0x7   : > { %158 = sbr.rel (%p155_p3) target bundleno = 248 (0xf8), region = 28  ;;  %422 = vmatprep.subr.bf16.mxu0 (!%p155_p3), %v488_v0  ;;  %430 = vmatprep.mubr.msk.bf16.mxu0 (!%p155_p3), %vm489_vm0, %v488_v0  ;;  %vm254_vm2 = vcmask (!%p155_p3), 523264  }
   0xe   : > { %s551_s9 = smov (!%p194_p4, %s478_s9), 1 }
   0xf   : > { %s416_s13 = sshll.u32 %s551_s9, 5  ;;  %s408_s14 = sshll.u32 %s551_s9, 2 }
  0x10   : > { %s204_s17 = scalar_lea.vmem %s544_s1, %s416_s13  ;;  %s212_s20 = scalar_lea.vmem %s545_s2, %s408_s14 }
  0x11   : > { %v460_v1 = vld [vmem:[%s204_s17] sm:$0xff]   ;;  %219 = vst.msk [vmem:[%s212_s20] sm:$0xf] %vm218_vm1, %v488_v0  ;;  %v461_v2 = vld [vmem:[%s204_s17 + $0x8] sm:$0xff]   ;;  %v462_v3 = vld [vmem:[%s204_s17 + $0x10] sm:$0xff]  }
  0x12   : > { %423 = vmatpush3.bf16.msra.mxu0 %v460_v1  ;;  %v463_v4 = vld [vmem:[%s204_s17 + $0x18] sm:$0xff]  }
  0x13   : > { %424 = vmatprep.subr.bf16.mxu0 %v488_v0 }
  0x16   : > { %425 = vmatpush3.bf16.msra.mxu0 %v461_v2 }
  0x17   : > { %426 = vmatprep.subr.bf16.mxu0 %v488_v0 }
  0x18   : > { %v220_v6 = vld [vmem:[%s212_s20] sm:$0xf] }
  0x1a   : > { %427 = vmatpush3.bf16.msra.mxu0 %v462_v3 }
  0x1b   : > { %428 = vmatprep.subr.bf16.mxu0 %v488_v0 }
  0x1e   : > { %429 = vmatpush3.bf16.msra.mxu0 %v463_v4 }
  0x21   : > { %431 = vmatmul.mubr.msk.bf16.vlgmr.msra.gmra.mrb[0].mxu0 %vm254_vm2, %v221_v5 }
  0xf4   : > { %v292_v7 = vpop.f32.mrb[0].mxu0 }
  0xf5   : > { %v298_v8 = vadd.f32 %v292_v7, %v220_v6  ;;  %v432_v9 = vpop.f32.mrb[1].mxu0 }
  0xf6   : > { %v295_v10 = vpop.f32.mrb[2].mxu0 }
  0xf7   : > { %300 = vst.msk [vmem:[%s212_s20] sm:$0xf] %vm218_vm1, %v298_v8  ;;  %v433_v11 = vpop.f32.mrb[3].mxu0 }
  0xf8 PF: > { %s12_s11 = sadd.s32 1, %s486_s11   ;;  %s546_s9 = smov %s482_s10 }
  0xf9   : > { %p9_p5 = scmp.ge.s32.totalorder %s12_s11, 4   ;;  %s547_s10 = smov %s549_s12 }
  0xfb   :  { %11 = sbr.rel (!%p9_p5) target bundleno = 2 (0x2), region = 65 }

// kernel: hourglass_forward.58
= control target key start
LH: loop header
LB: loop body
LE: loop exit
PB: predicated region body
PF: predicated region fallthrough
CT: control target
= control target key end

     0   :  { %s466_s9 = smov 0   ;;  %s468_s10 = smov 0   ;;  %s504_s0 = inlined_call_operand.vmem [shape: bf16[4,16], index: 0, kind: input, shape index: {}]   ;;  %s505_s1 = inlined_call_operand.vmem [shape: bf16[2,16,64], index: 1, kind: input, shape index: {}]   ;;  %s506_s2 = inlined_call_operand.vmem [shape: f32[2,4,64], index: 2, kind: output, shape index: {}]  }
   0x1   :  { %s470_s11 = smov 0  }
   0x2 LB: > { %s31_s12 = sadd.s32 1, %s443_s10  ;;  %p381_p0 = scmp.ge.s32.totalorder %s447_s11, 1  ;;  %s447_s11 = sphi %s470_s11, %s12_s11   ;;  %s443_s10 = sphi %s468_s10, %s508_s10   ;;  %s439_s9 = sphi %s466_s9, %s507_s9  }
   0x3   : > { %p33_p1 = scmp.ge.s32.totalorder %s31_s12, 2  ;;  %p154_p2 = scmp.lt.s32.totalorder %s447_s11, 3 }
   0x5   : > { %s510_s12 = smov (%p33_p1, %s31_s12), 0  ;;  %p155_p3 = pnand %p381_p0, %p154_p2 }
   0x6   : > { %p194_p4 = scmp.lt.s32.totalorder (!%p155_p3), %s439_s9, 1  ;;  %v449_v0 = vmov (!%p155_p3), 0.0   ;;  %vm450_vm0 = vmmov (!%p155_p3), 0   ;;  %vm218_vm1 = vcmask (!%p155_p3), 519168   ;;  %v221_v2 = vld [vmem:[%s504_s0] sm:$0x3] (!%p155_p3) }
   0x7   : > { %158 = sbr.rel (%p155_p3) target bundleno = 236 (0xec), region = 28  ;;  %392 = vmatprep.subr.bf16.mxu0 (!%p155_p3), %v449_v0  ;;  %394 = vmatprep.mubr.msk.bf16.mxu0 (!%p155_p3), %vm450_vm0, %v449_v0  ;;  %vm230_vm2 = vcmask (!%p155_p3), 130048  }
   0xe   : > { %s512_s9 = smov (!%p194_p4, %s439_s9), 1 }
   0xf   : > { %s389_s13 = sshll.u32 %s512_s9, 3  ;;  %s384_s14 = sshll.u32 %s512_s9, 2 }
  0x10   : > { %s204_s17 = scalar_lea.vmem %s505_s1, %s389_s13  ;;  %s212_s20 = scalar_lea.vmem %s506_s2, %s384_s14 }
  0x11   : > { %v424_v1 = vld [vmem:[%s204_s17] sm:$0xff]   ;;  %219 = vst.msk [vmem:[%s212_s20] sm:$0xf] %vm218_vm1, %v449_v0 }
  0x12   : > { %393 = vmatpush3.bf16.msra.mxu0 %v424_v1 }
  0x15   : > { %395 = vmatmul.mubr.msk.bf16.vlgmr.msra.gmra.mrb[0].mxu0 %vm230_vm2, %v221_v2 }
  0x18   : > { %v220_v3 = vld [vmem:[%s212_s20] sm:$0xf] }
  0xe8   : > { %v268_v4 = vpop.f32.mrb[0].mxu0 }
  0xe9   : > { %v274_v5 = vadd.f32 %v268_v4, %v220_v3  ;;  %v396_v6 = vpop.f32.mrb[1].mxu0 }
  0xea   : > { %v271_v7 = vpop.f32.mrb[2].mxu0 }
  0xeb   : > { %276 = vst.msk [vmem:[%s212_s20] sm:$0xf] %vm218_vm1, %v274_v5  ;;  %v397_v8 = vpop.f32.mrb[3].mxu0 }
  0xec PF: > { %s12_s11 = sadd.s32 1, %s447_s11   ;;  %s507_s9 = smov %s443_s10 }
  0xed   : > { %p9_p5 = scmp.ge.s32.totalorder %s12_s11, 4   ;;  %s508_s10 = smov %s510_s12 }
  0xef   :  { %11 = sbr.rel (!%p9_p5) target bundleno = 2 (0x2), region = 65 }

// kernel: hourglass_forward.60
= control target key start
LH: loop header
LB: loop body
LE: loop exit
PB: predicated region body
PF: predicated region fallthrough
CT: control target
= control target key end

     0   :  { %s479_s9 = smov 0   ;;  %s481_s10 = smov 0   ;;  %s517_s0 = inlined_call_operand.vmem [shape: bf16[4,32], index: 0, kind: input, shape index: {}]   ;;  %s518_s1 = inlined_call_operand.vmem [shape: bf16[2,32,64], index: 1, kind: input, shape index: {}]   ;;  %s519_s2 = inlined_call_operand.vmem [shape: f32[2,4,64], index: 2, kind: output, shape index: {}]  }
   0x1   :  { %s483_s11 = smov 0  }
   0x2 LB: > { %s31_s12 = sadd.s32 1, %s456_s10  ;;  %p389_p0 = scmp.ge.s32.totalorder %s460_s11, 1  ;;  %s460_s11 = sphi %s483_s11, %s12_s11   ;;  %s456_s10 = sphi %s481_s10, %s521_s10   ;;  %s452_s9 = sphi %s479_s9, %s520_s9  }
   0x3   : > { %p33_p1 = scmp.ge.s32.totalorder %s31_s12, 2  ;;  %p154_p2 = scmp.lt.s32.totalorder %s460_s11, 3 }
   0x5   : > { %s523_s12 = smov (%p33_p1, %s31_s12), 0  ;;  %p155_p3 = pnand %p389_p0, %p154_p2 }
   0x6   : > { %p194_p4 = scmp.lt.s32.totalorder (!%p155_p3), %s452_s9, 1  ;;  %v462_v0 = vmov (!%p155_p3), 0.0   ;;  %vm463_vm0 = vmmov (!%p155_p3), 0   ;;  %vm218_vm1 = vcmask (!%p155_p3), 519168   ;;  %v221_v3 = vld [vmem:[%s517_s0] sm:$0x3] (!%p155_p3) }
   0x7   : > { %158 = sbr.rel (%p155_p3) target bundleno = 240 (0xf0), region = 28  ;;  %402 = vmatprep.subr.bf16.mxu0 (!%p155_p3), %v462_v0  ;;  %406 = vmatprep.mubr.msk.bf16.mxu0 (!%p155_p3), %vm463_vm0, %v462_v0  ;;  %vm238_vm2 = vcmask (!%p155_p3), 261120  }
   0xe   : > { %s525_s9 = smov (!%p194_p4, %s452_s9), 1 }
   0xf   : > { %s398_s13 = sshll.u32 %s525_s9, 4  ;;  %s392_s14 = sshll.u32 %s525_s9, 2 }
  0x10   : > { %s204_s17 = scalar_lea.vmem %s518_s1, %s398_s13  ;;  %s212_s20 = scalar_lea.vmem %s519_s2, %s392_s14 }
  0x11   : > { %v436_v1 = vld [vmem:[%s204_s17] sm:$0xff]   ;;  %219 = vst.msk [vmem:[%s212_s20] sm:$0xf] %vm218_vm1, %v462_v0  ;;  %v437_v2 = vld [vmem:[%s204_s17 + $0x8] sm:$0xff]  }
  0x12   : > { %403 = vmatpush3.bf16.msra.mxu0 %v436_v1 }
  0x13   : > { %404 = vmatprep.subr.bf16.mxu0 %v462_v0 }
  0x16   : > { %405 = vmatpush3.bf16.msra.mxu0 %v437_v2 }
  0x18   : > { %v220_v4 = vld [vmem:[%s212_s20] sm:$0xf] }
  0x19   : > { %407 = vmatmul.mubr.msk.bf16.vlgmr.msra.gmra.mrb[0].mxu0 %vm238_vm2, %v221_v3 }
  0xec   : > { %v276_v5 = vpop.f32.mrb[0].mxu0 }
  0xed   : > { %v282_v6 = vadd.f32 %v276_v5, %v220_v4  ;;  %v408_v7 = vpop.f32.mrb[1].mxu0 }
  0xee   : > { %v279_v8 = vpop.f32.mrb[2].mxu0 }
  0xef   : > { %284 = vst.msk [vmem:[%s212_s20] sm:$0xf] %vm218_vm1, %v282_v6  ;;  %v409_v9 = vpop.f32.mrb[3].mxu0 }
  0xf0 PF: > { %s12_s11 = sadd.s32 1, %s460_s11   ;;  %s520_s9 = smov %s456_s10 }
  0xf1   : > { %p9_p5 = scmp.ge.s32.totalorder %s12_s11, 4   ;;  %s521_s10 = smov %s523_s12 }
  0xf3   :  { %11 = sbr.rel (!%p9_p5) target bundleno = 2 (0x2), region = 65 }

// kernel: hourglass_forward.62
= control target key start
LH: loop header
LB: loop body
LE: loop exit
PB: predicated region body
PF: predicated region fallthrough
CT: control target
= control target key end

     0   :  { %s331_s9 = smov 0   ;;  %s333_s10 = smov 0   ;;  %s397_s0 = inlined_call_operand.vmem [shape: f32[2,4,512], index: 0, kind: input, shape index: {}]   ;;  %s398_s1 = inlined_call_operand.vmem [shape: f32[4,1], index: 1, kind: output, shape index: {0}]   ;;  %s399_s2 = inlined_call_operand.vmem [shape: f32[4,1], index: 2, kind: output, shape index: {1}]  }
   0x1   :  { %s335_s11 = smov 0   ;;  %s337_s12 = smov 0  }
   0x2   :  { %s339_s13 = smov 0  }
   0x3 LB: > { %s22_s14 = sadd.s32 1, %s305_s11  ;;  %s25_s15 = sadd.s32 1, %s309_s12  ;;  %s313_s13 = sphi %s339_s13, %s13_s13   ;;  %s309_s12 = sphi %s337_s12, %s403_s12   ;;  %s305_s11 = sphi %s335_s11, %s402_s11   ;;  %s301_s10 = sphi %s333_s10, %s401_s10   ;;  %s297_s9 = sphi %s331_s9, %s400_s9  }
   0x4   : > { %p23_p0 = scmp.ge.s32.totalorder %s22_s14, 4  ;;  %p229_p1 = scmp.ge.s32.totalorder %s313_s13, 1 }
   0x5   : > { %p122_p2 = scmp.lt.s32.totalorder %s313_s13, 9 }
   0x6   : > { %s405_s14 = smov (%p23_p0, %s22_s14), 0  ;;  %s407_s15 = smov (!%p23_p0, %s25_s15), %s309_s12 }
   0x7   : > { %p123_p3 = pnand %p229_p1, %p122_p2  ;;  %p27_p4 = scmp.ge.s32.totalorder %s407_s15, 2 }
   0x8   : > { %p142_p5 = scmp.lt.s32.totalorder (!%p123_p3), %s301_s10, 1  ;;  %p144_p6 = scmp.lt.s32.totalorder (!%p123_p3), %s297_s9, 3 }
   0x9   : > { %s409_s15 = smov (%p27_p4, %s407_s15), 0  ;;  %126 = sbr.rel (%p123_p3) target bundleno = 175 (0xaf), region = 24 }
   0xa   : > { %p150_p7 = scmp.eq.s32.totalorder (!%p123_p3), %s301_s10, 0  ;;  %p151_p8 = scmp.eq.s32.totalorder (!%p123_p3), %s297_s9, 0 }
   0xc   : > { %p152_p9 = pnand (!%p123_p3), %p151_p8, %p150_p7 }
  0x10   : > { %s411_s10 = smov (!%p142_p5, %s301_s10), 1  ;;  %s413_s9 = smov (!%p144_p6, %s297_s9), 3 }
  0x11   : > { %s230_s16 = sshll.u32 %s411_s10, 2  ;;  %155 = sbr.rel (%p152_p9) target bundleno = 24 (0x18), region = 28  ;;  %vm156_vm0 = vcmask (!%p152_p9), 3072   ;;  %v315_v0 = vmov (!%p152_p9), 0.0  }
  0x12   : > { %s147_s17 = sadd.s32 %s230_s16, %s413_s9  ;;  %157 = vst.msk [vmem:[%s398_s1] sm:$0xf] (!%p152_p9), %vm156_vm0, %v315_v0  ;;  %158 = vst.msk [vmem:[%s399_s2] sm:$0xf] (!%p152_p9), %vm156_vm0, %v315_v0 }
  0x13   : > { %s231_s18 = sshll.u32 %s147_s17, 2 }
  0x14   : > { %s149_s21 = scalar_lea.vmem %s397_s0, %s231_s18 }
  0x18 PF: > { %v159_v1 = vld [vmem:[%s149_s21] sm:$0xf]  ;;  %vm161_vm1 = vcmask 1043456   ;;  %vm166_vm2 = vcmask 3072  }
  0x19   : > { %v162_v2 = vsel %vm161_vm1, %v159_v1, 0.0  ;;  %v169_v3 = vmul.f32 %v159_v1, %v159_v1  ;;  %v160_v5 = vld [vmem:[%s398_s1] sm:$0xf] }
  0x1a   : > { %163 = vadd.xlane.f32.xlu0 %v162_v2  ;;  %v168_v8 = vld [vmem:[%s399_s2] sm:$0xf] }
  0x1b   : > { %v170_v4 = vsel %vm161_vm1, %v169_v3, 0.0 }
  0x1e   : > { %171 = vadd.xlane.f32.xlu0 %v170_v4 }
  0xa7   : > { %v164_v6 = vpop.xlane.xlu0 %163 }
  0xa8   : > { %v165_v7 = vadd.f32 %v164_v6, %v160_v5 }
  0xaa   : > { %167 = vst.msk [vmem:[%s398_s1] sm:$0xf] %vm166_vm2, %v165_v7 }
  0xab   : > { %v172_v9 = vpop.xlane.xlu0 %171 }
  0xac   : > { %v173_v10 = vadd.f32 %v172_v9, %v168_v8 }
  0xae   : > { %174 = vst.msk [vmem:[%s399_s2] sm:$0xf] %vm166_vm2, %v173_v10 }
  0xaf PF: > { %s13_s13 = sadd.s32 1, %s313_s13   ;;  %s400_s9 = smov %s305_s11 }
  0xb0   : > { %p10_p10 = scmp.ge.s32.totalorder %s13_s13, 10   ;;  %s401_s10 = smov %s309_s12 }
  0xb1   : > { %s402_s11 = smov %s405_s14  ;;  %s403_s12 = smov %s409_s15 }
  0xb2   :  { %12 = sbr.rel (!%p10_p10) target bundleno = 3 (0x3), region = 62 }

// kernel: hourglass_forward.63
= control target key start
LH: loop header
LB: loop body
LE: loop exit
PB: predicated region body
PF: predicated region fallthrough
CT: control target
= control target key end

     0   :  { %s504_s15 = smov 0   ;;  %s506_s16 = smov 0   ;;  %s564_s0 = inlined_call_operand.vmem [shape: f32[2,4,512], index: 0, kind: input, shape index: {}]   ;;  %s565_s1 = inlined_call_operand.vmem [shape: f32[2,4,512], index: 1, kind: input, shape index: {}]   ;;  %s566_s2 = inlined_call_operand.vmem [shape: f32[4,1], index: 2, kind: input, shape index: {}]   ;;  %s567_s3 = inlined_call_operand.vmem [shape: f32[4,1], index: 3, kind: input, shape index: {}]   ;;  %s568_s4 = inlined_call_operand.vmem [shape: f32[2,4,512], index: 4, kind: output, shape index: {}]  }
   0x1   :  { %s508_s17 = smov 0   ;;  %s510_s18 = smov 0  }
   0x2   :  { %s512_s19 = smov 0  }
   0x3 LB: > { %s23_s20 = sadd.s32 1, %s468_s17  ;;  %s26_s21 = sadd.s32 1, %s472_s18  ;;  %s476_s19 = sphi %s512_s19, %s14_s19   ;;  %s472_s18 = sphi %s510_s18, %s572_s18   ;;  %s468_s17 = sphi %s508_s17, %s571_s17   ;;  %s464_s16 = sphi %s506_s16, %s570_s16   ;;  %s460_s15 = sphi %s504_s15, %s569_s15  }
   0x4   : > { %p24_p0 = scmp.ge.s32.totalorder %s23_s20, 4  ;;  %p387_p1 = scmp.ge.s32.totalorder %s476_s19, 1 }
   0x5   : > { %p196_p2 = scmp.lt.s32.totalorder %s476_s19, 9 }
   0x6   : > { %s574_s20 = smov (%p24_p0, %s23_s20), 0  ;;  %s576_s21 = smov (!%p24_p0, %s26_s21), %s472_s18 }
   0x7   : > { %p197_p3 = pnand %p387_p1, %p196_p2  ;;  %p28_p4 = scmp.ge.s32.totalorder %s576_s21, 2 }
   0x8   : > { %v261_v0 = vld [vmem:[%s566_s2] sm:$0xf] (!%p197_p3)  ;;  %v478_v1 = vmov (!%p197_p3), 0   ;;  %p236_p5 = scmp.lt.s32.totalorder (!%p197_p3), %s464_s16, 1  ;;  %p238_p6 = scmp.lt.s32.totalorder (!%p197_p3), %s460_s15, 3 }
   0x9   : > { %s578_s21 = smov (%p28_p4, %s576_s21), 0  ;;  %200 = sbr.rel (%p197_p3) target bundleno = 150 (0x96), region = 36 }
   0xa   : > { %437 = vset.pattern.permute.xlu0 (!%p197_p3), %v478_v1  ;;  %v268_v2 = vld [vmem:[%s567_s3] sm:$0xf] (!%p197_p3) }
   0xb   : > { %264 = vperm.xlu0 (!%p197_p3), %437, %v261_v0  }
   0xf   : > { %271 = vperm.xlu0 (!%p197_p3), %437, %v268_v2  }
  0x10   : > { %s580_s16 = smov (!%p236_p5, %s464_s16), 1  ;;  %s582_s15 = smov (!%p238_p6, %s460_s15), 3 }
  0x11   : > { %s388_s26 = sshll.u32 %s580_s16, 2 }
  0x12   : > { %s241_s27 = sadd.s32 %s388_s26, %s582_s15 }
  0x13   : > { %s389_s28 = sshll.u32 %s241_s27, 2 }
  0x14   : > { %s243_s5 = scalar_lea.vmem %s564_s0, %s389_s28  ;;  %s251_s8 = scalar_lea.vmem %s565_s1, %s389_s28 }
  0x15   : > { %v260_v4 = vld [vmem:[%s243_s5] sm:$0xf]  ;;  %s259_s11 = scalar_lea.vmem %s568_s4, %s389_s28 }
  0x16   : > { %v275_v7 = vld [vmem:[%s251_s8] sm:$0xf] }
  0x8a   : > { %v265_v3 = vpop.permute.xlu0 %264 }
  0x8b   : > { %v267_v5 = vmul.f32 %v265_v3, %v260_v4 }
  0x8e   : > { %v272_v6 = vpop.permute.xlu0 %271 }
  0x8f   : > { %v274_v8 = vadd.f32 %v272_v6, %v267_v5 }
  0x91   : > { %v276_v9 = vadd.f32 %v275_v7, %v274_v8 }
  0x93   : > { %v277_v10 = vmax.f32 %v276_v9, 0.0 }
  0x95   : > { %278 = vst [vmem:[%s259_s11] sm:$0xf] %v277_v10 }
  0x96 PF: > { %s14_s19 = sadd.s32 1, %s476_s19   ;;  %s569_s15 = smov %s468_s17 }
  0x97   : > { %p11_p7 = scmp.ge.s32.totalorder %s14_s19, 10   ;;  %s570_s16 = smov %s472_s18 }
  0x98   : > { %s571_s17 = smov %s574_s20  ;;  %s572_s18 = smov %s578_s21 }
  0x99   :  { %13 = sbr.rel (!%p11_p7) target bundleno = 3 (0x3), region = 69 }

</bundles_post_ra>
